<compile_context>
chip_gen: v6e
topology: v6e:2x2x1
jax: 0.10.0
libtpu: 0.0.40
codegen_flags: <defaults>
</compile_context>

<pallas_src>
import functools

import numpy as np
import jax
import jax.numpy as jnp
from jax.experimental import pallas as pl
from jax.experimental.pallas import tpu as pltpu


# ----------------------------- configuration ------------------------------

def make_cfg(in_ch, num_conv):
    """(kernel, padding, cin, cout) for the 9 conv blocks of CNN9."""
    C = num_conv
    return (
        (3, 1, in_ch, C), (3, 1, C, C), (3, 1, C, C),
        (3, 1, C, 2 * C), (3, 1, 2 * C, 2 * C), (3, 1, 2 * C, 2 * C),
        (3, 0, 2 * C, 2 * C), (1, 1, 2 * C, 2 * C), (1, 1, 2 * C, 128),
    )


def _geometry(H, W):
    """Static per-image canvas geometry for the fused kernel."""
    g = {}
    # stage A: H x W image, 3x3/pad-1 convs -> (H+2) x (W+2) canvas
    g["HA"], g["WA"] = H, W
    g["HPA"], g["WPA"] = H + 2, W + 2
    g["LA"] = g["HPA"] * g["WPA"]
    g["EA"] = g["WPA"] + 1                      # extension for shifted taps
    # maxpool -> stage B
    g["HB"], g["WB"] = H // 2, W // 2
    g["HPB"], g["WPB"] = g["HB"] + 2, g["WB"] + 2
    g["LB"] = g["HPB"] * g["WPB"]
    g["EB"] = g["WPB"] + 1
    # maxpool -> stage C (input of the 3x3/pad-0 conv), pad-0 canvas
    g["HC"], g["WC"] = g["HB"] // 2, g["WB"] // 2
    g["LC"] = g["HC"] * g["WC"]
    g["EC"] = g["WC"] + 1
    # layer-8 input canvas: (HC x WC image from layer 7) + pad 1
    g["HD"], g["WD"] = g["HC"] + 2, g["WC"] + 2
    g["LD"] = g["HD"] * g["WD"]
    return g


def _interior_mask(hp, wp, oy, nh, ox, nw):
    m = np.zeros((hp, wp), np.float32)
    m[oy:oy + nh, ox:ox + nw] = 1.0
    return jnp.asarray(m.reshape(1, hp * wp))


# ------------------------------ fused kernel -------------------------------

def _build_kernel(cfg, g):
    EA, WPA, LA = g["EA"], g["WPA"], g["LA"]
    EB, WPB, LB, HB, WB = g["EB"], g["WPB"], g["LB"], g["HB"], g["WB"]
    EC, WC, LC, HC = g["EC"], g["WC"], g["LC"], g["HC"]
    WD, LD = g["WD"], g["LD"]
    ksizes = tuple(c[0] for c in cfg)

    def conv(src, w_ref, sb_ref, *, k, ext, wp, lc, oy, ox, mask=None):
        """Conv(kxk) + folded-BN affine + LeakyReLU(0.1) on a flat canvas.

        src: (Cin, lc + 2*ext) f32 canvas value (halo/extension lanes are 0).
        Destination flat position p reads source p + (dy-oy)*wp + (dx-ox).
        Returns (Cout, lc) f32 (lane-dense: spatial on lanes).
        """
        cout = w_ref.shape[1]
        s16 = src.astype(jnp.bfloat16)                 # bf16 MXU operands
        acc = jnp.zeros((cout, lc), jnp.float32)
        for dy in range(k):
            for dx in range(k):
                off = (dy - oy) * wp + (dx - ox)
                sl = s16[:, ext + off: ext + off + lc]
                acc = acc + jnp.dot(w_ref[dy * k + dx], sl,
                                    preferred_element_type=jnp.float32)
        y = acc * sb_ref[0] + sb_ref[1]                # folded BatchNorm (f32)
        y = jnp.maximum(y, 0.1 * y)                    # LeakyReLU(0.1)
        if mask is not None:
            y = y * mask                               # zero the halo ring
        return y

    def maxpool(src, dst_ref, *, src_wp, src_e, hout, wout,
                dst_wp, dst_e, dst_oy, dst_ox):
        """2x2 / stride-2 max pool, canvas value -> canvas ref (one image)."""
        n = 2 * wout
        cin = src.shape[0]
        r = jax.lax.broadcasted_iota(jnp.int32, (n, wout), 0)
        c = jax.lax.broadcasted_iota(jnp.int32, (n, wout), 1)
        sel_e = (r == 2 * c).astype(jnp.float32)       # picks even columns
        sel_o = (r == 2 * c + 1).astype(jnp.float32)   # picks odd columns
        for yo in range(hout):
            s0 = src_e + (2 * yo + 1) * src_wp + 1
            s1 = s0 + src_wp
            v = jnp.maximum(src[:, s0:s0 + n], src[:, s1:s1 + n])
            h = jnp.maximum(
                jnp.dot(v, sel_e, preferred_element_type=jnp.float32),
                jnp.dot(v, sel_o, preferred_element_type=jnp.float32))
            d = dst_e + (dst_oy + yo) * dst_wp + dst_ox
            dst_ref[0:cin, d:d + wout] = h

    def kernel(x_ref, *refs):
        w = refs[0:9]                  # per-layer (k*k, Cout, Cin) bf16
        sb = refs[9:18]                # per-layer (2, Cout, 1) f32 scale/bias
        m_a, m_b, m_c = refs[18], refs[19], refs[20]
        lw_ref, lb_ref = refs[21], refs[22]
        out_ref = refs[23]
        a0, a1, b0, b1, c0, c1, d0 = refs[24:31]

        # Halo + extension lanes of every canvas must read as zero.
        for ref in (a0, a1, b0, b1, c0, c1, d0):
            ref[...] = jnp.zeros(ref.shape, ref.dtype)

        mA, mB, mC = m_a[...], m_b[...], m_c[...]

        # -------- stage A: three 3x3 / pad-1 conv blocks --------
        a0[:, EA:EA + LA] = conv(x_ref[0], w[0], sb[0], k=ksizes[0],
                                 ext=EA, wp=WPA, lc=LA, oy=1, ox=1, mask=mA)
        a1[:, EA:EA + LA] = conv(a0[...], w[1], sb[1], k=ksizes[1],
                                 ext=EA, wp=WPA, lc=LA, oy=1, ox=1, mask=mA)
        a0[:, EA:EA + LA] = conv(a1[...], w[2], sb[2], k=ksizes[2],
                                 ext=EA, wp=WPA, lc=LA, oy=1, ox=1, mask=mA)

        # MaxPool2d(2,2); Dropout2d is identity in eval mode.
        maxpool(a0[...], b0, src_wp=WPA, src_e=EA, hout=HB, wout=WB,
                dst_wp=WPB, dst_e=EB, dst_oy=1, dst_ox=1)

        # -------- stage B: three 3x3 / pad-1 conv blocks --------
        b1[:, EB:EB + LB] = conv(b0[...], w[3], sb[3], k=ksizes[3],
                                 ext=EB, wp=WPB, lc=LB, oy=1, ox=1, mask=mB)
        b0[:, EB:EB + LB] = conv(b1[...], w[4], sb[4], k=ksizes[4],
                                 ext=EB, wp=WPB, lc=LB, oy=1, ox=1, mask=mB)
        b1[:, EB:EB + LB] = conv(b0[...], w[5], sb[5], k=ksizes[5],
                                 ext=EB, wp=WPB, lc=LB, oy=1, ox=1, mask=mB)

        # MaxPool2d(2,2)
        maxpool(b1[...], c0, src_wp=WPB, src_e=EB, hout=HC, wout=WC,
                dst_wp=WC, dst_e=EC, dst_oy=0, dst_ox=0)

        # -------- layer 6: 3x3 conv, pad 0 (output written at (+1,+1) into
        #          the pad-1 canvas consumed by the next 1x1/pad-1 conv) -----
        c1[:, EC:EC + LC] = conv(c0[...], w[6], sb[6], k=ksizes[6],
                                 ext=EC, wp=WC, lc=LC, oy=1, ox=1, mask=mC)

        # -------- layer 7: 1x1 conv, pad 1 (ring outputs = BN bias) --------
        y7 = conv(c1[...], w[7], sb[7], k=ksizes[7],
                  ext=EC, wp=WC, lc=LC, oy=0, ox=0)

        # place the HC x WC layer-7 output into layer-8's pad-1 canvas
        for yy in range(HC):
            dd = (yy + 1) * WD + 1
            d0[:, dd:dd + WC] = y7[:, yy * WC:(yy + 1) * WC]

        # -------- layer 8: 1x1 conv, pad 1 -> 128 channels --------
        y8 = conv(d0[...], w[8], sb[8], k=ksizes[8],
                  ext=0, wp=WD, lc=LD, oy=0, ox=0)          # (128, LD)

        # -------- AdaptiveAvgPool2d((1,1)) + Linear(128, 10) --------
        pooled = jnp.sum(y8, axis=1, keepdims=True) * (1.0 / LD)   # (128, 1)
        logits = (jnp.sum(pooled * lw_ref[...], axis=0, keepdims=True)
                  + lb_ref[...])                                   # (1, 10)
        out_ref[0] = logits

    return kernel


# ------------------------------ JAX wrapper --------------------------------

def init_params(key, cfg):
    """Deterministic synthetic parameters (shapes match CNN9.__init__)."""
    eps = 2e-5
    convs = []
    for (k, _pad, cin, cout) in cfg:
        key, kw_, kg, kb, km, kv = jax.random.split(key, 6)
        w = jax.random.normal(kw_, (k, k, cin, cout), jnp.float32) \
            * (2.0 / (k * k * cin)) ** 0.5
        gamma = jax.random.uniform(kg, (cout,), jnp.float32, 0.5, 1.5)
        beta = jax.random.normal(kb, (cout,), jnp.float32) * 0.1
        rmean = jax.random.normal(km, (cout,), jnp.float32) * 0.1
        rvar = jax.random.uniform(kv, (cout,), jnp.float32, 0.5, 1.5)
        scale = gamma / jnp.sqrt(rvar + eps)      # folded BN (eval mode)
        bias = beta - rmean * scale
        convs.append((w, scale, bias))
    key, kl, kbl = jax.random.split(key, 3)
    lin_w = jax.random.normal(kl, (128, 10), jnp.float32) * (1.0 / 128.0) ** 0.5
    lin_b = jax.random.normal(kbl, (10,), jnp.float32) * 0.1
    return {"convs": convs, "lin_w": lin_w, "lin_b": lin_b}


def cnn9_forward(params, x_nchw, *, cfg):
    # TODO(synk): training-mode channel dropout / batch-stat BN not implemented.
    B, Cin, H, W = x_nchw.shape
    assert H % 4 == 0 and W % 4 == 0 and H >= 12 and W >= 12
    g = _geometry(H, W)
    CA = cfg[0][3]              # num_conv
    CB = cfg[3][3]              # 2 * num_conv

    # input NCHW -> flat padded canvas (B, Cin, LA + 2*EA); channels->sublanes
    xf = jnp.pad(x_nchw.astype(jnp.float32),
                 ((0, 0), (0, 0), (1, 1), (1, 1))).reshape(B, Cin, g["LA"])
    xc = jnp.pad(xf, ((0, 0), (0, 0), (g["EA"], g["EA"])))

    # weights: (k,k,cin,cout) -> (k*k, cout, cin) bf16; BN folded scale/bias
    w_list, sb_list = [], []
    for i, (k, _pad, cin, cout) in enumerate(cfg):
        w, scale, bias = params["convs"][i]
        wt = jnp.transpose(w, (0, 1, 3, 2)).reshape(k * k, cout, cin)
        if i == 3:
            # pooled stage-A activations live in a CB-channel canvas whose
            # upper channels are zero; pad Cin so no in-kernel slicing needed
            wt = jnp.pad(wt, ((0, 0), (0, 0), (0, CB - cin)))
        w_list.append(wt.astype(jnp.bfloat16))
        sb_list.append(jnp.stack([scale.reshape(-1, 1),
                                  bias.reshape(-1, 1)], axis=0))

    m_a = _interior_mask(g["HPA"], g["WPA"], 1, g["HA"], 1, g["WA"])
    m_b = _interior_mask(g["HPB"], g["WPB"], 1, g["HB"], 1, g["WB"])
    m_c = _interior_mask(g["HC"], g["WC"], 1, g["HC"] - 2, 1, g["WC"] - 2)

    lw = params["lin_w"].astype(jnp.float32)            # (128, 10)
    lb = params["lin_b"].reshape(1, 10).astype(jnp.float32)

    const2 = lambda b: (0, 0)
    const3 = lambda b: (0, 0, 0)
    in_specs = [pl.BlockSpec((1, Cin, xc.shape[-1]), lambda b: (b, 0, 0))]
    in_specs += [pl.BlockSpec(wt.shape, const3) for wt in w_list]
    in_specs += [pl.BlockSpec(sbi.shape, const3) for sbi in sb_list]
    in_specs += [pl.BlockSpec(m.shape, const2) for m in (m_a, m_b, m_c)]
    in_specs += [pl.BlockSpec(lw.shape, const2), pl.BlockSpec(lb.shape, const2)]

    scratch = [
        pltpu.VMEM((CA, g["LA"] + 2 * g["EA"]), jnp.float32),   # a0
        pltpu.VMEM((CA, g["LA"] + 2 * g["EA"]), jnp.float32),   # a1
        pltpu.VMEM((CB, g["LB"] + 2 * g["EB"]), jnp.float32),   # b0
        pltpu.VMEM((CB, g["LB"] + 2 * g["EB"]), jnp.float32),   # b1
        pltpu.VMEM((CB, g["LC"] + 2 * g["EC"]), jnp.float32),   # c0
        pltpu.VMEM((CB, g["LC"] + 2 * g["EC"]), jnp.float32),   # c1
        pltpu.VMEM((CB, g["LD"]), jnp.float32),                 # d0
    ]

    kernel = _build_kernel(cfg, g)
    out = pl.pallas_call(
        kernel,
        out_shape=jax.ShapeDtypeStruct((B, 1, 10), jnp.float32),
        grid=(B,),
        in_specs=in_specs,
        out_specs=pl.BlockSpec((1, 1, 10), lambda b: (b, 0, 0)),
        scratch_shapes=scratch,
        compiler_params=pltpu.CompilerParams(
            dimension_semantics=("parallel",)),
    )(xc, *w_list, *sb_list, m_a, m_b, m_c, lw, lb)
    return out.reshape(B, 10)


if __name__ == "__main__":
    key = jax.random.PRNGKey(0)
    kx, kp = jax.random.split(key)

    # Small shapes consistent with the module: NCHW input, 3 channels.
    x = jax.random.normal(kx, (2, 3, 16, 16), jnp.float32)
    cfg = make_cfg(in_ch=3, num_conv=8)
    params = init_params(kp, cfg)

    fwd = jax.jit(functools.partial(cnn9_forward, cfg=cfg))
    out = jax.block_until_ready(fwd(params, x))

    assert out.shape == (2, 10), out.shape
    assert bool(jnp.all(jnp.isfinite(out)))
    print("KERNEL_OK")
</pallas_src>

<mosaic_0001>
module attributes {stable_mosaic.version = 11 : i64} {
  func.func @kernel(%arg0: i32, %arg1: memref<1x3x362xf32, #tpu.memory_space<vmem>>, %arg2: memref<9x8x3xbf16, #tpu.memory_space<vmem>>, %arg3: memref<9x8x8xbf16, #tpu.memory_space<vmem>>, %arg4: memref<9x8x8xbf16, #tpu.memory_space<vmem>>, %arg5: memref<9x16x16xbf16, #tpu.memory_space<vmem>>, %arg6: memref<9x16x16xbf16, #tpu.memory_space<vmem>>, %arg7: memref<9x16x16xbf16, #tpu.memory_space<vmem>>, %arg8: memref<9x16x16xbf16, #tpu.memory_space<vmem>>, %arg9: memref<1x16x16xbf16, #tpu.memory_space<vmem>>, %arg10: memref<1x128x16xbf16, #tpu.memory_space<vmem>>, %arg11: memref<2x8x1xf32, #tpu.memory_space<vmem>>, %arg12: memref<2x8x1xf32, #tpu.memory_space<vmem>>, %arg13: memref<2x8x1xf32, #tpu.memory_space<vmem>>, %arg14: memref<2x16x1xf32, #tpu.memory_space<vmem>>, %arg15: memref<2x16x1xf32, #tpu.memory_space<vmem>>, %arg16: memref<2x16x1xf32, #tpu.memory_space<vmem>>, %arg17: memref<2x16x1xf32, #tpu.memory_space<vmem>>, %arg18: memref<2x16x1xf32, #tpu.memory_space<vmem>>, %arg19: memref<2x128x1xf32, #tpu.memory_space<vmem>>, %arg20: memref<1x324xf32, #tpu.memory_space<vmem>>, %arg21: memref<1x100xf32, #tpu.memory_space<vmem>>, %arg22: memref<1x16xf32, #tpu.memory_space<vmem>>, %arg23: memref<128x10xf32, #tpu.memory_space<vmem>>, %arg24: memref<1x10xf32, #tpu.memory_space<vmem>>, %arg25: memref<1x1x10xf32, #tpu.memory_space<vmem>>, %arg26: memref<8x362xf32, #tpu.memory_space<vmem>>, %arg27: memref<8x362xf32, #tpu.memory_space<vmem>>, %arg28: memref<16x122xf32, #tpu.memory_space<vmem>>, %arg29: memref<16x122xf32, #tpu.memory_space<vmem>>, %arg30: memref<16x26xf32, #tpu.memory_space<vmem>>, %arg31: memref<16x26xf32, #tpu.memory_space<vmem>>, %arg32: memref<16x36xf32, #tpu.memory_space<vmem>>) attributes {dimension_semantics = [#tpu.dimension_semantics<parallel>], iteration_bounds = array<i64: 2>, scalar_prefetch = 0 : i64, scratch_operands = 7 : i64, tpu.core_type = #tpu.core_type<tc>, window_params = [{transform_indices = @transform_0, window_bounds = array<i64: 1, 3, 362>}, {pipeline_mode = #tpu.pipeline_mode<synchronous>, transform_indices = @transform_1, window_bounds = array<i64: 9, 8, 3>}, {pipeline_mode = #tpu.pipeline_mode<synchronous>, transform_indices = @transform_2, window_bounds = array<i64: 9, 8, 8>}, {pipeline_mode = #tpu.pipeline_mode<synchronous>, transform_indices = @transform_3, window_bounds = array<i64: 9, 8, 8>}, {pipeline_mode = #tpu.pipeline_mode<synchronous>, transform_indices = @transform_4, window_bounds = array<i64: 9, 16, 16>}, {pipeline_mode = #tpu.pipeline_mode<synchronous>, transform_indices = @transform_5, window_bounds = array<i64: 9, 16, 16>}, {pipeline_mode = #tpu.pipeline_mode<synchronous>, transform_indices = @transform_6, window_bounds = array<i64: 9, 16, 16>}, {pipeline_mode = #tpu.pipeline_mode<synchronous>, transform_indices = @transform_7, window_bounds = array<i64: 9, 16, 16>}, {pipeline_mode = #tpu.pipeline_mode<synchronous>, transform_indices = @transform_8, window_bounds = array<i64: 1, 16, 16>}, {pipeline_mode = #tpu.pipeline_mode<synchronous>, transform_indices = @transform_9, window_bounds = array<i64: 1, 128, 16>}, {pipeline_mode = #tpu.pipeline_mode<synchronous>, transform_indices = @transform_10, window_bounds = array<i64: 2, 8, 1>}, {pipeline_mode = #tpu.pipeline_mode<synchronous>, transform_indices = @transform_11, window_bounds = array<i64: 2, 8, 1>}, {pipeline_mode = #tpu.pipeline_mode<synchronous>, transform_indices = @transform_12, window_bounds = array<i64: 2, 8, 1>}, {pipeline_mode = #tpu.pipeline_mode<synchronous>, transform_indices = @transform_13, window_bounds = array<i64: 2, 16, 1>}, {pipeline_mode = #tpu.pipeline_mode<synchronous>, transform_indices = @transform_14, window_bounds = array<i64: 2, 16, 1>}, {pipeline_mode = #tpu.pipeline_mode<synchronous>, transform_indices = @transform_15, window_bounds = array<i64: 2, 16, 1>}, {pipeline_mode = #tpu.pipeline_mode<synchronous>, transform_indices = @transform_16, window_bounds = array<i64: 2, 16, 1>}, {pipeline_mode = #tpu.pipeline_mode<synchronous>, transform_indices = @transform_17, window_bounds = array<i64: 2, 16, 1>}, {pipeline_mode = #tpu.pipeline_mode<synchronous>, transform_indices = @transform_18, window_bounds = array<i64: 2, 128, 1>}, {pipeline_mode = #tpu.pipeline_mode<synchronous>, transform_indices = @transform_19, window_bounds = array<i64: 1, 324>}, {pipeline_mode = #tpu.pipeline_mode<synchronous>, transform_indices = @transform_20, window_bounds = array<i64: 1, 100>}, {pipeline_mode = #tpu.pipeline_mode<synchronous>, transform_indices = @transform_21, window_bounds = array<i64: 1, 16>}, {pipeline_mode = #tpu.pipeline_mode<synchronous>, transform_indices = @transform_22, window_bounds = array<i64: 128, 10>}, {pipeline_mode = #tpu.pipeline_mode<synchronous>, transform_indices = @transform_23, window_bounds = array<i64: 1, 10>}, {transform_indices = @transform_24, window_bounds = array<i64: 1, 1, 10>}]} {
    %cst = arith.constant 0.000000e+00 : f32
    %0 = vector.broadcast %cst : f32 to vector<8x362xf32>
    %c0 = arith.constant 0 : index
    %c0_0 = arith.constant 0 : index
    %1 = vector.load %arg26[%c0, %c0_0] : memref<8x362xf32, #tpu.memory_space<vmem>>, vector<8x362xf32>
    tpu.vector_store %arg26[%c0, %c0_0], %0 {strides = array<i32>} : memref<8x362xf32, #tpu.memory_space<vmem>>, vector<8x362xf32>,
    %cst_1 = arith.constant 0.000000e+00 : f32
    %2 = vector.broadcast %cst_1 : f32 to vector<8x362xf32>
    %c0_2 = arith.constant 0 : index
    %c0_3 = arith.constant 0 : index
    %3 = vector.load %arg27[%c0_2, %c0_3] : memref<8x362xf32, #tpu.memory_space<vmem>>, vector<8x362xf32>
    tpu.vector_store %arg27[%c0_2, %c0_3], %2 {strides = array<i32>} : memref<8x362xf32, #tpu.memory_space<vmem>>, vector<8x362xf32>,
    %cst_4 = arith.constant 0.000000e+00 : f32
    %4 = vector.broadcast %cst_4 : f32 to vector<16x122xf32>
    %c0_5 = arith.constant 0 : index
    %c0_6 = arith.constant 0 : index
    %5 = vector.load %arg28[%c0_5, %c0_6] : memref<16x122xf32, #tpu.memory_space<vmem>>, vector<16x122xf32>
    tpu.vector_store %arg28[%c0_5, %c0_6], %4 {strides = array<i32>} : memref<16x122xf32, #tpu.memory_space<vmem>>, vector<16x122xf32>,
    %cst_7 = arith.constant 0.000000e+00 : f32
    %6 = vector.broadcast %cst_7 : f32 to vector<16x122xf32>
    %c0_8 = arith.constant 0 : index
    %c0_9 = arith.constant 0 : index
    %7 = vector.load %arg29[%c0_8, %c0_9] : memref<16x122xf32, #tpu.memory_space<vmem>>, vector<16x122xf32>
    tpu.vector_store %arg29[%c0_8, %c0_9], %6 {strides = array<i32>} : memref<16x122xf32, #tpu.memory_space<vmem>>, vector<16x122xf32>,
    %cst_10 = arith.constant 0.000000e+00 : f32
    %8 = vector.broadcast %cst_10 : f32 to vector<16x26xf32>
    %c0_11 = arith.constant 0 : index
    %c0_12 = arith.constant 0 : index
    %9 = vector.load %arg30[%c0_11, %c0_12] : memref<16x26xf32, #tpu.memory_space<vmem>>, vector<16x26xf32>
    tpu.vector_store %arg30[%c0_11, %c0_12], %8 {strides = array<i32>} : memref<16x26xf32, #tpu.memory_space<vmem>>, vector<16x26xf32>,
    %cst_13 = arith.constant 0.000000e+00 : f32
    %10 = vector.broadcast %cst_13 : f32 to vector<16x26xf32>
    %c0_14 = arith.constant 0 : index
    %c0_15 = arith.constant 0 : index
    %11 = vector.load %arg31[%c0_14, %c0_15] : memref<16x26xf32, #tpu.memory_space<vmem>>, vector<16x26xf32>
    tpu.vector_store %arg31[%c0_14, %c0_15], %10 {strides = array<i32>} : memref<16x26xf32, #tpu.memory_space<vmem>>, vector<16x26xf32>,
    %cst_16 = arith.constant 0.000000e+00 : f32
    %12 = vector.broadcast %cst_16 : f32 to vector<16x36xf32>
    %c0_17 = arith.constant 0 : index
    %c0_18 = arith.constant 0 : index
    %13 = vector.load %arg32[%c0_17, %c0_18] : memref<16x36xf32, #tpu.memory_space<vmem>>, vector<16x36xf32>
    tpu.vector_store %arg32[%c0_17, %c0_18], %12 {strides = array<i32>} : memref<16x36xf32, #tpu.memory_space<vmem>>, vector<16x36xf32>,
    %c0_19 = arith.constant 0 : index
    %c0_20 = arith.constant 0 : index
    %14 = vector.load %arg20[%c0_19, %c0_20] : memref<1x324xf32, #tpu.memory_space<vmem>>, vector<1x324xf32>
    %c0_21 = arith.constant 0 : index
    %c0_22 = arith.constant 0 : index
    %15 = vector.load %arg21[%c0_21, %c0_22] : memref<1x100xf32, #tpu.memory_space<vmem>>, vector<1x100xf32>
    %c0_23 = arith.constant 0 : index
    %c0_24 = arith.constant 0 : index
    %16 = vector.load %arg22[%c0_23, %c0_24] : memref<1x16xf32, #tpu.memory_space<vmem>>, vector<1x16xf32>
    %c0_25 = arith.constant 0 : index
    %c0_26 = arith.constant 0 : index
    %c0_27 = arith.constant 0 : index
    %17 = vector.load %arg1[%c0_25, %c0_26, %c0_27] : memref<1x3x362xf32, #tpu.memory_space<vmem>>, vector<1x3x362xf32>
    %18 = vector.shape_cast %17 : vector<1x3x362xf32> to vector<3x362xf32>
    %19 = arith.truncf %18 : vector<3x362xf32> to vector<3x362xbf16>
    %cst_28 = arith.constant 0.000000e+00 : f32
    %20 = vector.broadcast %cst_28 : f32 to vector<8x324xf32>
    %21 = vector.extract_strided_slice %19 {offsets = [0, 0], sizes = [3, 324], strides = [1, 1]} : vector<3x362xbf16> to vector<3x324xbf16>
    %c0_29 = arith.constant 0 : index
    %c0_30 = arith.constant 0 : index
    %c0_31 = arith.constant 0 : index
    %22 = vector.load %arg2[%c0_29, %c0_30, %c0_31] : memref<9x8x3xbf16, #tpu.memory_space<vmem>>, vector<1x8x3xbf16>
    %23 = vector.shape_cast %22 : vector<1x8x3xbf16> to vector<8x3xbf16>
    %cst_32 = arith.constant dense<0.000000e+00> : vector<8x324xf32>
    %24 = tpu.matmul %23, %21, %cst_32 {dimension_numbers = #tpu.dot_dimension_numbers<[1], [0], [0], [1], [0, 0, 1, 1], [], []>} : vector<8x3xbf16>, vector<3x324xbf16>, vector<8x324xf32> -> vector<8x324xf32>
    %25 = arith.addf %20, %24 : vector<8x324xf32>
    %26 = vector.extract_strided_slice %19 {offsets = [0, 1], sizes = [3, 324], strides = [1, 1]} : vector<3x362xbf16> to vector<3x324xbf16>
    %c1 = arith.constant 1 : index
    %c0_33 = arith.constant 0 : index
    %c0_34 = arith.constant 0 : index
    %27 = vector.load %arg2[%c1, %c0_33, %c0_34] : memref<9x8x3xbf16, #tpu.memory_space<vmem>>, vector<1x8x3xbf16>
    %28 = vector.shape_cast %27 : vector<1x8x3xbf16> to vector<8x3xbf16>
    %cst_35 = arith.constant dense<0.000000e+00> : vector<8x324xf32>
    %29 = tpu.matmul %28, %26, %cst_35 {dimension_numbers = #tpu.dot_dimension_numbers<[1], [0], [0], [1], [0, 0, 1, 1], [], []>} : vector<8x3xbf16>, vector<3x324xbf16>, vector<8x324xf32> -> vector<8x324xf32>
    %30 = arith.addf %25, %29 : vector<8x324xf32>
    %31 = vector.extract_strided_slice %19 {offsets = [0, 2], sizes = [3, 324], strides = [1, 1]} : vector<3x362xbf16> to vector<3x324xbf16>
    %c2 = arith.constant 2 : index
    %c0_36 = arith.constant 0 : index
    %c0_37 = arith.constant 0 : index
    %32 = vector.load %arg2[%c2, %c0_36, %c0_37] : memref<9x8x3xbf16, #tpu.memory_space<vmem>>, vector<1x8x3xbf16>
    %33 = vector.shape_cast %32 : vector<1x8x3xbf16> to vector<8x3xbf16>
    %cst_38 = arith.constant dense<0.000000e+00> : vector<8x324xf32>
    %34 = tpu.matmul %33, %31, %cst_38 {dimension_numbers = #tpu.dot_dimension_numbers<[1], [0], [0], [1], [0, 0, 1, 1], [], []>} : vector<8x3xbf16>, vector<3x324xbf16>, vector<8x324xf32> -> vector<8x324xf32>
    %35 = arith.addf %30, %34 : vector<8x324xf32>
    %36 = vector.extract_strided_slice %19 {offsets = [0, 18], sizes = [3, 324], strides = [1, 1]} : vector<3x362xbf16> to vector<3x324xbf16>
    %c3 = arith.constant 3 : index
    %c0_39 = arith.constant 0 : index
    %c0_40 = arith.constant 0 : index
    %37 = vector.load %arg2[%c3, %c0_39, %c0_40] : memref<9x8x3xbf16, #tpu.memory_space<vmem>>, vector<1x8x3xbf16>
    %38 = vector.shape_cast %37 : vector<1x8x3xbf16> to vector<8x3xbf16>
    %cst_41 = arith.constant dense<0.000000e+00> : vector<8x324xf32>
    %39 = tpu.matmul %38, %36, %cst_41 {dimension_numbers = #tpu.dot_dimension_numbers<[1], [0], [0], [1], [0, 0, 1, 1], [], []>} : vector<8x3xbf16>, vector<3x324xbf16>, vector<8x324xf32> -> vector<8x324xf32>
    %40 = arith.addf %35, %39 : vector<8x324xf32>
    %41 = vector.extract_strided_slice %19 {offsets = [0, 19], sizes = [3, 324], strides = [1, 1]} : vector<3x362xbf16> to vector<3x324xbf16>
    %c4 = arith.constant 4 : index
    %c0_42 = arith.constant 0 : index
    %c0_43 = arith.constant 0 : index
    %42 = vector.load %arg2[%c4, %c0_42, %c0_43] : memref<9x8x3xbf16, #tpu.memory_space<vmem>>, vector<1x8x3xbf16>
    %43 = vector.shape_cast %42 : vector<1x8x3xbf16> to vector<8x3xbf16>
    %cst_44 = arith.constant dense<0.000000e+00> : vector<8x324xf32>
    %44 = tpu.matmul %43, %41, %cst_44 {dimension_numbers = #tpu.dot_dimension_numbers<[1], [0], [0], [1], [0, 0, 1, 1], [], []>} : vector<8x3xbf16>, vector<3x324xbf16>, vector<8x324xf32> -> vector<8x324xf32>
    %45 = arith.addf %40, %44 : vector<8x324xf32>
    %46 = vector.extract_strided_slice %19 {offsets = [0, 20], sizes = [3, 324], strides = [1, 1]} : vector<3x362xbf16> to vector<3x324xbf16>
    %c5 = arith.constant 5 : index
    %c0_45 = arith.constant 0 : index
    %c0_46 = arith.constant 0 : index
    %47 = vector.load %arg2[%c5, %c0_45, %c0_46] : memref<9x8x3xbf16, #tpu.memory_space<vmem>>, vector<1x8x3xbf16>
    %48 = vector.shape_cast %47 : vector<1x8x3xbf16> to vector<8x3xbf16>
    %cst_47 = arith.constant dense<0.000000e+00> : vector<8x324xf32>
    %49 = tpu.matmul %48, %46, %cst_47 {dimension_numbers = #tpu.dot_dimension_numbers<[1], [0], [0], [1], [0, 0, 1, 1], [], []>} : vector<8x3xbf16>, vector<3x324xbf16>, vector<8x324xf32> -> vector<8x324xf32>
    %50 = arith.addf %45, %49 : vector<8x324xf32>
    %51 = vector.extract_strided_slice %19 {offsets = [0, 36], sizes = [3, 324], strides = [1, 1]} : vector<3x362xbf16> to vector<3x324xbf16>
    %c6 = arith.constant 6 : index
    %c0_48 = arith.constant 0 : index
    %c0_49 = arith.constant 0 : index
    %52 = vector.load %arg2[%c6, %c0_48, %c0_49] : memref<9x8x3xbf16, #tpu.memory_space<vmem>>, vector<1x8x3xbf16>
    %53 = vector.shape_cast %52 : vector<1x8x3xbf16> to vector<8x3xbf16>
    %cst_50 = arith.constant dense<0.000000e+00> : vector<8x324xf32>
    %54 = tpu.matmul %53, %51, %cst_50 {dimension_numbers = #tpu.dot_dimension_numbers<[1], [0], [0], [1], [0, 0, 1, 1], [], []>} : vector<8x3xbf16>, vector<3x324xbf16>, vector<8x324xf32> -> vector<8x324xf32>
    %55 = arith.addf %50, %54 : vector<8x324xf32>
    %56 = vector.extract_strided_slice %19 {offsets = [0, 37], sizes = [3, 324], strides = [1, 1]} : vector<3x362xbf16> to vector<3x324xbf16>
    %c7 = arith.constant 7 : index
    %c0_51 = arith.constant 0 : index
    %c0_52 = arith.constant 0 : index
    %57 = vector.load %arg2[%c7, %c0_51, %c0_52] : memref<9x8x3xbf16, #tpu.memory_space<vmem>>, vector<1x8x3xbf16>
    %58 = vector.shape_cast %57 : vector<1x8x3xbf16> to vector<8x3xbf16>
    %cst_53 = arith.constant dense<0.000000e+00> : vector<8x324xf32>
    %59 = tpu.matmul %58, %56, %cst_53 {dimension_numbers = #tpu.dot_dimension_numbers<[1], [0], [0], [1], [0, 0, 1, 1], [], []>} : vector<8x3xbf16>, vector<3x324xbf16>, vector<8x324xf32> -> vector<8x324xf32>
    %60 = arith.addf %55, %59 : vector<8x324xf32>
    %61 = vector.extract_strided_slice %19 {offsets = [0, 38], sizes = [3, 324], strides = [1, 1]} : vector<3x362xbf16> to vector<3x324xbf16>
    %c8 = arith.constant 8 : index
    %c0_54 = arith.constant 0 : index
    %c0_55 = arith.constant 0 : index
    %62 = vector.load %arg2[%c8, %c0_54, %c0_55] : memref<9x8x3xbf16, #tpu.memory_space<vmem>>, vector<1x8x3xbf16>
    %63 = vector.shape_cast %62 : vector<1x8x3xbf16> to vector<8x3xbf16>
    %cst_56 = arith.constant dense<0.000000e+00> : vector<8x324xf32>
    %64 = tpu.matmul %63, %61, %cst_56 {dimension_numbers = #tpu.dot_dimension_numbers<[1], [0], [0], [1], [0, 0, 1, 1], [], []>} : vector<8x3xbf16>, vector<3x324xbf16>, vector<8x324xf32> -> vector<8x324xf32>
    %65 = arith.addf %60, %64 : vector<8x324xf32>
    %c0_57 = arith.constant 0 : index
    %c0_58 = arith.constant 0 : index
    %c0_59 = arith.constant 0 : index
    %66 = vector.load %arg11[%c0_57, %c0_58, %c0_59] : memref<2x8x1xf32, #tpu.memory_space<vmem>>, vector<1x8x1xf32>
    %67 = vector.shape_cast %66 : vector<1x8x1xf32> to vector<8x1xf32>
    %68 = vector.broadcast %67 : vector<8x1xf32> to vector<8x324xf32>
    %69 = arith.mulf %65, %68 : vector<8x324xf32>
    %c1_60 = arith.constant 1 : index
    %c0_61 = arith.constant 0 : index
    %c0_62 = arith.constant 0 : index
    %70 = vector.load %arg11[%c1_60, %c0_61, %c0_62] : memref<2x8x1xf32, #tpu.memory_space<vmem>>, vector<1x8x1xf32>
    %71 = vector.shape_cast %70 : vector<1x8x1xf32> to vector<8x1xf32>
    %72 = vector.broadcast %71 : vector<8x1xf32> to vector<8x324xf32>
    %73 = arith.addf %69, %72 : vector<8x324xf32>
    %cst_63 = arith.constant 1.000000e-01 : f32
    %74 = vector.broadcast %cst_63 : f32 to vector<8x324xf32>
    %75 = arith.mulf %74, %73 : vector<8x324xf32>
    %76 = arith.maximumf %73, %75 : vector<8x324xf32>
    %77 = vector.broadcast %14 : vector<1x324xf32> to vector<8x324xf32>
    %78 = arith.mulf %76, %77 : vector<8x324xf32>
    %c0_64 = arith.constant 0 : index
    %c19 = arith.constant 19 : index
    %79 = vector.load %arg26[%c0_64, %c19] : memref<8x362xf32, #tpu.memory_space<vmem>>, vector<8x324xf32>
    tpu.vector_store %arg26[%c0_64, %c19], %78 {strides = array<i32>} : memref<8x362xf32, #tpu.memory_space<vmem>>, vector<8x324xf32>,
    %c0_65 = arith.constant 0 : index
    %c0_66 = arith.constant 0 : index
    %80 = vector.load %arg26[%c0_65, %c0_66] : memref<8x362xf32, #tpu.memory_space<vmem>>, vector<8x362xf32>
    %81 = arith.truncf %80 : vector<8x362xf32> to vector<8x362xbf16>
    %cst_67 = arith.constant 0.000000e+00 : f32
    %82 = vector.broadcast %cst_67 : f32 to vector<8x324xf32>
    %83 = vector.extract_strided_slice %81 {offsets = [0, 0], sizes = [8, 324], strides = [1, 1]} : vector<8x362xbf16> to vector<8x324xbf16>
    %c0_68 = arith.constant 0 : index
    %c0_69 = arith.constant 0 : index
    %c0_70 = arith.constant 0 : index
    %84 = vector.load %arg3[%c0_68, %c0_69, %c0_70] : memref<9x8x8xbf16, #tpu.memory_space<vmem>>, vector<1x8x8xbf16>
    %85 = vector.shape_cast %84 : vector<1x8x8xbf16> to vector<8x8xbf16>
    %cst_71 = arith.constant dense<0.000000e+00> : vector<8x324xf32>
    %86 = tpu.matmul %85, %83, %cst_71 {dimension_numbers = #tpu.dot_dimension_numbers<[1], [0], [0], [1], [0, 0, 1, 1], [], []>} : vector<8x8xbf16>, vector<8x324xbf16>, vector<8x324xf32> -> vector<8x324xf32>
    %87 = arith.addf %82, %86 : vector<8x324xf32>
    %88 = vector.extract_strided_slice %81 {offsets = [0, 1], sizes = [8, 324], strides = [1, 1]} : vector<8x362xbf16> to vector<8x324xbf16>
    %c1_72 = arith.constant 1 : index
    %c0_73 = arith.constant 0 : index
    %c0_74 = arith.constant 0 : index
    %89 = vector.load %arg3[%c1_72, %c0_73, %c0_74] : memref<9x8x8xbf16, #tpu.memory_space<vmem>>, vector<1x8x8xbf16>
    %90 = vector.shape_cast %89 : vector<1x8x8xbf16> to vector<8x8xbf16>
    %cst_75 = arith.constant dense<0.000000e+00> : vector<8x324xf32>
    %91 = tpu.matmul %90, %88, %cst_75 {dimension_numbers = #tpu.dot_dimension_numbers<[1], [0], [0], [1], [0, 0, 1, 1], [], []>} : vector<8x8xbf16>, vector<8x324xbf16>, vector<8x324xf32> -> vector<8x324xf32>
    %92 = arith.addf %87, %91 : vector<8x324xf32>
    %93 = vector.extract_strided_slice %81 {offsets = [0, 2], sizes = [8, 324], strides = [1, 1]} : vector<8x362xbf16> to vector<8x324xbf16>
    %c2_76 = arith.constant 2 : index
    %c0_77 = arith.constant 0 : index
    %c0_78 = arith.constant 0 : index
    %94 = vector.load %arg3[%c2_76, %c0_77, %c0_78] : memref<9x8x8xbf16, #tpu.memory_space<vmem>>, vector<1x8x8xbf16>
    %95 = vector.shape_cast %94 : vector<1x8x8xbf16> to vector<8x8xbf16>
    %cst_79 = arith.constant dense<0.000000e+00> : vector<8x324xf32>
    %96 = tpu.matmul %95, %93, %cst_79 {dimension_numbers = #tpu.dot_dimension_numbers<[1], [0], [0], [1], [0, 0, 1, 1], [], []>} : vector<8x8xbf16>, vector<8x324xbf16>, vector<8x324xf32> -> vector<8x324xf32>
    %97 = arith.addf %92, %96 : vector<8x324xf32>
    %98 = vector.extract_strided_slice %81 {offsets = [0, 18], sizes = [8, 324], strides = [1, 1]} : vector<8x362xbf16> to vector<8x324xbf16>
    %c3_80 = arith.constant 3 : index
    %c0_81 = arith.constant 0 : index
    %c0_82 = arith.constant 0 : index
    %99 = vector.load %arg3[%c3_80, %c0_81, %c0_82] : memref<9x8x8xbf16, #tpu.memory_space<vmem>>, vector<1x8x8xbf16>
    %100 = vector.shape_cast %99 : vector<1x8x8xbf16> to vector<8x8xbf16>
    %cst_83 = arith.constant dense<0.000000e+00> : vector<8x324xf32>
    %101 = tpu.matmul %100, %98, %cst_83 {dimension_numbers = #tpu.dot_dimension_numbers<[1], [0], [0], [1], [0, 0, 1, 1], [], []>} : vector<8x8xbf16>, vector<8x324xbf16>, vector<8x324xf32> -> vector<8x324xf32>
    %102 = arith.addf %97, %101 : vector<8x324xf32>
    %103 = vector.extract_strided_slice %81 {offsets = [0, 19], sizes = [8, 324], strides = [1, 1]} : vector<8x362xbf16> to vector<8x324xbf16>
    %c4_84 = arith.constant 4 : index
    %c0_85 = arith.constant 0 : index
    %c0_86 = arith.constant 0 : index
    %104 = vector.load %arg3[%c4_84, %c0_85, %c0_86] : memref<9x8x8xbf16, #tpu.memory_space<vmem>>, vector<1x8x8xbf16>
    %105 = vector.shape_cast %104 : vector<1x8x8xbf16> to vector<8x8xbf16>
    %cst_87 = arith.constant dense<0.000000e+00> : vector<8x324xf32>
    %106 = tpu.matmul %105, %103, %cst_87 {dimension_numbers = #tpu.dot_dimension_numbers<[1], [0], [0], [1], [0, 0, 1, 1], [], []>} : vector<8x8xbf16>, vector<8x324xbf16>, vector<8x324xf32> -> vector<8x324xf32>
    %107 = arith.addf %102, %106 : vector<8x324xf32>
    %108 = vector.extract_strided_slice %81 {offsets = [0, 20], sizes = [8, 324], strides = [1, 1]} : vector<8x362xbf16> to vector<8x324xbf16>
    %c5_88 = arith.constant 5 : index
    %c0_89 = arith.constant 0 : index
    %c0_90 = arith.constant 0 : index
    %109 = vector.load %arg3[%c5_88, %c0_89, %c0_90] : memref<9x8x8xbf16, #tpu.memory_space<vmem>>, vector<1x8x8xbf16>
    %110 = vector.shape_cast %109 : vector<1x8x8xbf16> to vector<8x8xbf16>
    %cst_91 = arith.constant dense<0.000000e+00> : vector<8x324xf32>
    %111 = tpu.matmul %110, %108, %cst_91 {dimension_numbers = #tpu.dot_dimension_numbers<[1], [0], [0], [1], [0, 0, 1, 1], [], []>} : vector<8x8xbf16>, vector<8x324xbf16>, vector<8x324xf32> -> vector<8x324xf32>
    %112 = arith.addf %107, %111 : vector<8x324xf32>
    %113 = vector.extract_strided_slice %81 {offsets = [0, 36], sizes = [8, 324], strides = [1, 1]} : vector<8x362xbf16> to vector<8x324xbf16>
    %c6_92 = arith.constant 6 : index
    %c0_93 = arith.constant 0 : index
    %c0_94 = arith.constant 0 : index
    %114 = vector.load %arg3[%c6_92, %c0_93, %c0_94] : memref<9x8x8xbf16, #tpu.memory_space<vmem>>, vector<1x8x8xbf16>
    %115 = vector.shape_cast %114 : vector<1x8x8xbf16> to vector<8x8xbf16>
    %cst_95 = arith.constant dense<0.000000e+00> : vector<8x324xf32>
    %116 = tpu.matmul %115, %113, %cst_95 {dimension_numbers = #tpu.dot_dimension_numbers<[1], [0], [0], [1], [0, 0, 1, 1], [], []>} : vector<8x8xbf16>, vector<8x324xbf16>, vector<8x324xf32> -> vector<8x324xf32>
    %117 = arith.addf %112, %116 : vector<8x324xf32>
    %118 = vector.extract_strided_slice %81 {offsets = [0, 37], sizes = [8, 324], strides = [1, 1]} : vector<8x362xbf16> to vector<8x324xbf16>
    %c7_96 = arith.constant 7 : index
    %c0_97 = arith.constant 0 : index
    %c0_98 = arith.constant 0 : index
    %119 = vector.load %arg3[%c7_96, %c0_97, %c0_98] : memref<9x8x8xbf16, #tpu.memory_space<vmem>>, vector<1x8x8xbf16>
    %120 = vector.shape_cast %119 : vector<1x8x8xbf16> to vector<8x8xbf16>
    %cst_99 = arith.constant dense<0.000000e+00> : vector<8x324xf32>
    %121 = tpu.matmul %120, %118, %cst_99 {dimension_numbers = #tpu.dot_dimension_numbers<[1], [0], [0], [1], [0, 0, 1, 1], [], []>} : vector<8x8xbf16>, vector<8x324xbf16>, vector<8x324xf32> -> vector<8x324xf32>
    %122 = arith.addf %117, %121 : vector<8x324xf32>
    %123 = vector.extract_strided_slice %81 {offsets = [0, 38], sizes = [8, 324], strides = [1, 1]} : vector<8x362xbf16> to vector<8x324xbf16>
    %c8_100 = arith.constant 8 : index
    %c0_101 = arith.constant 0 : index
    %c0_102 = arith.constant 0 : index
    %124 = vector.load %arg3[%c8_100, %c0_101, %c0_102] : memref<9x8x8xbf16, #tpu.memory_space<vmem>>, vector<1x8x8xbf16>
    %125 = vector.shape_cast %124 : vector<1x8x8xbf16> to vector<8x8xbf16>
    %cst_103 = arith.constant dense<0.000000e+00> : vector<8x324xf32>
    %126 = tpu.matmul %125, %123, %cst_103 {dimension_numbers = #tpu.dot_dimension_numbers<[1], [0], [0], [1], [0, 0, 1, 1], [], []>} : vector<8x8xbf16>, vector<8x324xbf16>, vector<8x324xf32> -> vector<8x324xf32>
    %127 = arith.addf %122, %126 : vector<8x324xf32>
    %c0_104 = arith.constant 0 : index
    %c0_105 = arith.constant 0 : index
    %c0_106 = arith.constant 0 : index
    %128 = vector.load %arg12[%c0_104, %c0_105, %c0_106] : memref<2x8x1xf32, #tpu.memory_space<vmem>>, vector<1x8x1xf32>
    %129 = vector.shape_cast %128 : vector<1x8x1xf32> to vector<8x1xf32>
    %130 = vector.broadcast %129 : vector<8x1xf32> to vector<8x324xf32>
    %131 = arith.mulf %127, %130 : vector<8x324xf32>
    %c1_107 = arith.constant 1 : index
    %c0_108 = arith.constant 0 : index
    %c0_109 = arith.constant 0 : index
    %132 = vector.load %arg12[%c1_107, %c0_108, %c0_109] : memref<2x8x1xf32, #tpu.memory_space<vmem>>, vector<1x8x1xf32>
    %133 = vector.shape_cast %132 : vector<1x8x1xf32> to vector<8x1xf32>
    %134 = vector.broadcast %133 : vector<8x1xf32> to vector<8x324xf32>
    %135 = arith.addf %131, %134 : vector<8x324xf32>
    %cst_110 = arith.constant 1.000000e-01 : f32
    %136 = vector.broadcast %cst_110 : f32 to vector<8x324xf32>
    %137 = arith.mulf %136, %135 : vector<8x324xf32>
    %138 = arith.maximumf %135, %137 : vector<8x324xf32>
    %139 = vector.broadcast %14 : vector<1x324xf32> to vector<8x324xf32>
    %140 = arith.mulf %138, %139 : vector<8x324xf32>
    %c0_111 = arith.constant 0 : index
    %c19_112 = arith.constant 19 : index
    %141 = vector.load %arg27[%c0_111, %c19_112] : memref<8x362xf32, #tpu.memory_space<vmem>>, vector<8x324xf32>
    tpu.vector_store %arg27[%c0_111, %c19_112], %140 {strides = array<i32>} : memref<8x362xf32, #tpu.memory_space<vmem>>, vector<8x324xf32>,
    %c0_113 = arith.constant 0 : index
    %c0_114 = arith.constant 0 : index
    %142 = vector.load %arg27[%c0_113, %c0_114] : memref<8x362xf32, #tpu.memory_space<vmem>>, vector<8x362xf32>
    %143 = arith.truncf %142 : vector<8x362xf32> to vector<8x362xbf16>
    %cst_115 = arith.constant 0.000000e+00 : f32
    %144 = vector.broadcast %cst_115 : f32 to vector<8x324xf32>
    %145 = vector.extract_strided_slice %143 {offsets = [0, 0], sizes = [8, 324], strides = [1, 1]} : vector<8x362xbf16> to vector<8x324xbf16>
    %c0_116 = arith.constant 0 : index
    %c0_117 = arith.constant 0 : index
    %c0_118 = arith.constant 0 : index
    %146 = vector.load %arg4[%c0_116, %c0_117, %c0_118] : memref<9x8x8xbf16, #tpu.memory_space<vmem>>, vector<1x8x8xbf16>
    %147 = vector.shape_cast %146 : vector<1x8x8xbf16> to vector<8x8xbf16>
    %cst_119 = arith.constant dense<0.000000e+00> : vector<8x324xf32>
    %148 = tpu.matmul %147, %145, %cst_119 {dimension_numbers = #tpu.dot_dimension_numbers<[1], [0], [0], [1], [0, 0, 1, 1], [], []>} : vector<8x8xbf16>, vector<8x324xbf16>, vector<8x324xf32> -> vector<8x324xf32>
    %149 = arith.addf %144, %148 : vector<8x324xf32>
    %150 = vector.extract_strided_slice %143 {offsets = [0, 1], sizes = [8, 324], strides = [1, 1]} : vector<8x362xbf16> to vector<8x324xbf16>
    %c1_120 = arith.constant 1 : index
    %c0_121 = arith.constant 0 : index
    %c0_122 = arith.constant 0 : index
    %151 = vector.load %arg4[%c1_120, %c0_121, %c0_122] : memref<9x8x8xbf16, #tpu.memory_space<vmem>>, vector<1x8x8xbf16>
    %152 = vector.shape_cast %151 : vector<1x8x8xbf16> to vector<8x8xbf16>
    %cst_123 = arith.constant dense<0.000000e+00> : vector<8x324xf32>
    %153 = tpu.matmul %152, %150, %cst_123 {dimension_numbers = #tpu.dot_dimension_numbers<[1], [0], [0], [1], [0, 0, 1, 1], [], []>} : vector<8x8xbf16>, vector<8x324xbf16>, vector<8x324xf32> -> vector<8x324xf32>
    %154 = arith.addf %149, %153 : vector<8x324xf32>
    %155 = vector.extract_strided_slice %143 {offsets = [0, 2], sizes = [8, 324], strides = [1, 1]} : vector<8x362xbf16> to vector<8x324xbf16>
    %c2_124 = arith.constant 2 : index
    %c0_125 = arith.constant 0 : index
    %c0_126 = arith.constant 0 : index
    %156 = vector.load %arg4[%c2_124, %c0_125, %c0_126] : memref<9x8x8xbf16, #tpu.memory_space<vmem>>, vector<1x8x8xbf16>
    %157 = vector.shape_cast %156 : vector<1x8x8xbf16> to vector<8x8xbf16>
    %cst_127 = arith.constant dense<0.000000e+00> : vector<8x324xf32>
    %158 = tpu.matmul %157, %155, %cst_127 {dimension_numbers = #tpu.dot_dimension_numbers<[1], [0], [0], [1], [0, 0, 1, 1], [], []>} : vector<8x8xbf16>, vector<8x324xbf16>, vector<8x324xf32> -> vector<8x324xf32>
    %159 = arith.addf %154, %158 : vector<8x324xf32>
    %160 = vector.extract_strided_slice %143 {offsets = [0, 18], sizes = [8, 324], strides = [1, 1]} : vector<8x362xbf16> to vector<8x324xbf16>
    %c3_128 = arith.constant 3 : index
    %c0_129 = arith.constant 0 : index
    %c0_130 = arith.constant 0 : index
    %161 = vector.load %arg4[%c3_128, %c0_129, %c0_130] : memref<9x8x8xbf16, #tpu.memory_space<vmem>>, vector<1x8x8xbf16>
    %162 = vector.shape_cast %161 : vector<1x8x8xbf16> to vector<8x8xbf16>
    %cst_131 = arith.constant dense<0.000000e+00> : vector<8x324xf32>
    %163 = tpu.matmul %162, %160, %cst_131 {dimension_numbers = #tpu.dot_dimension_numbers<[1], [0], [0], [1], [0, 0, 1, 1], [], []>} : vector<8x8xbf16>, vector<8x324xbf16>, vector<8x324xf32> -> vector<8x324xf32>
    %164 = arith.addf %159, %163 : vector<8x324xf32>
    %165 = vector.extract_strided_slice %143 {offsets = [0, 19], sizes = [8, 324], strides = [1, 1]} : vector<8x362xbf16> to vector<8x324xbf16>
    %c4_132 = arith.constant 4 : index
    %c0_133 = arith.constant 0 : index
    %c0_134 = arith.constant 0 : index
    %166 = vector.load %arg4[%c4_132, %c0_133, %c0_134] : memref<9x8x8xbf16, #tpu.memory_space<vmem>>, vector<1x8x8xbf16>
    %167 = vector.shape_cast %166 : vector<1x8x8xbf16> to vector<8x8xbf16>
    %cst_135 = arith.constant dense<0.000000e+00> : vector<8x324xf32>
    %168 = tpu.matmul %167, %165, %cst_135 {dimension_numbers = #tpu.dot_dimension_numbers<[1], [0], [0], [1], [0, 0, 1, 1], [], []>} : vector<8x8xbf16>, vector<8x324xbf16>, vector<8x324xf32> -> vector<8x324xf32>
    %169 = arith.addf %164, %168 : vector<8x324xf32>
    %170 = vector.extract_strided_slice %143 {offsets = [0, 20], sizes = [8, 324], strides = [1, 1]} : vector<8x362xbf16> to vector<8x324xbf16>
    %c5_136 = arith.constant 5 : index
    %c0_137 = arith.constant 0 : index
    %c0_138 = arith.constant 0 : index
    %171 = vector.load %arg4[%c5_136, %c0_137, %c0_138] : memref<9x8x8xbf16, #tpu.memory_space<vmem>>, vector<1x8x8xbf16>
    %172 = vector.shape_cast %171 : vector<1x8x8xbf16> to vector<8x8xbf16>
    %cst_139 = arith.constant dense<0.000000e+00> : vector<8x324xf32>
    %173 = tpu.matmul %172, %170, %cst_139 {dimension_numbers = #tpu.dot_dimension_numbers<[1], [0], [0], [1], [0, 0, 1, 1], [], []>} : vector<8x8xbf16>, vector<8x324xbf16>, vector<8x324xf32> -> vector<8x324xf32>
    %174 = arith.addf %169, %173 : vector<8x324xf32>
    %175 = vector.extract_strided_slice %143 {offsets = [0, 36], sizes = [8, 324], strides = [1, 1]} : vector<8x362xbf16> to vector<8x324xbf16>
    %c6_140 = arith.constant 6 : index
    %c0_141 = arith.constant 0 : index
    %c0_142 = arith.constant 0 : index
    %176 = vector.load %arg4[%c6_140, %c0_141, %c0_142] : memref<9x8x8xbf16, #tpu.memory_space<vmem>>, vector<1x8x8xbf16>
    %177 = vector.shape_cast %176 : vector<1x8x8xbf16> to vector<8x8xbf16>
    %cst_143 = arith.constant dense<0.000000e+00> : vector<8x324xf32>
    %178 = tpu.matmul %177, %175, %cst_143 {dimension_numbers = #tpu.dot_dimension_numbers<[1], [0], [0], [1], [0, 0, 1, 1], [], []>} : vector<8x8xbf16>, vector<8x324xbf16>, vector<8x324xf32> -> vector<8x324xf32>
    %179 = arith.addf %174, %178 : vector<8x324xf32>
    %180 = vector.extract_strided_slice %143 {offsets = [0, 37], sizes = [8, 324], strides = [1, 1]} : vector<8x362xbf16> to vector<8x324xbf16>
    %c7_144 = arith.constant 7 : index
    %c0_145 = arith.constant 0 : index
    %c0_146 = arith.constant 0 : index
    %181 = vector.load %arg4[%c7_144, %c0_145, %c0_146] : memref<9x8x8xbf16, #tpu.memory_space<vmem>>, vector<1x8x8xbf16>
    %182 = vector.shape_cast %181 : vector<1x8x8xbf16> to vector<8x8xbf16>
    %cst_147 = arith.constant dense<0.000000e+00> : vector<8x324xf32>
    %183 = tpu.matmul %182, %180, %cst_147 {dimension_numbers = #tpu.dot_dimension_numbers<[1], [0], [0], [1], [0, 0, 1, 1], [], []>} : vector<8x8xbf16>, vector<8x324xbf16>, vector<8x324xf32> -> vector<8x324xf32>
    %184 = arith.addf %179, %183 : vector<8x324xf32>
    %185 = vector.extract_strided_slice %143 {offsets = [0, 38], sizes = [8, 324], strides = [1, 1]} : vector<8x362xbf16> to vector<8x324xbf16>
    %c8_148 = arith.constant 8 : index
    %c0_149 = arith.constant 0 : index
    %c0_150 = arith.constant 0 : index
    %186 = vector.load %arg4[%c8_148, %c0_149, %c0_150] : memref<9x8x8xbf16, #tpu.memory_space<vmem>>, vector<1x8x8xbf16>
    %187 = vector.shape_cast %186 : vector<1x8x8xbf16> to vector<8x8xbf16>
    %cst_151 = arith.constant dense<0.000000e+00> : vector<8x324xf32>
    %188 = tpu.matmul %187, %185, %cst_151 {dimension_numbers = #tpu.dot_dimension_numbers<[1], [0], [0], [1], [0, 0, 1, 1], [], []>} : vector<8x8xbf16>, vector<8x324xbf16>, vector<8x324xf32> -> vector<8x324xf32>
    %189 = arith.addf %184, %188 : vector<8x324xf32>
    %c0_152 = arith.constant 0 : index
    %c0_153 = arith.constant 0 : index
    %c0_154 = arith.constant 0 : index
    %190 = vector.load %arg13[%c0_152, %c0_153, %c0_154] : memref<2x8x1xf32, #tpu.memory_space<vmem>>, vector<1x8x1xf32>
    %191 = vector.shape_cast %190 : vector<1x8x1xf32> to vector<8x1xf32>
    %192 = vector.broadcast %191 : vector<8x1xf32> to vector<8x324xf32>
    %193 = arith.mulf %189, %192 : vector<8x324xf32>
    %c1_155 = arith.constant 1 : index
    %c0_156 = arith.constant 0 : index
    %c0_157 = arith.constant 0 : index
    %194 = vector.load %arg13[%c1_155, %c0_156, %c0_157] : memref<2x8x1xf32, #tpu.memory_space<vmem>>, vector<1x8x1xf32>
    %195 = vector.shape_cast %194 : vector<1x8x1xf32> to vector<8x1xf32>
    %196 = vector.broadcast %195 : vector<8x1xf32> to vector<8x324xf32>
    %197 = arith.addf %193, %196 : vector<8x324xf32>
    %cst_158 = arith.constant 1.000000e-01 : f32
    %198 = vector.broadcast %cst_158 : f32 to vector<8x324xf32>
    %199 = arith.mulf %198, %197 : vector<8x324xf32>
    %200 = arith.maximumf %197, %199 : vector<8x324xf32>
    %201 = vector.broadcast %14 : vector<1x324xf32> to vector<8x324xf32>
    %202 = arith.mulf %200, %201 : vector<8x324xf32>
    %c0_159 = arith.constant 0 : index
    %c19_160 = arith.constant 19 : index
    %203 = vector.load %arg26[%c0_159, %c19_160] : memref<8x362xf32, #tpu.memory_space<vmem>>, vector<8x324xf32>
    tpu.vector_store %arg26[%c0_159, %c19_160], %202 {strides = array<i32>} : memref<8x362xf32, #tpu.memory_space<vmem>>, vector<8x324xf32>,
    %c0_161 = arith.constant 0 : index
    %c0_162 = arith.constant 0 : index
    %204 = vector.load %arg26[%c0_161, %c0_162] : memref<8x362xf32, #tpu.memory_space<vmem>>, vector<8x362xf32>
    %205 = tpu.iota {dimensions = array<i32: 0>} : vector<16x8xi32>
    %206 = tpu.iota {dimensions = array<i32: 1>} : vector<16x8xi32>
    %c2_i32 = arith.constant 2 : i32
    %207 = vector.broadcast %c2_i32 : i32 to vector<16x8xi32>
    %208 = arith.muli %207, %206 : vector<16x8xi32>
    %209 = arith.cmpi eq, %205, %208 : vector<16x8xi32>
    %210 = arith.extui %209 : vector<16x8xi1> to vector<16x8xi32>
    %211 = arith.sitofp %210 : vector<16x8xi32> to vector<16x8xf32>
    %c2_i32_163 = arith.constant 2 : i32
    %212 = vector.broadcast %c2_i32_163 : i32 to vector<16x8xi32>
    %213 = arith.muli %212, %206 : vector<16x8xi32>
    %c1_i32 = arith.constant 1 : i32
    %214 = vector.broadcast %c1_i32 : i32 to vector<16x8xi32>
    %215 = arith.addi %213, %214 : vector<16x8xi32>
    %216 = arith.cmpi eq, %205, %215 : vector<16x8xi32>
    %217 = arith.extui %216 : vector<16x8xi1> to vector<16x8xi32>
    %218 = arith.sitofp %217 : vector<16x8xi32> to vector<16x8xf32>
    %219 = vector.extract_strided_slice %204 {offsets = [0, 38], sizes = [8, 16], strides = [1, 1]} : vector<8x362xf32> to vector<8x16xf32>
    %220 = vector.extract_strided_slice %204 {offsets = [0, 56], sizes = [8, 16], strides = [1, 1]} : vector<8x362xf32> to vector<8x16xf32>
    %221 = arith.maximumf %219, %220 : vector<8x16xf32>
    %cst_164 = arith.constant dense<0.000000e+00> : vector<8x8xf32>
    %222 = tpu.matmul %221, %211, %cst_164 {dimension_numbers = #tpu.dot_dimension_numbers<[1], [0], [0], [1], [0, 0, 1, 1], [], []>} : vector<8x16xf32>, vector<16x8xf32>, vector<8x8xf32> -> vector<8x8xf32>
    %cst_165 = arith.constant dense<0.000000e+00> : vector<8x8xf32>
    %223 = tpu.matmul %221, %218, %cst_165 {dimension_numbers = #tpu.dot_dimension_numbers<[1], [0], [0], [1], [0, 0, 1, 1], [], []>} : vector<8x16xf32>, vector<16x8xf32>, vector<8x8xf32> -> vector<8x8xf32>
    %224 = arith.maximumf %222, %223 : vector<8x8xf32>
    %c0_166 = arith.constant 0 : index
    %c22 = arith.constant 22 : index
    %225 = vector.load %arg28[%c0_166, %c22] : memref<16x122xf32, #tpu.memory_space<vmem>>, vector<8x8xf32>
    tpu.vector_store %arg28[%c0_166, %c22], %224 {strides = array<i32>} : memref<16x122xf32, #tpu.memory_space<vmem>>, vector<8x8xf32>,
    %226 = vector.extract_strided_slice %204 {offsets = [0, 74], sizes = [8, 16], strides = [1, 1]} : vector<8x362xf32> to vector<8x16xf32>
    %227 = vector.extract_strided_slice %204 {offsets = [0, 92], sizes = [8, 16], strides = [1, 1]} : vector<8x362xf32> to vector<8x16xf32>
    %228 = arith.maximumf %226, %227 : vector<8x16xf32>
    %cst_167 = arith.constant dense<0.000000e+00> : vector<8x8xf32>
    %229 = tpu.matmul %228, %211, %cst_167 {dimension_numbers = #tpu.dot_dimension_numbers<[1], [0], [0], [1], [0, 0, 1, 1], [], []>} : vector<8x16xf32>, vector<16x8xf32>, vector<8x8xf32> -> vector<8x8xf32>
    %cst_168 = arith.constant dense<0.000000e+00> : vector<8x8xf32>
    %230 = tpu.matmul %228, %218, %cst_168 {dimension_numbers = #tpu.dot_dimension_numbers<[1], [0], [0], [1], [0, 0, 1, 1], [], []>} : vector<8x16xf32>, vector<16x8xf32>, vector<8x8xf32> -> vector<8x8xf32>
    %231 = arith.maximumf %229, %230 : vector<8x8xf32>
    %c0_169 = arith.constant 0 : index
    %c32 = arith.constant 32 : index
    %232 = vector.load %arg28[%c0_169, %c32] : memref<16x122xf32, #tpu.memory_space<vmem>>, vector<8x8xf32>
    tpu.vector_store %arg28[%c0_169, %c32], %231 {strides = array<i32>} : memref<16x122xf32, #tpu.memory_space<vmem>>, vector<8x8xf32>,
    %233 = vector.extract_strided_slice %204 {offsets = [0, 110], sizes = [8, 16], strides = [1, 1]} : vector<8x362xf32> to vector<8x16xf32>
    %234 = vector.extract_strided_slice %204 {offsets = [0, 128], sizes = [8, 16], strides = [1, 1]} : vector<8x362xf32> to vector<8x16xf32>
    %235 = arith.maximumf %233, %234 : vector<8x16xf32>
    %cst_170 = arith.constant dense<0.000000e+00> : vector<8x8xf32>
    %236 = tpu.matmul %235, %211, %cst_170 {dimension_numbers = #tpu.dot_dimension_numbers<[1], [0], [0], [1], [0, 0, 1, 1], [], []>} : vector<8x16xf32>, vector<16x8xf32>, vector<8x8xf32> -> vector<8x8xf32>
    %cst_171 = arith.constant dense<0.000000e+00> : vector<8x8xf32>
    %237 = tpu.matmul %235, %218, %cst_171 {dimension_numbers = #tpu.dot_dimension_numbers<[1], [0], [0], [1], [0, 0, 1, 1], [], []>} : vector<8x16xf32>, vector<16x8xf32>, vector<8x8xf32> -> vector<8x8xf32>
    %238 = arith.maximumf %236, %237 : vector<8x8xf32>
    %c0_172 = arith.constant 0 : index
    %c42 = arith.constant 42 : index
    %239 = vector.load %arg28[%c0_172, %c42] : memref<16x122xf32, #tpu.memory_space<vmem>>, vector<8x8xf32>
    tpu.vector_store %arg28[%c0_172, %c42], %238 {strides = array<i32>} : memref<16x122xf32, #tpu.memory_space<vmem>>, vector<8x8xf32>,
    %240 = vector.extract_strided_slice %204 {offsets = [0, 146], sizes = [8, 16], strides = [1, 1]} : vector<8x362xf32> to vector<8x16xf32>
    %241 = vector.extract_strided_slice %204 {offsets = [0, 164], sizes = [8, 16], strides = [1, 1]} : vector<8x362xf32> to vector<8x16xf32>
    %242 = arith.maximumf %240, %241 : vector<8x16xf32>
    %cst_173 = arith.constant dense<0.000000e+00> : vector<8x8xf32>
    %243 = tpu.matmul %242, %211, %cst_173 {dimension_numbers = #tpu.dot_dimension_numbers<[1], [0], [0], [1], [0, 0, 1, 1], [], []>} : vector<8x16xf32>, vector<16x8xf32>, vector<8x8xf32> -> vector<8x8xf32>
    %cst_174 = arith.constant dense<0.000000e+00> : vector<8x8xf32>
    %244 = tpu.matmul %242, %218, %cst_174 {dimension_numbers = #tpu.dot_dimension_numbers<[1], [0], [0], [1], [0, 0, 1, 1], [], []>} : vector<8x16xf32>, vector<16x8xf32>, vector<8x8xf32> -> vector<8x8xf32>
    %245 = arith.maximumf %243, %244 : vector<8x8xf32>
    %c0_175 = arith.constant 0 : index
    %c52 = arith.constant 52 : index
    %246 = vector.load %arg28[%c0_175, %c52] : memref<16x122xf32, #tpu.memory_space<vmem>>, vector<8x8xf32>
    tpu.vector_store %arg28[%c0_175, %c52], %245 {strides = array<i32>} : memref<16x122xf32, #tpu.memory_space<vmem>>, vector<8x8xf32>,
    %247 = vector.extract_strided_slice %204 {offsets = [0, 182], sizes = [8, 16], strides = [1, 1]} : vector<8x362xf32> to vector<8x16xf32>
    %248 = vector.extract_strided_slice %204 {offsets = [0, 200], sizes = [8, 16], strides = [1, 1]} : vector<8x362xf32> to vector<8x16xf32>
    %249 = arith.maximumf %247, %248 : vector<8x16xf32>
    %cst_176 = arith.constant dense<0.000000e+00> : vector<8x8xf32>
    %250 = tpu.matmul %249, %211, %cst_176 {dimension_numbers = #tpu.dot_dimension_numbers<[1], [0], [0], [1], [0, 0, 1, 1], [], []>} : vector<8x16xf32>, vector<16x8xf32>, vector<8x8xf32> -> vector<8x8xf32>
    %cst_177 = arith.constant dense<0.000000e+00> : vector<8x8xf32>
    %251 = tpu.matmul %249, %218, %cst_177 {dimension_numbers = #tpu.dot_dimension_numbers<[1], [0], [0], [1], [0, 0, 1, 1], [], []>} : vector<8x16xf32>, vector<16x8xf32>, vector<8x8xf32> -> vector<8x8xf32>
    %252 = arith.maximumf %250, %251 : vector<8x8xf32>
    %c0_178 = arith.constant 0 : index
    %c62 = arith.constant 62 : index
    %253 = vector.load %arg28[%c0_178, %c62] : memref<16x122xf32, #tpu.memory_space<vmem>>, vector<8x8xf32>
    tpu.vector_store %arg28[%c0_178, %c62], %252 {strides = array<i32>} : memref<16x122xf32, #tpu.memory_space<vmem>>, vector<8x8xf32>,
    %254 = vector.extract_strided_slice %204 {offsets = [0, 218], sizes = [8, 16], strides = [1, 1]} : vector<8x362xf32> to vector<8x16xf32>
    %255 = vector.extract_strided_slice %204 {offsets = [0, 236], sizes = [8, 16], strides = [1, 1]} : vector<8x362xf32> to vector<8x16xf32>
    %256 = arith.maximumf %254, %255 : vector<8x16xf32>
    %cst_179 = arith.constant dense<0.000000e+00> : vector<8x8xf32>
    %257 = tpu.matmul %256, %211, %cst_179 {dimension_numbers = #tpu.dot_dimension_numbers<[1], [0], [0], [1], [0, 0, 1, 1], [], []>} : vector<8x16xf32>, vector<16x8xf32>, vector<8x8xf32> -> vector<8x8xf32>
    %cst_180 = arith.constant dense<0.000000e+00> : vector<8x8xf32>
    %258 = tpu.matmul %256, %218, %cst_180 {dimension_numbers = #tpu.dot_dimension_numbers<[1], [0], [0], [1], [0, 0, 1, 1], [], []>} : vector<8x16xf32>, vector<16x8xf32>, vector<8x8xf32> -> vector<8x8xf32>
    %259 = arith.maximumf %257, %258 : vector<8x8xf32>
    %c0_181 = arith.constant 0 : index
    %c72 = arith.constant 72 : index
    %260 = vector.load %arg28[%c0_181, %c72] : memref<16x122xf32, #tpu.memory_space<vmem>>, vector<8x8xf32>
    tpu.vector_store %arg28[%c0_181, %c72], %259 {strides = array<i32>} : memref<16x122xf32, #tpu.memory_space<vmem>>, vector<8x8xf32>,
    %261 = vector.extract_strided_slice %204 {offsets = [0, 254], sizes = [8, 16], strides = [1, 1]} : vector<8x362xf32> to vector<8x16xf32>
    %262 = vector.extract_strided_slice %204 {offsets = [0, 272], sizes = [8, 16], strides = [1, 1]} : vector<8x362xf32> to vector<8x16xf32>
    %263 = arith.maximumf %261, %262 : vector<8x16xf32>
    %cst_182 = arith.constant dense<0.000000e+00> : vector<8x8xf32>
    %264 = tpu.matmul %263, %211, %cst_182 {dimension_numbers = #tpu.dot_dimension_numbers<[1], [0], [0], [1], [0, 0, 1, 1], [], []>} : vector<8x16xf32>, vector<16x8xf32>, vector<8x8xf32> -> vector<8x8xf32>
    %cst_183 = arith.constant dense<0.000000e+00> : vector<8x8xf32>
    %265 = tpu.matmul %263, %218, %cst_183 {dimension_numbers = #tpu.dot_dimension_numbers<[1], [0], [0], [1], [0, 0, 1, 1], [], []>} : vector<8x16xf32>, vector<16x8xf32>, vector<8x8xf32> -> vector<8x8xf32>
    %266 = arith.maximumf %264, %265 : vector<8x8xf32>
    %c0_184 = arith.constant 0 : index
    %c82 = arith.constant 82 : index
    %267 = vector.load %arg28[%c0_184, %c82] : memref<16x122xf32, #tpu.memory_space<vmem>>, vector<8x8xf32>
    tpu.vector_store %arg28[%c0_184, %c82], %266 {strides = array<i32>} : memref<16x122xf32, #tpu.memory_space<vmem>>, vector<8x8xf32>,
    %268 = vector.extract_strided_slice %204 {offsets = [0, 290], sizes = [8, 16], strides = [1, 1]} : vector<8x362xf32> to vector<8x16xf32>
    %269 = vector.extract_strided_slice %204 {offsets = [0, 308], sizes = [8, 16], strides = [1, 1]} : vector<8x362xf32> to vector<8x16xf32>
    %270 = arith.maximumf %268, %269 : vector<8x16xf32>
    %cst_185 = arith.constant dense<0.000000e+00> : vector<8x8xf32>
    %271 = tpu.matmul %270, %211, %cst_185 {dimension_numbers = #tpu.dot_dimension_numbers<[1], [0], [0], [1], [0, 0, 1, 1], [], []>} : vector<8x16xf32>, vector<16x8xf32>, vector<8x8xf32> -> vector<8x8xf32>
    %cst_186 = arith.constant dense<0.000000e+00> : vector<8x8xf32>
    %272 = tpu.matmul %270, %218, %cst_186 {dimension_numbers = #tpu.dot_dimension_numbers<[1], [0], [0], [1], [0, 0, 1, 1], [], []>} : vector<8x16xf32>, vector<16x8xf32>, vector<8x8xf32> -> vector<8x8xf32>
    %273 = arith.maximumf %271, %272 : vector<8x8xf32>
    %c0_187 = arith.constant 0 : index
    %c92 = arith.constant 92 : index
    %274 = vector.load %arg28[%c0_187, %c92] : memref<16x122xf32, #tpu.memory_space<vmem>>, vector<8x8xf32>
    tpu.vector_store %arg28[%c0_187, %c92], %273 {strides = array<i32>} : memref<16x122xf32, #tpu.memory_space<vmem>>, vector<8x8xf32>,
    %c0_188 = arith.constant 0 : index
    %c0_189 = arith.constant 0 : index
    %275 = vector.load %arg28[%c0_188, %c0_189] : memref<16x122xf32, #tpu.memory_space<vmem>>, vector<16x122xf32>
    %276 = arith.truncf %275 : vector<16x122xf32> to vector<16x122xbf16>
    %cst_190 = arith.constant 0.000000e+00 : f32
    %277 = vector.broadcast %cst_190 : f32 to vector<16x100xf32>
    %278 = vector.extract_strided_slice %276 {offsets = [0, 0], sizes = [16, 100], strides = [1, 1]} : vector<16x122xbf16> to vector<16x100xbf16>
    %c0_191 = arith.constant 0 : index
    %c0_192 = arith.constant 0 : index
    %c0_193 = arith.constant 0 : index
    %279 = vector.load %arg5[%c0_191, %c0_192, %c0_193] : memref<9x16x16xbf16, #tpu.memory_space<vmem>>, vector<1x16x16xbf16>
    %280 = vector.shape_cast %279 : vector<1x16x16xbf16> to vector<16x16xbf16>
    %cst_194 = arith.constant dense<0.000000e+00> : vector<16x100xf32>
    %281 = tpu.matmul %280, %278, %cst_194 {dimension_numbers = #tpu.dot_dimension_numbers<[1], [0], [0], [1], [0, 0, 1, 1], [], []>} : vector<16x16xbf16>, vector<16x100xbf16>, vector<16x100xf32> -> vector<16x100xf32>
    %282 = arith.addf %277, %281 : vector<16x100xf32>
    %283 = vector.extract_strided_slice %276 {offsets = [0, 1], sizes = [16, 100], strides = [1, 1]} : vector<16x122xbf16> to vector<16x100xbf16>
    %c1_195 = arith.constant 1 : index
    %c0_196 = arith.constant 0 : index
    %c0_197 = arith.constant 0 : index
    %284 = vector.load %arg5[%c1_195, %c0_196, %c0_197] : memref<9x16x16xbf16, #tpu.memory_space<vmem>>, vector<1x16x16xbf16>
    %285 = vector.shape_cast %284 : vector<1x16x16xbf16> to vector<16x16xbf16>
    %cst_198 = arith.constant dense<0.000000e+00> : vector<16x100xf32>
    %286 = tpu.matmul %285, %283, %cst_198 {dimension_numbers = #tpu.dot_dimension_numbers<[1], [0], [0], [1], [0, 0, 1, 1], [], []>} : vector<16x16xbf16>, vector<16x100xbf16>, vector<16x100xf32> -> vector<16x100xf32>
    %287 = arith.addf %282, %286 : vector<16x100xf32>
    %288 = vector.extract_strided_slice %276 {offsets = [0, 2], sizes = [16, 100], strides = [1, 1]} : vector<16x122xbf16> to vector<16x100xbf16>
    %c2_199 = arith.constant 2 : index
    %c0_200 = arith.constant 0 : index
    %c0_201 = arith.constant 0 : index
    %289 = vector.load %arg5[%c2_199, %c0_200, %c0_201] : memref<9x16x16xbf16, #tpu.memory_space<vmem>>, vector<1x16x16xbf16>
    %290 = vector.shape_cast %289 : vector<1x16x16xbf16> to vector<16x16xbf16>
    %cst_202 = arith.constant dense<0.000000e+00> : vector<16x100xf32>
    %291 = tpu.matmul %290, %288, %cst_202 {dimension_numbers = #tpu.dot_dimension_numbers<[1], [0], [0], [1], [0, 0, 1, 1], [], []>} : vector<16x16xbf16>, vector<16x100xbf16>, vector<16x100xf32> -> vector<16x100xf32>
    %292 = arith.addf %287, %291 : vector<16x100xf32>
    %293 = vector.extract_strided_slice %276 {offsets = [0, 10], sizes = [16, 100], strides = [1, 1]} : vector<16x122xbf16> to vector<16x100xbf16>
    %c3_203 = arith.constant 3 : index
    %c0_204 = arith.constant 0 : index
    %c0_205 = arith.constant 0 : index
    %294 = vector.load %arg5[%c3_203, %c0_204, %c0_205] : memref<9x16x16xbf16, #tpu.memory_space<vmem>>, vector<1x16x16xbf16>
    %295 = vector.shape_cast %294 : vector<1x16x16xbf16> to vector<16x16xbf16>
    %cst_206 = arith.constant dense<0.000000e+00> : vector<16x100xf32>
    %296 = tpu.matmul %295, %293, %cst_206 {dimension_numbers = #tpu.dot_dimension_numbers<[1], [0], [0], [1], [0, 0, 1, 1], [], []>} : vector<16x16xbf16>, vector<16x100xbf16>, vector<16x100xf32> -> vector<16x100xf32>
    %297 = arith.addf %292, %296 : vector<16x100xf32>
    %298 = vector.extract_strided_slice %276 {offsets = [0, 11], sizes = [16, 100], strides = [1, 1]} : vector<16x122xbf16> to vector<16x100xbf16>
    %c4_207 = arith.constant 4 : index
    %c0_208 = arith.constant 0 : index
    %c0_209 = arith.constant 0 : index
    %299 = vector.load %arg5[%c4_207, %c0_208, %c0_209] : memref<9x16x16xbf16, #tpu.memory_space<vmem>>, vector<1x16x16xbf16>
    %300 = vector.shape_cast %299 : vector<1x16x16xbf16> to vector<16x16xbf16>
    %cst_210 = arith.constant dense<0.000000e+00> : vector<16x100xf32>
    %301 = tpu.matmul %300, %298, %cst_210 {dimension_numbers = #tpu.dot_dimension_numbers<[1], [0], [0], [1], [0, 0, 1, 1], [], []>} : vector<16x16xbf16>, vector<16x100xbf16>, vector<16x100xf32> -> vector<16x100xf32>
    %302 = arith.addf %297, %301 : vector<16x100xf32>
    %303 = vector.extract_strided_slice %276 {offsets = [0, 12], sizes = [16, 100], strides = [1, 1]} : vector<16x122xbf16> to vector<16x100xbf16>
    %c5_211 = arith.constant 5 : index
    %c0_212 = arith.constant 0 : index
    %c0_213 = arith.constant 0 : index
    %304 = vector.load %arg5[%c5_211, %c0_212, %c0_213] : memref<9x16x16xbf16, #tpu.memory_space<vmem>>, vector<1x16x16xbf16>
    %305 = vector.shape_cast %304 : vector<1x16x16xbf16> to vector<16x16xbf16>
    %cst_214 = arith.constant dense<0.000000e+00> : vector<16x100xf32>
    %306 = tpu.matmul %305, %303, %cst_214 {dimension_numbers = #tpu.dot_dimension_numbers<[1], [0], [0], [1], [0, 0, 1, 1], [], []>} : vector<16x16xbf16>, vector<16x100xbf16>, vector<16x100xf32> -> vector<16x100xf32>
    %307 = arith.addf %302, %306 : vector<16x100xf32>
    %308 = vector.extract_strided_slice %276 {offsets = [0, 20], sizes = [16, 100], strides = [1, 1]} : vector<16x122xbf16> to vector<16x100xbf16>
    %c6_215 = arith.constant 6 : index
    %c0_216 = arith.constant 0 : index
    %c0_217 = arith.constant 0 : index
    %309 = vector.load %arg5[%c6_215, %c0_216, %c0_217] : memref<9x16x16xbf16, #tpu.memory_space<vmem>>, vector<1x16x16xbf16>
    %310 = vector.shape_cast %309 : vector<1x16x16xbf16> to vector<16x16xbf16>
    %cst_218 = arith.constant dense<0.000000e+00> : vector<16x100xf32>
    %311 = tpu.matmul %310, %308, %cst_218 {dimension_numbers = #tpu.dot_dimension_numbers<[1], [0], [0], [1], [0, 0, 1, 1], [], []>} : vector<16x16xbf16>, vector<16x100xbf16>, vector<16x100xf32> -> vector<16x100xf32>
    %312 = arith.addf %307, %311 : vector<16x100xf32>
    %313 = vector.extract_strided_slice %276 {offsets = [0, 21], sizes = [16, 100], strides = [1, 1]} : vector<16x122xbf16> to vector<16x100xbf16>
    %c7_219 = arith.constant 7 : index
    %c0_220 = arith.constant 0 : index
    %c0_221 = arith.constant 0 : index
    %314 = vector.load %arg5[%c7_219, %c0_220, %c0_221] : memref<9x16x16xbf16, #tpu.memory_space<vmem>>, vector<1x16x16xbf16>
    %315 = vector.shape_cast %314 : vector<1x16x16xbf16> to vector<16x16xbf16>
    %cst_222 = arith.constant dense<0.000000e+00> : vector<16x100xf32>
    %316 = tpu.matmul %315, %313, %cst_222 {dimension_numbers = #tpu.dot_dimension_numbers<[1], [0], [0], [1], [0, 0, 1, 1], [], []>} : vector<16x16xbf16>, vector<16x100xbf16>, vector<16x100xf32> -> vector<16x100xf32>
    %317 = arith.addf %312, %316 : vector<16x100xf32>
    %318 = vector.extract_strided_slice %276 {offsets = [0, 22], sizes = [16, 100], strides = [1, 1]} : vector<16x122xbf16> to vector<16x100xbf16>
    %c8_223 = arith.constant 8 : index
    %c0_224 = arith.constant 0 : index
    %c0_225 = arith.constant 0 : index
    %319 = vector.load %arg5[%c8_223, %c0_224, %c0_225] : memref<9x16x16xbf16, #tpu.memory_space<vmem>>, vector<1x16x16xbf16>
    %320 = vector.shape_cast %319 : vector<1x16x16xbf16> to vector<16x16xbf16>
    %cst_226 = arith.constant dense<0.000000e+00> : vector<16x100xf32>
    %321 = tpu.matmul %320, %318, %cst_226 {dimension_numbers = #tpu.dot_dimension_numbers<[1], [0], [0], [1], [0, 0, 1, 1], [], []>} : vector<16x16xbf16>, vector<16x100xbf16>, vector<16x100xf32> -> vector<16x100xf32>
    %322 = arith.addf %317, %321 : vector<16x100xf32>
    %c0_227 = arith.constant 0 : index
    %c0_228 = arith.constant 0 : index
    %c0_229 = arith.constant 0 : index
    %323 = vector.load %arg14[%c0_227, %c0_228, %c0_229] : memref<2x16x1xf32, #tpu.memory_space<vmem>>, vector<1x16x1xf32>
    %324 = vector.shape_cast %323 : vector<1x16x1xf32> to vector<16x1xf32>
    %325 = vector.broadcast %324 : vector<16x1xf32> to vector<16x100xf32>
    %326 = arith.mulf %322, %325 : vector<16x100xf32>
    %c1_230 = arith.constant 1 : index
    %c0_231 = arith.constant 0 : index
    %c0_232 = arith.constant 0 : index
    %327 = vector.load %arg14[%c1_230, %c0_231, %c0_232] : memref<2x16x1xf32, #tpu.memory_space<vmem>>, vector<1x16x1xf32>
    %328 = vector.shape_cast %327 : vector<1x16x1xf32> to vector<16x1xf32>
    %329 = vector.broadcast %328 : vector<16x1xf32> to vector<16x100xf32>
    %330 = arith.addf %326, %329 : vector<16x100xf32>
    %cst_233 = arith.constant 1.000000e-01 : f32
    %331 = vector.broadcast %cst_233 : f32 to vector<16x100xf32>
    %332 = arith.mulf %331, %330 : vector<16x100xf32>
    %333 = arith.maximumf %330, %332 : vector<16x100xf32>
    %334 = vector.broadcast %15 : vector<1x100xf32> to vector<16x100xf32>
    %335 = arith.mulf %333, %334 : vector<16x100xf32>
    %c0_234 = arith.constant 0 : index
    %c11 = arith.constant 11 : index
    %336 = vector.load %arg29[%c0_234, %c11] : memref<16x122xf32, #tpu.memory_space<vmem>>, vector<16x100xf32>
    tpu.vector_store %arg29[%c0_234, %c11], %335 {strides = array<i32>} : memref<16x122xf32, #tpu.memory_space<vmem>>, vector<16x100xf32>,
    %c0_235 = arith.constant 0 : index
    %c0_236 = arith.constant 0 : index
    %337 = vector.load %arg29[%c0_235, %c0_236] : memref<16x122xf32, #tpu.memory_space<vmem>>, vector<16x122xf32>
    %338 = arith.truncf %337 : vector<16x122xf32> to vector<16x122xbf16>
    %cst_237 = arith.constant 0.000000e+00 : f32
    %339 = vector.broadcast %cst_237 : f32 to vector<16x100xf32>
    %340 = vector.extract_strided_slice %338 {offsets = [0, 0], sizes = [16, 100], strides = [1, 1]} : vector<16x122xbf16> to vector<16x100xbf16>
    %c0_238 = arith.constant 0 : index
    %c0_239 = arith.constant 0 : index
    %c0_240 = arith.constant 0 : index
    %341 = vector.load %arg6[%c0_238, %c0_239, %c0_240] : memref<9x16x16xbf16, #tpu.memory_space<vmem>>, vector<1x16x16xbf16>
    %342 = vector.shape_cast %341 : vector<1x16x16xbf16> to vector<16x16xbf16>
    %cst_241 = arith.constant dense<0.000000e+00> : vector<16x100xf32>
    %343 = tpu.matmul %342, %340, %cst_241 {dimension_numbers = #tpu.dot_dimension_numbers<[1], [0], [0], [1], [0, 0, 1, 1], [], []>} : vector<16x16xbf16>, vector<16x100xbf16>, vector<16x100xf32> -> vector<16x100xf32>
    %344 = arith.addf %339, %343 : vector<16x100xf32>
    %345 = vector.extract_strided_slice %338 {offsets = [0, 1], sizes = [16, 100], strides = [1, 1]} : vector<16x122xbf16> to vector<16x100xbf16>
    %c1_242 = arith.constant 1 : index
    %c0_243 = arith.constant 0 : index
    %c0_244 = arith.constant 0 : index
    %346 = vector.load %arg6[%c1_242, %c0_243, %c0_244] : memref<9x16x16xbf16, #tpu.memory_space<vmem>>, vector<1x16x16xbf16>
    %347 = vector.shape_cast %346 : vector<1x16x16xbf16> to vector<16x16xbf16>
    %cst_245 = arith.constant dense<0.000000e+00> : vector<16x100xf32>
    %348 = tpu.matmul %347, %345, %cst_245 {dimension_numbers = #tpu.dot_dimension_numbers<[1], [0], [0], [1], [0, 0, 1, 1], [], []>} : vector<16x16xbf16>, vector<16x100xbf16>, vector<16x100xf32> -> vector<16x100xf32>
    %349 = arith.addf %344, %348 : vector<16x100xf32>
    %350 = vector.extract_strided_slice %338 {offsets = [0, 2], sizes = [16, 100], strides = [1, 1]} : vector<16x122xbf16> to vector<16x100xbf16>
    %c2_246 = arith.constant 2 : index
    %c0_247 = arith.constant 0 : index
    %c0_248 = arith.constant 0 : index
    %351 = vector.load %arg6[%c2_246, %c0_247, %c0_248] : memref<9x16x16xbf16, #tpu.memory_space<vmem>>, vector<1x16x16xbf16>
    %352 = vector.shape_cast %351 : vector<1x16x16xbf16> to vector<16x16xbf16>
    %cst_249 = arith.constant dense<0.000000e+00> : vector<16x100xf32>
    %353 = tpu.matmul %352, %350, %cst_249 {dimension_numbers = #tpu.dot_dimension_numbers<[1], [0], [0], [1], [0, 0, 1, 1], [], []>} : vector<16x16xbf16>, vector<16x100xbf16>, vector<16x100xf32> -> vector<16x100xf32>
    %354 = arith.addf %349, %353 : vector<16x100xf32>
    %355 = vector.extract_strided_slice %338 {offsets = [0, 10], sizes = [16, 100], strides = [1, 1]} : vector<16x122xbf16> to vector<16x100xbf16>
    %c3_250 = arith.constant 3 : index
    %c0_251 = arith.constant 0 : index
    %c0_252 = arith.constant 0 : index
    %356 = vector.load %arg6[%c3_250, %c0_251, %c0_252] : memref<9x16x16xbf16, #tpu.memory_space<vmem>>, vector<1x16x16xbf16>
    %357 = vector.shape_cast %356 : vector<1x16x16xbf16> to vector<16x16xbf16>
    %cst_253 = arith.constant dense<0.000000e+00> : vector<16x100xf32>
    %358 = tpu.matmul %357, %355, %cst_253 {dimension_numbers = #tpu.dot_dimension_numbers<[1], [0], [0], [1], [0, 0, 1, 1], [], []>} : vector<16x16xbf16>, vector<16x100xbf16>, vector<16x100xf32> -> vector<16x100xf32>
    %359 = arith.addf %354, %358 : vector<16x100xf32>
    %360 = vector.extract_strided_slice %338 {offsets = [0, 11], sizes = [16, 100], strides = [1, 1]} : vector<16x122xbf16> to vector<16x100xbf16>
    %c4_254 = arith.constant 4 : index
    %c0_255 = arith.constant 0 : index
    %c0_256 = arith.constant 0 : index
    %361 = vector.load %arg6[%c4_254, %c0_255, %c0_256] : memref<9x16x16xbf16, #tpu.memory_space<vmem>>, vector<1x16x16xbf16>
    %362 = vector.shape_cast %361 : vector<1x16x16xbf16> to vector<16x16xbf16>
    %cst_257 = arith.constant dense<0.000000e+00> : vector<16x100xf32>
    %363 = tpu.matmul %362, %360, %cst_257 {dimension_numbers = #tpu.dot_dimension_numbers<[1], [0], [0], [1], [0, 0, 1, 1], [], []>} : vector<16x16xbf16>, vector<16x100xbf16>, vector<16x100xf32> -> vector<16x100xf32>
    %364 = arith.addf %359, %363 : vector<16x100xf32>
    %365 = vector.extract_strided_slice %338 {offsets = [0, 12], sizes = [16, 100], strides = [1, 1]} : vector<16x122xbf16> to vector<16x100xbf16>
    %c5_258 = arith.constant 5 : index
    %c0_259 = arith.constant 0 : index
    %c0_260 = arith.constant 0 : index
    %366 = vector.load %arg6[%c5_258, %c0_259, %c0_260] : memref<9x16x16xbf16, #tpu.memory_space<vmem>>, vector<1x16x16xbf16>
    %367 = vector.shape_cast %366 : vector<1x16x16xbf16> to vector<16x16xbf16>
    %cst_261 = arith.constant dense<0.000000e+00> : vector<16x100xf32>
    %368 = tpu.matmul %367, %365, %cst_261 {dimension_numbers = #tpu.dot_dimension_numbers<[1], [0], [0], [1], [0, 0, 1, 1], [], []>} : vector<16x16xbf16>, vector<16x100xbf16>, vector<16x100xf32> -> vector<16x100xf32>
    %369 = arith.addf %364, %368 : vector<16x100xf32>
    %370 = vector.extract_strided_slice %338 {offsets = [0, 20], sizes = [16, 100], strides = [1, 1]} : vector<16x122xbf16> to vector<16x100xbf16>
    %c6_262 = arith.constant 6 : index
    %c0_263 = arith.constant 0 : index
    %c0_264 = arith.constant 0 : index
    %371 = vector.load %arg6[%c6_262, %c0_263, %c0_264] : memref<9x16x16xbf16, #tpu.memory_space<vmem>>, vector<1x16x16xbf16>
    %372 = vector.shape_cast %371 : vector<1x16x16xbf16> to vector<16x16xbf16>
    %cst_265 = arith.constant dense<0.000000e+00> : vector<16x100xf32>
    %373 = tpu.matmul %372, %370, %cst_265 {dimension_numbers = #tpu.dot_dimension_numbers<[1], [0], [0], [1], [0, 0, 1, 1], [], []>} : vector<16x16xbf16>, vector<16x100xbf16>, vector<16x100xf32> -> vector<16x100xf32>
    %374 = arith.addf %369, %373 : vector<16x100xf32>
    %375 = vector.extract_strided_slice %338 {offsets = [0, 21], sizes = [16, 100], strides = [1, 1]} : vector<16x122xbf16> to vector<16x100xbf16>
    %c7_266 = arith.constant 7 : index
    %c0_267 = arith.constant 0 : index
    %c0_268 = arith.constant 0 : index
    %376 = vector.load %arg6[%c7_266, %c0_267, %c0_268] : memref<9x16x16xbf16, #tpu.memory_space<vmem>>, vector<1x16x16xbf16>
    %377 = vector.shape_cast %376 : vector<1x16x16xbf16> to vector<16x16xbf16>
    %cst_269 = arith.constant dense<0.000000e+00> : vector<16x100xf32>
    %378 = tpu.matmul %377, %375, %cst_269 {dimension_numbers = #tpu.dot_dimension_numbers<[1], [0], [0], [1], [0, 0, 1, 1], [], []>} : vector<16x16xbf16>, vector<16x100xbf16>, vector<16x100xf32> -> vector<16x100xf32>
    %379 = arith.addf %374, %378 : vector<16x100xf32>
    %380 = vector.extract_strided_slice %338 {offsets = [0, 22], sizes = [16, 100], strides = [1, 1]} : vector<16x122xbf16> to vector<16x100xbf16>
    %c8_270 = arith.constant 8 : index
    %c0_271 = arith.constant 0 : index
    %c0_272 = arith.constant 0 : index
    %381 = vector.load %arg6[%c8_270, %c0_271, %c0_272] : memref<9x16x16xbf16, #tpu.memory_space<vmem>>, vector<1x16x16xbf16>
    %382 = vector.shape_cast %381 : vector<1x16x16xbf16> to vector<16x16xbf16>
    %cst_273 = arith.constant dense<0.000000e+00> : vector<16x100xf32>
    %383 = tpu.matmul %382, %380, %cst_273 {dimension_numbers = #tpu.dot_dimension_numbers<[1], [0], [0], [1], [0, 0, 1, 1], [], []>} : vector<16x16xbf16>, vector<16x100xbf16>, vector<16x100xf32> -> vector<16x100xf32>
    %384 = arith.addf %379, %383 : vector<16x100xf32>
    %c0_274 = arith.constant 0 : index
    %c0_275 = arith.constant 0 : index
    %c0_276 = arith.constant 0 : index
    %385 = vector.load %arg15[%c0_274, %c0_275, %c0_276] : memref<2x16x1xf32, #tpu.memory_space<vmem>>, vector<1x16x1xf32>
    %386 = vector.shape_cast %385 : vector<1x16x1xf32> to vector<16x1xf32>
    %387 = vector.broadcast %386 : vector<16x1xf32> to vector<16x100xf32>
    %388 = arith.mulf %384, %387 : vector<16x100xf32>
    %c1_277 = arith.constant 1 : index
    %c0_278 = arith.constant 0 : index
    %c0_279 = arith.constant 0 : index
    %389 = vector.load %arg15[%c1_277, %c0_278, %c0_279] : memref<2x16x1xf32, #tpu.memory_space<vmem>>, vector<1x16x1xf32>
    %390 = vector.shape_cast %389 : vector<1x16x1xf32> to vector<16x1xf32>
    %391 = vector.broadcast %390 : vector<16x1xf32> to vector<16x100xf32>
    %392 = arith.addf %388, %391 : vector<16x100xf32>
    %cst_280 = arith.constant 1.000000e-01 : f32
    %393 = vector.broadcast %cst_280 : f32 to vector<16x100xf32>
    %394 = arith.mulf %393, %392 : vector<16x100xf32>
    %395 = arith.maximumf %392, %394 : vector<16x100xf32>
    %396 = vector.broadcast %15 : vector<1x100xf32> to vector<16x100xf32>
    %397 = arith.mulf %395, %396 : vector<16x100xf32>
    %c0_281 = arith.constant 0 : index
    %c11_282 = arith.constant 11 : index
    %398 = vector.load %arg28[%c0_281, %c11_282] : memref<16x122xf32, #tpu.memory_space<vmem>>, vector<16x100xf32>
    tpu.vector_store %arg28[%c0_281, %c11_282], %397 {strides = array<i32>} : memref<16x122xf32, #tpu.memory_space<vmem>>, vector<16x100xf32>,
    %c0_283 = arith.constant 0 : index
    %c0_284 = arith.constant 0 : index
    %399 = vector.load %arg28[%c0_283, %c0_284] : memref<16x122xf32, #tpu.memory_space<vmem>>, vector<16x122xf32>
    %400 = arith.truncf %399 : vector<16x122xf32> to vector<16x122xbf16>
    %cst_285 = arith.constant 0.000000e+00 : f32
    %401 = vector.broadcast %cst_285 : f32 to vector<16x100xf32>
    %402 = vector.extract_strided_slice %400 {offsets = [0, 0], sizes = [16, 100], strides = [1, 1]} : vector<16x122xbf16> to vector<16x100xbf16>
    %c0_286 = arith.constant 0 : index
    %c0_287 = arith.constant 0 : index
    %c0_288 = arith.constant 0 : index
    %403 = vector.load %arg7[%c0_286, %c0_287, %c0_288] : memref<9x16x16xbf16, #tpu.memory_space<vmem>>, vector<1x16x16xbf16>
    %404 = vector.shape_cast %403 : vector<1x16x16xbf16> to vector<16x16xbf16>
    %cst_289 = arith.constant dense<0.000000e+00> : vector<16x100xf32>
    %405 = tpu.matmul %404, %402, %cst_289 {dimension_numbers = #tpu.dot_dimension_numbers<[1], [0], [0], [1], [0, 0, 1, 1], [], []>} : vector<16x16xbf16>, vector<16x100xbf16>, vector<16x100xf32> -> vector<16x100xf32>
    %406 = arith.addf %401, %405 : vector<16x100xf32>
    %407 = vector.extract_strided_slice %400 {offsets = [0, 1], sizes = [16, 100], strides = [1, 1]} : vector<16x122xbf16> to vector<16x100xbf16>
    %c1_290 = arith.constant 1 : index
    %c0_291 = arith.constant 0 : index
    %c0_292 = arith.constant 0 : index
    %408 = vector.load %arg7[%c1_290, %c0_291, %c0_292] : memref<9x16x16xbf16, #tpu.memory_space<vmem>>, vector<1x16x16xbf16>
    %409 = vector.shape_cast %408 : vector<1x16x16xbf16> to vector<16x16xbf16>
    %cst_293 = arith.constant dense<0.000000e+00> : vector<16x100xf32>
    %410 = tpu.matmul %409, %407, %cst_293 {dimension_numbers = #tpu.dot_dimension_numbers<[1], [0], [0], [1], [0, 0, 1, 1], [], []>} : vector<16x16xbf16>, vector<16x100xbf16>, vector<16x100xf32> -> vector<16x100xf32>
    %411 = arith.addf %406, %410 : vector<16x100xf32>
    %412 = vector.extract_strided_slice %400 {offsets = [0, 2], sizes = [16, 100], strides = [1, 1]} : vector<16x122xbf16> to vector<16x100xbf16>
    %c2_294 = arith.constant 2 : index
    %c0_295 = arith.constant 0 : index
    %c0_296 = arith.constant 0 : index
    %413 = vector.load %arg7[%c2_294, %c0_295, %c0_296] : memref<9x16x16xbf16, #tpu.memory_space<vmem>>, vector<1x16x16xbf16>
    %414 = vector.shape_cast %413 : vector<1x16x16xbf16> to vector<16x16xbf16>
    %cst_297 = arith.constant dense<0.000000e+00> : vector<16x100xf32>
    %415 = tpu.matmul %414, %412, %cst_297 {dimension_numbers = #tpu.dot_dimension_numbers<[1], [0], [0], [1], [0, 0, 1, 1], [], []>} : vector<16x16xbf16>, vector<16x100xbf16>, vector<16x100xf32> -> vector<16x100xf32>
    %416 = arith.addf %411, %415 : vector<16x100xf32>
    %417 = vector.extract_strided_slice %400 {offsets = [0, 10], sizes = [16, 100], strides = [1, 1]} : vector<16x122xbf16> to vector<16x100xbf16>
    %c3_298 = arith.constant 3 : index
    %c0_299 = arith.constant 0 : index
    %c0_300 = arith.constant 0 : index
    %418 = vector.load %arg7[%c3_298, %c0_299, %c0_300] : memref<9x16x16xbf16, #tpu.memory_space<vmem>>, vector<1x16x16xbf16>
    %419 = vector.shape_cast %418 : vector<1x16x16xbf16> to vector<16x16xbf16>
    %cst_301 = arith.constant dense<0.000000e+00> : vector<16x100xf32>
    %420 = tpu.matmul %419, %417, %cst_301 {dimension_numbers = #tpu.dot_dimension_numbers<[1], [0], [0], [1], [0, 0, 1, 1], [], []>} : vector<16x16xbf16>, vector<16x100xbf16>, vector<16x100xf32> -> vector<16x100xf32>
    %421 = arith.addf %416, %420 : vector<16x100xf32>
    %422 = vector.extract_strided_slice %400 {offsets = [0, 11], sizes = [16, 100], strides = [1, 1]} : vector<16x122xbf16> to vector<16x100xbf16>
    %c4_302 = arith.constant 4 : index
    %c0_303 = arith.constant 0 : index
    %c0_304 = arith.constant 0 : index
    %423 = vector.load %arg7[%c4_302, %c0_303, %c0_304] : memref<9x16x16xbf16, #tpu.memory_space<vmem>>, vector<1x16x16xbf16>
    %424 = vector.shape_cast %423 : vector<1x16x16xbf16> to vector<16x16xbf16>
    %cst_305 = arith.constant dense<0.000000e+00> : vector<16x100xf32>
    %425 = tpu.matmul %424, %422, %cst_305 {dimension_numbers = #tpu.dot_dimension_numbers<[1], [0], [0], [1], [0, 0, 1, 1], [], []>} : vector<16x16xbf16>, vector<16x100xbf16>, vector<16x100xf32> -> vector<16x100xf32>
    %426 = arith.addf %421, %425 : vector<16x100xf32>
    %427 = vector.extract_strided_slice %400 {offsets = [0, 12], sizes = [16, 100], strides = [1, 1]} : vector<16x122xbf16> to vector<16x100xbf16>
    %c5_306 = arith.constant 5 : index
    %c0_307 = arith.constant 0 : index
    %c0_308 = arith.constant 0 : index
    %428 = vector.load %arg7[%c5_306, %c0_307, %c0_308] : memref<9x16x16xbf16, #tpu.memory_space<vmem>>, vector<1x16x16xbf16>
    %429 = vector.shape_cast %428 : vector<1x16x16xbf16> to vector<16x16xbf16>
    %cst_309 = arith.constant dense<0.000000e+00> : vector<16x100xf32>
    %430 = tpu.matmul %429, %427, %cst_309 {dimension_numbers = #tpu.dot_dimension_numbers<[1], [0], [0], [1], [0, 0, 1, 1], [], []>} : vector<16x16xbf16>, vector<16x100xbf16>, vector<16x100xf32> -> vector<16x100xf32>
    %431 = arith.addf %426, %430 : vector<16x100xf32>
    %432 = vector.extract_strided_slice %400 {offsets = [0, 20], sizes = [16, 100], strides = [1, 1]} : vector<16x122xbf16> to vector<16x100xbf16>
    %c6_310 = arith.constant 6 : index
    %c0_311 = arith.constant 0 : index
    %c0_312 = arith.constant 0 : index
    %433 = vector.load %arg7[%c6_310, %c0_311, %c0_312] : memref<9x16x16xbf16, #tpu.memory_space<vmem>>, vector<1x16x16xbf16>
    %434 = vector.shape_cast %433 : vector<1x16x16xbf16> to vector<16x16xbf16>
    %cst_313 = arith.constant dense<0.000000e+00> : vector<16x100xf32>
    %435 = tpu.matmul %434, %432, %cst_313 {dimension_numbers = #tpu.dot_dimension_numbers<[1], [0], [0], [1], [0, 0, 1, 1], [], []>} : vector<16x16xbf16>, vector<16x100xbf16>, vector<16x100xf32> -> vector<16x100xf32>
    %436 = arith.addf %431, %435 : vector<16x100xf32>
    %437 = vector.extract_strided_slice %400 {offsets = [0, 21], sizes = [16, 100], strides = [1, 1]} : vector<16x122xbf16> to vector<16x100xbf16>
    %c7_314 = arith.constant 7 : index
    %c0_315 = arith.constant 0 : index
    %c0_316 = arith.constant 0 : index
    %438 = vector.load %arg7[%c7_314, %c0_315, %c0_316] : memref<9x16x16xbf16, #tpu.memory_space<vmem>>, vector<1x16x16xbf16>
    %439 = vector.shape_cast %438 : vector<1x16x16xbf16> to vector<16x16xbf16>
    %cst_317 = arith.constant dense<0.000000e+00> : vector<16x100xf32>
    %440 = tpu.matmul %439, %437, %cst_317 {dimension_numbers = #tpu.dot_dimension_numbers<[1], [0], [0], [1], [0, 0, 1, 1], [], []>} : vector<16x16xbf16>, vector<16x100xbf16>, vector<16x100xf32> -> vector<16x100xf32>
    %441 = arith.addf %436, %440 : vector<16x100xf32>
    %442 = vector.extract_strided_slice %400 {offsets = [0, 22], sizes = [16, 100], strides = [1, 1]} : vector<16x122xbf16> to vector<16x100xbf16>
    %c8_318 = arith.constant 8 : index
    %c0_319 = arith.constant 0 : index
    %c0_320 = arith.constant 0 : index
    %443 = vector.load %arg7[%c8_318, %c0_319, %c0_320] : memref<9x16x16xbf16, #tpu.memory_space<vmem>>, vector<1x16x16xbf16>
    %444 = vector.shape_cast %443 : vector<1x16x16xbf16> to vector<16x16xbf16>
    %cst_321 = arith.constant dense<0.000000e+00> : vector<16x100xf32>
    %445 = tpu.matmul %444, %442, %cst_321 {dimension_numbers = #tpu.dot_dimension_numbers<[1], [0], [0], [1], [0, 0, 1, 1], [], []>} : vector<16x16xbf16>, vector<16x100xbf16>, vector<16x100xf32> -> vector<16x100xf32>
    %446 = arith.addf %441, %445 : vector<16x100xf32>
    %c0_322 = arith.constant 0 : index
    %c0_323 = arith.constant 0 : index
    %c0_324 = arith.constant 0 : index
    %447 = vector.load %arg16[%c0_322, %c0_323, %c0_324] : memref<2x16x1xf32, #tpu.memory_space<vmem>>, vector<1x16x1xf32>
    %448 = vector.shape_cast %447 : vector<1x16x1xf32> to vector<16x1xf32>
    %449 = vector.broadcast %448 : vector<16x1xf32> to vector<16x100xf32>
    %450 = arith.mulf %446, %449 : vector<16x100xf32>
    %c1_325 = arith.constant 1 : index
    %c0_326 = arith.constant 0 : index
    %c0_327 = arith.constant 0 : index
    %451 = vector.load %arg16[%c1_325, %c0_326, %c0_327] : memref<2x16x1xf32, #tpu.memory_space<vmem>>, vector<1x16x1xf32>
    %452 = vector.shape_cast %451 : vector<1x16x1xf32> to vector<16x1xf32>
    %453 = vector.broadcast %452 : vector<16x1xf32> to vector<16x100xf32>
    %454 = arith.addf %450, %453 : vector<16x100xf32>
    %cst_328 = arith.constant 1.000000e-01 : f32
    %455 = vector.broadcast %cst_328 : f32 to vector<16x100xf32>
    %456 = arith.mulf %455, %454 : vector<16x100xf32>
    %457 = arith.maximumf %454, %456 : vector<16x100xf32>
    %458 = vector.broadcast %15 : vector<1x100xf32> to vector<16x100xf32>
    %459 = arith.mulf %457, %458 : vector<16x100xf32>
    %c0_329 = arith.constant 0 : index
    %c11_330 = arith.constant 11 : index
    %460 = vector.load %arg29[%c0_329, %c11_330] : memref<16x122xf32, #tpu.memory_space<vmem>>, vector<16x100xf32>
    tpu.vector_store %arg29[%c0_329, %c11_330], %459 {strides = array<i32>} : memref<16x122xf32, #tpu.memory_space<vmem>>, vector<16x100xf32>,
    %c0_331 = arith.constant 0 : index
    %c0_332 = arith.constant 0 : index
    %461 = vector.load %arg29[%c0_331, %c0_332] : memref<16x122xf32, #tpu.memory_space<vmem>>, vector<16x122xf32>
    %462 = tpu.iota {dimensions = array<i32: 0>} : vector<8x4xi32>
    %463 = tpu.iota {dimensions = array<i32: 1>} : vector<8x4xi32>
    %c2_i32_333 = arith.constant 2 : i32
    %464 = vector.broadcast %c2_i32_333 : i32 to vector<8x4xi32>
    %465 = arith.muli %464, %463 : vector<8x4xi32>
    %466 = arith.cmpi eq, %462, %465 : vector<8x4xi32>
    %467 = arith.extui %466 : vector<8x4xi1> to vector<8x4xi32>
    %468 = arith.sitofp %467 : vector<8x4xi32> to vector<8x4xf32>
    %c2_i32_334 = arith.constant 2 : i32
    %469 = vector.broadcast %c2_i32_334 : i32 to vector<8x4xi32>
    %470 = arith.muli %469, %463 : vector<8x4xi32>
    %c1_i32_335 = arith.constant 1 : i32
    %471 = vector.broadcast %c1_i32_335 : i32 to vector<8x4xi32>
    %472 = arith.addi %470, %471 : vector<8x4xi32>
    %473 = arith.cmpi eq, %462, %472 : vector<8x4xi32>
    %474 = arith.extui %473 : vector<8x4xi1> to vector<8x4xi32>
    %475 = arith.sitofp %474 : vector<8x4xi32> to vector<8x4xf32>
    %476 = vector.extract_strided_slice %461 {offsets = [0, 22], sizes = [16, 8], strides = [1, 1]} : vector<16x122xf32> to vector<16x8xf32>
    %477 = vector.extract_strided_slice %461 {offsets = [0, 32], sizes = [16, 8], strides = [1, 1]} : vector<16x122xf32> to vector<16x8xf32>
    %478 = arith.maximumf %476, %477 : vector<16x8xf32>
    %cst_336 = arith.constant dense<0.000000e+00> : vector<16x4xf32>
    %479 = tpu.matmul %478, %468, %cst_336 {dimension_numbers = #tpu.dot_dimension_numbers<[1], [0], [0], [1], [0, 0, 1, 1], [], []>} : vector<16x8xf32>, vector<8x4xf32>, vector<16x4xf32> -> vector<16x4xf32>
    %cst_337 = arith.constant dense<0.000000e+00> : vector<16x4xf32>
    %480 = tpu.matmul %478, %475, %cst_337 {dimension_numbers = #tpu.dot_dimension_numbers<[1], [0], [0], [1], [0, 0, 1, 1], [], []>} : vector<16x8xf32>, vector<8x4xf32>, vector<16x4xf32> -> vector<16x4xf32>
    %481 = arith.maximumf %479, %480 : vector<16x4xf32>
    %c0_338 = arith.constant 0 : index
    %c5_339 = arith.constant 5 : index
    %482 = vector.load %arg30[%c0_338, %c5_339] : memref<16x26xf32, #tpu.memory_space<vmem>>, vector<16x4xf32>
    tpu.vector_store %arg30[%c0_338, %c5_339], %481 {strides = array<i32>} : memref<16x26xf32, #tpu.memory_space<vmem>>, vector<16x4xf32>,
    %483 = vector.extract_strided_slice %461 {offsets = [0, 42], sizes = [16, 8], strides = [1, 1]} : vector<16x122xf32> to vector<16x8xf32>
    %484 = vector.extract_strided_slice %461 {offsets = [0, 52], sizes = [16, 8], strides = [1, 1]} : vector<16x122xf32> to vector<16x8xf32>
    %485 = arith.maximumf %483, %484 : vector<16x8xf32>
    %cst_340 = arith.constant dense<0.000000e+00> : vector<16x4xf32>
    %486 = tpu.matmul %485, %468, %cst_340 {dimension_numbers = #tpu.dot_dimension_numbers<[1], [0], [0], [1], [0, 0, 1, 1], [], []>} : vector<16x8xf32>, vector<8x4xf32>, vector<16x4xf32> -> vector<16x4xf32>
    %cst_341 = arith.constant dense<0.000000e+00> : vector<16x4xf32>
    %487 = tpu.matmul %485, %475, %cst_341 {dimension_numbers = #tpu.dot_dimension_numbers<[1], [0], [0], [1], [0, 0, 1, 1], [], []>} : vector<16x8xf32>, vector<8x4xf32>, vector<16x4xf32> -> vector<16x4xf32>
    %488 = arith.maximumf %486, %487 : vector<16x4xf32>
    %c0_342 = arith.constant 0 : index
    %c9 = arith.constant 9 : index
    %489 = vector.load %arg30[%c0_342, %c9] : memref<16x26xf32, #tpu.memory_space<vmem>>, vector<16x4xf32>
    tpu.vector_store %arg30[%c0_342, %c9], %488 {strides = array<i32>} : memref<16x26xf32, #tpu.memory_space<vmem>>, vector<16x4xf32>,
    %490 = vector.extract_strided_slice %461 {offsets = [0, 62], sizes = [16, 8], strides = [1, 1]} : vector<16x122xf32> to vector<16x8xf32>
    %491 = vector.extract_strided_slice %461 {offsets = [0, 72], sizes = [16, 8], strides = [1, 1]} : vector<16x122xf32> to vector<16x8xf32>
    %492 = arith.maximumf %490, %491 : vector<16x8xf32>
    %cst_343 = arith.constant dense<0.000000e+00> : vector<16x4xf32>
    %493 = tpu.matmul %492, %468, %cst_343 {dimension_numbers = #tpu.dot_dimension_numbers<[1], [0], [0], [1], [0, 0, 1, 1], [], []>} : vector<16x8xf32>, vector<8x4xf32>, vector<16x4xf32> -> vector<16x4xf32>
    %cst_344 = arith.constant dense<0.000000e+00> : vector<16x4xf32>
    %494 = tpu.matmul %492, %475, %cst_344 {dimension_numbers = #tpu.dot_dimension_numbers<[1], [0], [0], [1], [0, 0, 1, 1], [], []>} : vector<16x8xf32>, vector<8x4xf32>, vector<16x4xf32> -> vector<16x4xf32>
    %495 = arith.maximumf %493, %494 : vector<16x4xf32>
    %c0_345 = arith.constant 0 : index
    %c13 = arith.constant 13 : index
    %496 = vector.load %arg30[%c0_345, %c13] : memref<16x26xf32, #tpu.memory_space<vmem>>, vector<16x4xf32>
    tpu.vector_store %arg30[%c0_345, %c13], %495 {strides = array<i32>} : memref<16x26xf32, #tpu.memory_space<vmem>>, vector<16x4xf32>,
    %497 = vector.extract_strided_slice %461 {offsets = [0, 82], sizes = [16, 8], strides = [1, 1]} : vector<16x122xf32> to vector<16x8xf32>
    %498 = vector.extract_strided_slice %461 {offsets = [0, 92], sizes = [16, 8], strides = [1, 1]} : vector<16x122xf32> to vector<16x8xf32>
    %499 = arith.maximumf %497, %498 : vector<16x8xf32>
    %cst_346 = arith.constant dense<0.000000e+00> : vector<16x4xf32>
    %500 = tpu.matmul %499, %468, %cst_346 {dimension_numbers = #tpu.dot_dimension_numbers<[1], [0], [0], [1], [0, 0, 1, 1], [], []>} : vector<16x8xf32>, vector<8x4xf32>, vector<16x4xf32> -> vector<16x4xf32>
    %cst_347 = arith.constant dense<0.000000e+00> : vector<16x4xf32>
    %501 = tpu.matmul %499, %475, %cst_347 {dimension_numbers = #tpu.dot_dimension_numbers<[1], [0], [0], [1], [0, 0, 1, 1], [], []>} : vector<16x8xf32>, vector<8x4xf32>, vector<16x4xf32> -> vector<16x4xf32>
    %502 = arith.maximumf %500, %501 : vector<16x4xf32>
    %c0_348 = arith.constant 0 : index
    %c17 = arith.constant 17 : index
    %503 = vector.load %arg30[%c0_348, %c17] : memref<16x26xf32, #tpu.memory_space<vmem>>, vector<16x4xf32>
    tpu.vector_store %arg30[%c0_348, %c17], %502 {strides = array<i32>} : memref<16x26xf32, #tpu.memory_space<vmem>>, vector<16x4xf32>,
    %c0_349 = arith.constant 0 : index
    %c0_350 = arith.constant 0 : index
    %504 = vector.load %arg30[%c0_349, %c0_350] : memref<16x26xf32, #tpu.memory_space<vmem>>, vector<16x26xf32>
    %505 = arith.truncf %504 : vector<16x26xf32> to vector<16x26xbf16>
    %cst_351 = arith.constant 0.000000e+00 : f32
    %506 = vector.broadcast %cst_351 : f32 to vector<16x16xf32>
    %507 = vector.extract_strided_slice %505 {offsets = [0, 0], sizes = [16, 16], strides = [1, 1]} : vector<16x26xbf16> to vector<16x16xbf16>
    %c0_352 = arith.constant 0 : index
    %c0_353 = arith.constant 0 : index
    %c0_354 = arith.constant 0 : index
    %508 = vector.load %arg8[%c0_352, %c0_353, %c0_354] : memref<9x16x16xbf16, #tpu.memory_space<vmem>>, vector<1x16x16xbf16>
    %509 = vector.shape_cast %508 : vector<1x16x16xbf16> to vector<16x16xbf16>
    %cst_355 = arith.constant dense<0.000000e+00> : vector<16x16xf32>
    %510 = tpu.matmul %509, %507, %cst_355 {dimension_numbers = #tpu.dot_dimension_numbers<[1], [0], [0], [1], [0, 0, 1, 1], [], []>} : vector<16x16xbf16>, vector<16x16xbf16>, vector<16x16xf32> -> vector<16x16xf32>
    %511 = arith.addf %506, %510 : vector<16x16xf32>
    %512 = vector.extract_strided_slice %505 {offsets = [0, 1], sizes = [16, 16], strides = [1, 1]} : vector<16x26xbf16> to vector<16x16xbf16>
    %c1_356 = arith.constant 1 : index
    %c0_357 = arith.constant 0 : index
    %c0_358 = arith.constant 0 : index
    %513 = vector.load %arg8[%c1_356, %c0_357, %c0_358] : memref<9x16x16xbf16, #tpu.memory_space<vmem>>, vector<1x16x16xbf16>
    %514 = vector.shape_cast %513 : vector<1x16x16xbf16> to vector<16x16xbf16>
    %cst_359 = arith.constant dense<0.000000e+00> : vector<16x16xf32>
    %515 = tpu.matmul %514, %512, %cst_359 {dimension_numbers = #tpu.dot_dimension_numbers<[1], [0], [0], [1], [0, 0, 1, 1], [], []>} : vector<16x16xbf16>, vector<16x16xbf16>, vector<16x16xf32> -> vector<16x16xf32>
    %516 = arith.addf %511, %515 : vector<16x16xf32>
    %517 = vector.extract_strided_slice %505 {offsets = [0, 2], sizes = [16, 16], strides = [1, 1]} : vector<16x26xbf16> to vector<16x16xbf16>
    %c2_360 = arith.constant 2 : index
    %c0_361 = arith.constant 0 : index
    %c0_362 = arith.constant 0 : index
    %518 = vector.load %arg8[%c2_360, %c0_361, %c0_362] : memref<9x16x16xbf16, #tpu.memory_space<vmem>>, vector<1x16x16xbf16>
    %519 = vector.shape_cast %518 : vector<1x16x16xbf16> to vector<16x16xbf16>
    %cst_363 = arith.constant dense<0.000000e+00> : vector<16x16xf32>
    %520 = tpu.matmul %519, %517, %cst_363 {dimension_numbers = #tpu.dot_dimension_numbers<[1], [0], [0], [1], [0, 0, 1, 1], [], []>} : vector<16x16xbf16>, vector<16x16xbf16>, vector<16x16xf32> -> vector<16x16xf32>
    %521 = arith.addf %516, %520 : vector<16x16xf32>
    %522 = vector.extract_strided_slice %505 {offsets = [0, 4], sizes = [16, 16], strides = [1, 1]} : vector<16x26xbf16> to vector<16x16xbf16>
    %c3_364 = arith.constant 3 : index
    %c0_365 = arith.constant 0 : index
    %c0_366 = arith.constant 0 : index
    %523 = vector.load %arg8[%c3_364, %c0_365, %c0_366] : memref<9x16x16xbf16, #tpu.memory_space<vmem>>, vector<1x16x16xbf16>
    %524 = vector.shape_cast %523 : vector<1x16x16xbf16> to vector<16x16xbf16>
    %cst_367 = arith.constant dense<0.000000e+00> : vector<16x16xf32>
    %525 = tpu.matmul %524, %522, %cst_367 {dimension_numbers = #tpu.dot_dimension_numbers<[1], [0], [0], [1], [0, 0, 1, 1], [], []>} : vector<16x16xbf16>, vector<16x16xbf16>, vector<16x16xf32> -> vector<16x16xf32>
    %526 = arith.addf %521, %525 : vector<16x16xf32>
    %527 = vector.extract_strided_slice %505 {offsets = [0, 5], sizes = [16, 16], strides = [1, 1]} : vector<16x26xbf16> to vector<16x16xbf16>
    %c4_368 = arith.constant 4 : index
    %c0_369 = arith.constant 0 : index
    %c0_370 = arith.constant 0 : index
    %528 = vector.load %arg8[%c4_368, %c0_369, %c0_370] : memref<9x16x16xbf16, #tpu.memory_space<vmem>>, vector<1x16x16xbf16>
    %529 = vector.shape_cast %528 : vector<1x16x16xbf16> to vector<16x16xbf16>
    %cst_371 = arith.constant dense<0.000000e+00> : vector<16x16xf32>
    %530 = tpu.matmul %529, %527, %cst_371 {dimension_numbers = #tpu.dot_dimension_numbers<[1], [0], [0], [1], [0, 0, 1, 1], [], []>} : vector<16x16xbf16>, vector<16x16xbf16>, vector<16x16xf32> -> vector<16x16xf32>
    %531 = arith.addf %526, %530 : vector<16x16xf32>
    %532 = vector.extract_strided_slice %505 {offsets = [0, 6], sizes = [16, 16], strides = [1, 1]} : vector<16x26xbf16> to vector<16x16xbf16>
    %c5_372 = arith.constant 5 : index
    %c0_373 = arith.constant 0 : index
    %c0_374 = arith.constant 0 : index
    %533 = vector.load %arg8[%c5_372, %c0_373, %c0_374] : memref<9x16x16xbf16, #tpu.memory_space<vmem>>, vector<1x16x16xbf16>
    %534 = vector.shape_cast %533 : vector<1x16x16xbf16> to vector<16x16xbf16>
    %cst_375 = arith.constant dense<0.000000e+00> : vector<16x16xf32>
    %535 = tpu.matmul %534, %532, %cst_375 {dimension_numbers = #tpu.dot_dimension_numbers<[1], [0], [0], [1], [0, 0, 1, 1], [], []>} : vector<16x16xbf16>, vector<16x16xbf16>, vector<16x16xf32> -> vector<16x16xf32>
    %536 = arith.addf %531, %535 : vector<16x16xf32>
    %537 = vector.extract_strided_slice %505 {offsets = [0, 8], sizes = [16, 16], strides = [1, 1]} : vector<16x26xbf16> to vector<16x16xbf16>
    %c6_376 = arith.constant 6 : index
    %c0_377 = arith.constant 0 : index
    %c0_378 = arith.constant 0 : index
    %538 = vector.load %arg8[%c6_376, %c0_377, %c0_378] : memref<9x16x16xbf16, #tpu.memory_space<vmem>>, vector<1x16x16xbf16>
    %539 = vector.shape_cast %538 : vector<1x16x16xbf16> to vector<16x16xbf16>
    %cst_379 = arith.constant dense<0.000000e+00> : vector<16x16xf32>
    %540 = tpu.matmul %539, %537, %cst_379 {dimension_numbers = #tpu.dot_dimension_numbers<[1], [0], [0], [1], [0, 0, 1, 1], [], []>} : vector<16x16xbf16>, vector<16x16xbf16>, vector<16x16xf32> -> vector<16x16xf32>
    %541 = arith.addf %536, %540 : vector<16x16xf32>
    %542 = vector.extract_strided_slice %505 {offsets = [0, 9], sizes = [16, 16], strides = [1, 1]} : vector<16x26xbf16> to vector<16x16xbf16>
    %c7_380 = arith.constant 7 : index
    %c0_381 = arith.constant 0 : index
    %c0_382 = arith.constant 0 : index
    %543 = vector.load %arg8[%c7_380, %c0_381, %c0_382] : memref<9x16x16xbf16, #tpu.memory_space<vmem>>, vector<1x16x16xbf16>
    %544 = vector.shape_cast %543 : vector<1x16x16xbf16> to vector<16x16xbf16>
    %cst_383 = arith.constant dense<0.000000e+00> : vector<16x16xf32>
    %545 = tpu.matmul %544, %542, %cst_383 {dimension_numbers = #tpu.dot_dimension_numbers<[1], [0], [0], [1], [0, 0, 1, 1], [], []>} : vector<16x16xbf16>, vector<16x16xbf16>, vector<16x16xf32> -> vector<16x16xf32>
    %546 = arith.addf %541, %545 : vector<16x16xf32>
    %547 = vector.extract_strided_slice %505 {offsets = [0, 10], sizes = [16, 16], strides = [1, 1]} : vector<16x26xbf16> to vector<16x16xbf16>
    %c8_384 = arith.constant 8 : index
    %c0_385 = arith.constant 0 : index
    %c0_386 = arith.constant 0 : index
    %548 = vector.load %arg8[%c8_384, %c0_385, %c0_386] : memref<9x16x16xbf16, #tpu.memory_space<vmem>>, vector<1x16x16xbf16>
    %549 = vector.shape_cast %548 : vector<1x16x16xbf16> to vector<16x16xbf16>
    %cst_387 = arith.constant dense<0.000000e+00> : vector<16x16xf32>
    %550 = tpu.matmul %549, %547, %cst_387 {dimension_numbers = #tpu.dot_dimension_numbers<[1], [0], [0], [1], [0, 0, 1, 1], [], []>} : vector<16x16xbf16>, vector<16x16xbf16>, vector<16x16xf32> -> vector<16x16xf32>
    %551 = arith.addf %546, %550 : vector<16x16xf32>
    %c0_388 = arith.constant 0 : index
    %c0_389 = arith.constant 0 : index
    %c0_390 = arith.constant 0 : index
    %552 = vector.load %arg17[%c0_388, %c0_389, %c0_390] : memref<2x16x1xf32, #tpu.memory_space<vmem>>, vector<1x16x1xf32>
    %553 = vector.shape_cast %552 : vector<1x16x1xf32> to vector<16x1xf32>
    %554 = vector.broadcast %553 : vector<16x1xf32> to vector<16x16xf32>
    %555 = arith.mulf %551, %554 : vector<16x16xf32>
    %c1_391 = arith.constant 1 : index
    %c0_392 = arith.constant 0 : index
    %c0_393 = arith.constant 0 : index
    %556 = vector.load %arg17[%c1_391, %c0_392, %c0_393] : memref<2x16x1xf32, #tpu.memory_space<vmem>>, vector<1x16x1xf32>
    %557 = vector.shape_cast %556 : vector<1x16x1xf32> to vector<16x1xf32>
    %558 = vector.broadcast %557 : vector<16x1xf32> to vector<16x16xf32>
    %559 = arith.addf %555, %558 : vector<16x16xf32>
    %cst_394 = arith.constant 1.000000e-01 : f32
    %560 = vector.broadcast %cst_394 : f32 to vector<16x16xf32>
    %561 = arith.mulf %560, %559 : vector<16x16xf32>
    %562 = arith.maximumf %559, %561 : vector<16x16xf32>
    %563 = vector.broadcast %16 : vector<1x16xf32> to vector<16x16xf32>
    %564 = arith.mulf %562, %563 : vector<16x16xf32>
    %c0_395 = arith.constant 0 : index
    %c5_396 = arith.constant 5 : index
    %565 = vector.load %arg31[%c0_395, %c5_396] : memref<16x26xf32, #tpu.memory_space<vmem>>, vector<16x16xf32>
    tpu.vector_store %arg31[%c0_395, %c5_396], %564 {strides = array<i32>} : memref<16x26xf32, #tpu.memory_space<vmem>>, vector<16x16xf32>,
    %c0_397 = arith.constant 0 : index
    %c0_398 = arith.constant 0 : index
    %566 = vector.load %arg31[%c0_397, %c0_398] : memref<16x26xf32, #tpu.memory_space<vmem>>, vector<16x26xf32>
    %567 = arith.truncf %566 : vector<16x26xf32> to vector<16x26xbf16>
    %cst_399 = arith.constant 0.000000e+00 : f32
    %568 = vector.broadcast %cst_399 : f32 to vector<16x16xf32>
    %569 = vector.extract_strided_slice %567 {offsets = [0, 5], sizes = [16, 16], strides = [1, 1]} : vector<16x26xbf16> to vector<16x16xbf16>
    %c0_400 = arith.constant 0 : index
    %c0_401 = arith.constant 0 : index
    %c0_402 = arith.constant 0 : index
    %570 = vector.load %arg9[%c0_400, %c0_401, %c0_402] : memref<1x16x16xbf16, #tpu.memory_space<vmem>>, vector<1x16x16xbf16>
    %571 = vector.shape_cast %570 : vector<1x16x16xbf16> to vector<16x16xbf16>
    %cst_403 = arith.constant dense<0.000000e+00> : vector<16x16xf32>
    %572 = tpu.matmul %571, %569, %cst_403 {dimension_numbers = #tpu.dot_dimension_numbers<[1], [0], [0], [1], [0, 0, 1, 1], [], []>} : vector<16x16xbf16>, vector<16x16xbf16>, vector<16x16xf32> -> vector<16x16xf32>
    %573 = arith.addf %568, %572 : vector<16x16xf32>
    %c0_404 = arith.constant 0 : index
    %c0_405 = arith.constant 0 : index
    %c0_406 = arith.constant 0 : index
    %574 = vector.load %arg18[%c0_404, %c0_405, %c0_406] : memref<2x16x1xf32, #tpu.memory_space<vmem>>, vector<1x16x1xf32>
    %575 = vector.shape_cast %574 : vector<1x16x1xf32> to vector<16x1xf32>
    %576 = vector.broadcast %575 : vector<16x1xf32> to vector<16x16xf32>
    %577 = arith.mulf %573, %576 : vector<16x16xf32>
    %c1_407 = arith.constant 1 : index
    %c0_408 = arith.constant 0 : index
    %c0_409 = arith.constant 0 : index
    %578 = vector.load %arg18[%c1_407, %c0_408, %c0_409] : memref<2x16x1xf32, #tpu.memory_space<vmem>>, vector<1x16x1xf32>
    %579 = vector.shape_cast %578 : vector<1x16x1xf32> to vector<16x1xf32>
    %580 = vector.broadcast %579 : vector<16x1xf32> to vector<16x16xf32>
    %581 = arith.addf %577, %580 : vector<16x16xf32>
    %cst_410 = arith.constant 1.000000e-01 : f32
    %582 = vector.broadcast %cst_410 : f32 to vector<16x16xf32>
    %583 = arith.mulf %582, %581 : vector<16x16xf32>
    %584 = arith.maximumf %581, %583 : vector<16x16xf32>
    %585 = vector.extract_strided_slice %584 {offsets = [0, 0], sizes = [16, 4], strides = [1, 1]} : vector<16x16xf32> to vector<16x4xf32>
    %c0_411 = arith.constant 0 : index
    %c7_412 = arith.constant 7 : index
    %586 = vector.load %arg32[%c0_411, %c7_412] : memref<16x36xf32, #tpu.memory_space<vmem>>, vector<16x4xf32>
    tpu.vector_store %arg32[%c0_411, %c7_412], %585 {strides = array<i32>} : memref<16x36xf32, #tpu.memory_space<vmem>>, vector<16x4xf32>,
    %587 = vector.extract_strided_slice %584 {offsets = [0, 4], sizes = [16, 4], strides = [1, 1]} : vector<16x16xf32> to vector<16x4xf32>
    %c0_413 = arith.constant 0 : index
    %c13_414 = arith.constant 13 : index
    %588 = vector.load %arg32[%c0_413, %c13_414] : memref<16x36xf32, #tpu.memory_space<vmem>>, vector<16x4xf32>
    tpu.vector_store %arg32[%c0_413, %c13_414], %587 {strides = array<i32>} : memref<16x36xf32, #tpu.memory_space<vmem>>, vector<16x4xf32>,
    %589 = vector.extract_strided_slice %584 {offsets = [0, 8], sizes = [16, 4], strides = [1, 1]} : vector<16x16xf32> to vector<16x4xf32>
    %c0_415 = arith.constant 0 : index
    %c19_416 = arith.constant 19 : index
    %590 = vector.load %arg32[%c0_415, %c19_416] : memref<16x36xf32, #tpu.memory_space<vmem>>, vector<16x4xf32>
    tpu.vector_store %arg32[%c0_415, %c19_416], %589 {strides = array<i32>} : memref<16x36xf32, #tpu.memory_space<vmem>>, vector<16x4xf32>,
    %591 = vector.extract_strided_slice %584 {offsets = [0, 12], sizes = [16, 4], strides = [1, 1]} : vector<16x16xf32> to vector<16x4xf32>
    %c0_417 = arith.constant 0 : index
    %c25 = arith.constant 25 : index
    %592 = vector.load %arg32[%c0_417, %c25] : memref<16x36xf32, #tpu.memory_space<vmem>>, vector<16x4xf32>
    tpu.vector_store %arg32[%c0_417, %c25], %591 {strides = array<i32>} : memref<16x36xf32, #tpu.memory_space<vmem>>, vector<16x4xf32>,
    %c0_418 = arith.constant 0 : index
    %c0_419 = arith.constant 0 : index
    %593 = vector.load %arg32[%c0_418, %c0_419] : memref<16x36xf32, #tpu.memory_space<vmem>>, vector<16x36xf32>
    %594 = arith.truncf %593 : vector<16x36xf32> to vector<16x36xbf16>
    %cst_420 = arith.constant 0.000000e+00 : f32
    %595 = vector.broadcast %cst_420 : f32 to vector<128x36xf32>
    %c0_421 = arith.constant 0 : index
    %c0_422 = arith.constant 0 : index
    %c0_423 = arith.constant 0 : index
    %596 = vector.load %arg10[%c0_421, %c0_422, %c0_423] : memref<1x128x16xbf16, #tpu.memory_space<vmem>>, vector<1x128x16xbf16>
    %597 = vector.shape_cast %596 : vector<1x128x16xbf16> to vector<128x16xbf16>
    %cst_424 = arith.constant dense<0.000000e+00> : vector<128x36xf32>
    %598 = tpu.matmul %597, %594, %cst_424 {dimension_numbers = #tpu.dot_dimension_numbers<[1], [0], [0], [1], [0, 0, 1, 1], [], []>} : vector<128x16xbf16>, vector<16x36xbf16>, vector<128x36xf32> -> vector<128x36xf32>
    %599 = arith.addf %595, %598 : vector<128x36xf32>
    %c0_425 = arith.constant 0 : index
    %c0_426 = arith.constant 0 : index
    %c0_427 = arith.constant 0 : index
    %600 = vector.load %arg19[%c0_425, %c0_426, %c0_427] : memref<2x128x1xf32, #tpu.memory_space<vmem>>, vector<1x128x1xf32>
    %601 = vector.shape_cast %600 : vector<1x128x1xf32> to vector<128x1xf32>
    %602 = vector.broadcast %601 : vector<128x1xf32> to vector<128x36xf32>
    %603 = arith.mulf %599, %602 : vector<128x36xf32>
    %c1_428 = arith.constant 1 : index
    %c0_429 = arith.constant 0 : index
    %c0_430 = arith.constant 0 : index
    %604 = vector.load %arg19[%c1_428, %c0_429, %c0_430] : memref<2x128x1xf32, #tpu.memory_space<vmem>>, vector<1x128x1xf32>
    %605 = vector.shape_cast %604 : vector<1x128x1xf32> to vector<128x1xf32>
    %606 = vector.broadcast %605 : vector<128x1xf32> to vector<128x36xf32>
    %607 = arith.addf %603, %606 : vector<128x36xf32>
    %cst_431 = arith.constant 1.000000e-01 : f32
    %608 = vector.broadcast %cst_431 : f32 to vector<128x36xf32>
    %609 = arith.mulf %608, %607 : vector<128x36xf32>
    %610 = arith.maximumf %607, %609 : vector<128x36xf32>
    %cst_432 = arith.constant dense<0.000000e+00> : vector<128xf32>
    %611 = vector.multi_reduction <add>, %610, %cst_432 [1] : vector<128x36xf32> to vector<128xf32>
    %612 = vector.shape_cast %611 : vector<128xf32> to vector<128x1xf32>
    %cst_433 = arith.constant 0.027777778 : f32
    %613 = vector.broadcast %cst_433 : f32 to vector<128x1xf32>
    %614 = arith.mulf %612, %613 : vector<128x1xf32>
    %c0_434 = arith.constant 0 : index
    %c0_435 = arith.constant 0 : index
    %615 = vector.load %arg23[%c0_434, %c0_435] : memref<128x10xf32, #tpu.memory_space<vmem>>, vector<128x10xf32>
    %616 = vector.broadcast %614 : vector<128x1xf32> to vector<128x10xf32>
    %617 = arith.mulf %616, %615 : vector<128x10xf32>
    %cst_436 = arith.constant dense<0.000000e+00> : vector<10xf32>
    %618 = vector.multi_reduction <add>, %617, %cst_436 [0] : vector<128x10xf32> to vector<10xf32>
    %619 = vector.shape_cast %618 : vector<10xf32> to vector<1x10xf32>
    %c0_437 = arith.constant 0 : index
    %c0_438 = arith.constant 0 : index
    %620 = vector.load %arg24[%c0_437, %c0_438] : memref<1x10xf32, #tpu.memory_space<vmem>>, vector<1x10xf32>
    %621 = arith.addf %619, %620 : vector<1x10xf32>
    %c0_439 = arith.constant 0 : index
    %c0_440 = arith.constant 0 : index
    %c0_441 = arith.constant 0 : index
    %622 = vector.load %arg25[%c0_439, %c0_440, %c0_441] : memref<1x1x10xf32, #tpu.memory_space<vmem>>, vector<1x1x10xf32>
    %623 = vector.shape_cast %622 : vector<1x1x10xf32> to vector<1x10xf32>
    %624 = vector.shape_cast %621 : vector<1x10xf32> to vector<1x1x10xf32>
    tpu.vector_store %arg25[%c0_439, %c0_440, %c0_441], %624 {strides = array<i32>} : memref<1x1x10xf32, #tpu.memory_space<vmem>>, vector<1x1x10xf32>,
    return
  }
  func.func @transform_0(%arg0: i32) -> (i32, i32, i32) {
    %c0_i32 = arith.constant 0 : i32
    %c0_i32_0 = arith.constant 0 : i32
    %c0_i32_1 = arith.constant 0 : i32
    return %arg0, %c0_i32, %c0_i32_0 : i32, i32, i32
  }
  func.func @transform_1(%arg0: i32) -> (i32, i32, i32) {
    %c0_i32 = arith.constant 0 : i32
    %c0_i32_0 = arith.constant 0 : i32
    %c0_i32_1 = arith.constant 0 : i32
    %c0_i32_2 = arith.constant 0 : i32
    return %c0_i32, %c0_i32_0, %c0_i32_1 : i32, i32, i32
  }
  func.func @transform_2(%arg0: i32) -> (i32, i32, i32) {
    %c0_i32 = arith.constant 0 : i32
    %c0_i32_0 = arith.constant 0 : i32
    %c0_i32_1 = arith.constant 0 : i32
    %c0_i32_2 = arith.constant 0 : i32
    return %c0_i32, %c0_i32_0, %c0_i32_1 : i32, i32, i32
  }
  func.func @transform_3(%arg0: i32) -> (i32, i32, i32) {
    %c0_i32 = arith.constant 0 : i32
    %c0_i32_0 = arith.constant 0 : i32
    %c0_i32_1 = arith.constant 0 : i32
    %c0_i32_2 = arith.constant 0 : i32
    return %c0_i32, %c0_i32_0, %c0_i32_1 : i32, i32, i32
  }
  func.func @transform_4(%arg0: i32) -> (i32, i32, i32) {
    %c0_i32 = arith.constant 0 : i32
    %c0_i32_0 = arith.constant 0 : i32
    %c0_i32_1 = arith.constant 0 : i32
    %c0_i32_2 = arith.constant 0 : i32
    return %c0_i32, %c0_i32_0, %c0_i32_1 : i32, i32, i32
  }
  func.func @transform_5(%arg0: i32) -> (i32, i32, i32) {
    %c0_i32 = arith.constant 0 : i32
    %c0_i32_0 = arith.constant 0 : i32
    %c0_i32_1 = arith.constant 0 : i32
    %c0_i32_2 = arith.constant 0 : i32
    return %c0_i32, %c0_i32_0, %c0_i32_1 : i32, i32, i32
  }
  func.func @transform_6(%arg0: i32) -> (i32, i32, i32) {
    %c0_i32 = arith.constant 0 : i32
    %c0_i32_0 = arith.constant 0 : i32
    %c0_i32_1 = arith.constant 0 : i32
    %c0_i32_2 = arith.constant 0 : i32
    return %c0_i32, %c0_i32_0, %c0_i32_1 : i32, i32, i32
  }
  func.func @transform_7(%arg0: i32) -> (i32, i32, i32) {
    %c0_i32 = arith.constant 0 : i32
    %c0_i32_0 = arith.constant 0 : i32
    %c0_i32_1 = arith.constant 0 : i32
    %c0_i32_2 = arith.constant 0 : i32
    return %c0_i32, %c0_i32_0, %c0_i32_1 : i32, i32, i32
  }
  func.func @transform_8(%arg0: i32) -> (i32, i32, i32) {
    %c0_i32 = arith.constant 0 : i32
    %c0_i32_0 = arith.constant 0 : i32
    %c0_i32_1 = arith.constant 0 : i32
    %c0_i32_2 = arith.constant 0 : i32
    return %c0_i32, %c0_i32_0, %c0_i32_1 : i32, i32, i32
  }
  func.func @transform_9(%arg0: i32) -> (i32, i32, i32) {
    %c0_i32 = arith.constant 0 : i32
    %c0_i32_0 = arith.constant 0 : i32
    %c0_i32_1 = arith.constant 0 : i32
    %c0_i32_2 = arith.constant 0 : i32
    return %c0_i32, %c0_i32_0, %c0_i32_1 : i32, i32, i32
  }
  func.func @transform_10(%arg0: i32) -> (i32, i32, i32) {
    %c0_i32 = arith.constant 0 : i32
    %c0_i32_0 = arith.constant 0 : i32
    %c0_i32_1 = arith.constant 0 : i32
    %c0_i32_2 = arith.constant 0 : i32
    return %c0_i32, %c0_i32_0, %c0_i32_1 : i32, i32, i32
  }
  func.func @transform_11(%arg0: i32) -> (i32, i32, i32) {
    %c0_i32 = arith.constant 0 : i32
    %c0_i32_0 = arith.constant 0 : i32
    %c0_i32_1 = arith.constant 0 : i32
    %c0_i32_2 = arith.constant 0 : i32
    return %c0_i32, %c0_i32_0, %c0_i32_1 : i32, i32, i32
  }
  func.func @transform_12(%arg0: i32) -> (i32, i32, i32) {
    %c0_i32 = arith.constant 0 : i32
    %c0_i32_0 = arith.constant 0 : i32
    %c0_i32_1 = arith.constant 0 : i32
    %c0_i32_2 = arith.constant 0 : i32
    return %c0_i32, %c0_i32_0, %c0_i32_1 : i32, i32, i32
  }
  func.func @transform_13(%arg0: i32) -> (i32, i32, i32) {
    %c0_i32 = arith.constant 0 : i32
    %c0_i32_0 = arith.constant 0 : i32
    %c0_i32_1 = arith.constant 0 : i32
    %c0_i32_2 = arith.constant 0 : i32
    return %c0_i32, %c0_i32_0, %c0_i32_1 : i32, i32, i32
  }
  func.func @transform_14(%arg0: i32) -> (i32, i32, i32) {
    %c0_i32 = arith.constant 0 : i32
    %c0_i32_0 = arith.constant 0 : i32
    %c0_i32_1 = arith.constant 0 : i32
    %c0_i32_2 = arith.constant 0 : i32
    return %c0_i32, %c0_i32_0, %c0_i32_1 : i32, i32, i32
  }
  func.func @transform_15(%arg0: i32) -> (i32, i32, i32) {
    %c0_i32 = arith.constant 0 : i32
    %c0_i32_0 = arith.constant 0 : i32
    %c0_i32_1 = arith.constant 0 : i32
    %c0_i32_2 = arith.constant 0 : i32
    return %c0_i32, %c0_i32_0, %c0_i32_1 : i32, i32, i32
  }
  func.func @transform_16(%arg0: i32) -> (i32, i32, i32) {
    %c0_i32 = arith.constant 0 : i32
    %c0_i32_0 = arith.constant 0 : i32
    %c0_i32_1 = arith.constant 0 : i32
    %c0_i32_2 = arith.constant 0 : i32
    return %c0_i32, %c0_i32_0, %c0_i32_1 : i32, i32, i32
  }
  func.func @transform_17(%arg0: i32) -> (i32, i32, i32) {
    %c0_i32 = arith.constant 0 : i32
    %c0_i32_0 = arith.constant 0 : i32
    %c0_i32_1 = arith.constant 0 : i32
    %c0_i32_2 = arith.constant 0 : i32
    return %c0_i32, %c0_i32_0, %c0_i32_1 : i32, i32, i32
  }
  func.func @transform_18(%arg0: i32) -> (i32, i32, i32) {
    %c0_i32 = arith.constant 0 : i32
    %c0_i32_0 = arith.constant 0 : i32
    %c0_i32_1 = arith.constant 0 : i32
    %c0_i32_2 = arith.constant 0 : i32
    return %c0_i32, %c0_i32_0, %c0_i32_1 : i32, i32, i32
  }
  func.func @transform_19(%arg0: i32) -> (i32, i32) {
    %c0_i32 = arith.constant 0 : i32
    %c0_i32_0 = arith.constant 0 : i32
    %c0_i32_1 = arith.constant 0 : i32
    return %c0_i32, %c0_i32_0 : i32, i32
  }
  func.func @transform_20(%arg0: i32) -> (i32, i32) {
    %c0_i32 = arith.constant 0 : i32
    %c0_i32_0 = arith.constant 0 : i32
    %c0_i32_1 = arith.constant 0 : i32
    return %c0_i32, %c0_i32_0 : i32, i32
  }
  func.func @transform_21(%arg0: i32) -> (i32, i32) {
    %c0_i32 = arith.constant 0 : i32
    %c0_i32_0 = arith.constant 0 : i32
    %c0_i32_1 = arith.constant 0 : i32
    return %c0_i32, %c0_i32_0 : i32, i32
  }
  func.func @transform_22(%arg0: i32) -> (i32, i32) {
    %c0_i32 = arith.constant 0 : i32
    %c0_i32_0 = arith.constant 0 : i32
    %c0_i32_1 = arith.constant 0 : i32
    return %c0_i32, %c0_i32_0 : i32, i32
  }
  func.func @transform_23(%arg0: i32) -> (i32, i32) {
    %c0_i32 = arith.constant 0 : i32
    %c0_i32_0 = arith.constant 0 : i32
    %c0_i32_1 = arith.constant 0 : i32
    return %c0_i32, %c0_i32_0 : i32, i32
  }
  func.func @transform_24(%arg0: i32) -> (i32, i32, i32) {
    %c0_i32 = arith.constant 0 : i32
    %c0_i32_0 = arith.constant 0 : i32
    %c0_i32_1 = arith.constant 0 : i32
    return %arg0, %c0_i32, %c0_i32_0 : i32, i32, i32
  }
}

</mosaic_0001>

<bundles_post_ra>
// kernel: cnn9_forward.1
= control target key start
LH: loop header
LB: loop body
LE: loop exit
PB: predicated region body
PF: predicated region fallthrough
CT: control target
= control target key end

     0   :  { %s11757_s0 = inlined_call_operand.vmem [shape: f32[2,3,362], index: 0, kind: input, shape index: {}]   ;;  %s11758_s1 = inlined_call_operand.vmem [shape: bf16[9,8,3], index: 1, kind: input, shape index: {}]   ;;  %s11759_s2 = inlined_call_operand.vmem [shape: bf16[9,8,8], index: 2, kind: input, shape index: {}]   ;;  %s11760_s3 = inlined_call_operand.vmem [shape: bf16[9,8,8], index: 3, kind: input, shape index: {}]   ;;  %s11761_s4 = inlined_call_operand.vmem [shape: bf16[9,16,16], index: 4, kind: input, shape index: {}]   ;;  %s11762_s5 = inlined_call_operand.vmem [shape: bf16[9,16,16], index: 5, kind: input, shape index: {}]   ;;  %s11763_s6 = inlined_call_operand.vmem [shape: bf16[9,16,16], index: 6, kind: input, shape index: {}]   ;;  %s11764_s7 = inlined_call_operand.vmem [shape: bf16[9,16,16], index: 7, kind: input, shape index: {}]   ;;  %s11765_s8 = inlined_call_operand.vmem [shape: bf16[1,16,16], index: 8, kind: input, shape index: {}]   ;;  %s11766_s9 = inlined_call_operand.vmem [shape: bf16[1,128,16], index: 9, kind: input, shape index: {}]   ;;  %s11767_s10 = inlined_call_operand.vmem [shape: f32[2,8,1], index: 10, kind: input, shape index: {}]   ;;  %s11768_s11 = inlined_call_operand.vmem [shape: f32[2,8,1], index: 11, kind: input, shape index: {}]   ;;  %s11769_s12 = inlined_call_operand.vmem [shape: f32[2,8,1], index: 12, kind: input, shape index: {}]   ;;  %s11770_s13 = inlined_call_operand.vmem [shape: f32[2,16,1], index: 13, kind: input, shape index: {}]   ;;  %s11771_s14 = inlined_call_operand.vmem [shape: f32[2,16,1], index: 14, kind: input, shape index: {}]   ;;  %s11772_s15 = inlined_call_operand.vmem [shape: f32[2,16,1], index: 15, kind: input, shape index: {}]   ;;  %s11773_s16 = inlined_call_operand.vmem [shape: f32[2,16,1], index: 16, kind: input, shape index: {}]   ;;  %s11774_s17 = inlined_call_operand.vmem [shape: f32[2,16,1], index: 17, kind: input, shape index: {}]   ;;  %s11775_s18 = inlined_call_operand.vmem [shape: f32[2,128,1], index: 18, kind: input, shape index: {}]   ;;  %s11776_s19 = inlined_call_operand.vmem [shape: f32[1,324], index: 19, kind: input, shape index: {}]   ;;  %s11777_s20 = inlined_call_operand.vmem [shape: f32[1,100], index: 20, kind: input, shape index: {}]   ;;  %s11778_s21 = inlined_call_operand.vmem [shape: f32[1,16], index: 21, kind: input, shape index: {}]   ;;  %s11779_s22 = inlined_call_operand.vmem [shape: f32[128,10], index: 22, kind: input, shape index: {}]   ;;  %s11780_s23 = inlined_call_operand.vmem [shape: f32[1,10], index: 23, kind: input, shape index: {}]   ;;  %s11781_s24 = inlined_call_operand.hbm [shape: f32[2,1,10], index: 24, kind: output, shape index: {}]  }
   0x1   :  { %11828 = sst [smem:[#allocation17_spill]] %s11757_s0 }
   0x2   :  { %11829 = sst [smem:[#allocation18_spill]] %s11758_s1 }
   0x3   :  { %11830 = sst [smem:[#allocation19_spill]] %s11759_s2 }
   0x4   :  { %11831 = sst [smem:[#allocation20_spill]] %s11760_s3 }
   0x5   :  { %11832 = sst [smem:[#allocation21_spill]] %s11761_s4 }
   0x6   :  { %11833 = sst [smem:[#allocation22_spill]] %s11762_s5 }
   0x7   :  { %11834 = sst [smem:[#allocation23_spill]] %s11763_s6 }
   0x8   :  { %11835 = sst [smem:[#allocation24_spill]] %s11764_s7 }
   0x9   :  { %11836 = sst [smem:[#allocation25_spill]] %s11765_s8 }
   0xa   :  { %11837 = sst [smem:[#allocation26_spill]] %s11767_s10 }
   0xb   :  { %11838 = sst [smem:[#allocation27_spill]] %s11768_s11 }
   0xc   :  { %11839 = sst [smem:[#allocation28_spill]] %s11769_s12 }
   0xd   :  { %11840 = sst [smem:[#allocation29_spill]] %s11770_s13 }
   0xe   :  { %11841 = sst [smem:[#allocation30_spill]] %s11776_s19 }
   0xf   :  { %11842 = sst [smem:[#allocation31_spill]] %s11777_s20 }
  0x10   :  { %29 = vsyncpa [#allocation10], 0 }
  0x11   :  { %31 = vsyncpa [#allocation10 + $0x1], 0  ;;  %s10229_s5 = smov 0   ;;  %s10231_s26 = smov 0  }
  0x12   :  { %s10233_s27 = smov 0   ;;  %s10235_s28 = smov 0  }
  0x13 LB: > { %11843 = sst [smem:[#allocation12_spill]] %s10043_s5  ;;  %s10250_s6 = sadd.s32 4294967295, %s10055_s28   ;;  %s10055_s28 = sphi %s10235_s28, %s11891_s28   ;;  %s10051_s27 = sphi %s10233_s27, %s11893_s27   ;;  %s10047_s26 = sphi %s10231_s26, %s11895_s26   ;;  %s10043_s5 = sphi %s10229_s5, %s11894_s5  }
  0x14   : > { %11844 = sst [smem:[#allocation13_spill]] %s10051_s27  ;;  %s8730_s2 = sadd.s32 4294967294, %s10055_s28  }
  0x15   : > { %s10254_s29 = sadd.s32 1, %s10055_s28   ;;  %s553_s0 = sadd.s32 1, %s10051_s27 }
  0x16   : > { %11845 = sst [smem:[#allocation14_spill]] %s10254_s29  ;;  %s550_s7 = ssub.s32 %s10055_s28, %s10254_s29 }
  0x17   : > { %p563_p0 = scmp.ne.s32.totalorder %s10051_s27, %s10047_s26  ;;  %p551_p1 = scmp.eq.s32.totalorder %s550_s7, 0 }
  0x18   : > { %p564_p2 = scmp.eq.s32.totalorder %s10250_s6, 1  ;;  %p569_p3 = scmp.ne.s32.totalorder %s10047_s26, %s10043_s5 }
  0x19   : > { %p570_p4 = scmp.eq.s32.totalorder %s8730_s2, 1  ;;  %p8733_p7 = scmp.ge.s32.totalorder %s10055_s28, 1 }
  0x1a   : > { %s10265_s30 = scalar_select %p551_p1, %s10051_s27, %s553_s0  }
  0x1b   : > { %p10267_p5 = por %p564_p2, %p563_p0  ;;  %p10271_p6 = por %p570_p4, %p569_p3 }
  0x1c   : > { %11846 = sst [smem:[#allocation15_spill]] %s10265_s30  ;;  %p665_p8 = scmp.lt.s32.totalorder %s10055_s28, 3 }
  0x1d   : > { %s11848_s25 = scalar_select %p10271_p6, 1, 0 }
  0x1e   : > { %p666_p9 = pnand %p8733_p7, %p665_p8 }
  0x1f   : > { %11849 = sst [smem:[#allocation16_spill]] %s11848_s25  ;;  %p730_p10 = scmp.lt.s32.totalorder (!%p666_p9), %s10250_s6, 1 }
  0x20   : > { %669 = sbr.rel (%p666_p9) target bundleno = 5574 (0x15c6), region = 116  ;;  %s11850_s0 = sld [smem:[#allocation17_spill]] (!%p666_p9) }
  0x21   : > { %s11803_s30 = smov (!%p666_p9), 127   ;;  %s11789_s1 = smov (!%p666_p9), 109  }
  0x22   : > { %s11793_s2 = smov (!%p666_p9), 108   ;;  %s11851_s10 = sld [smem:[#allocation26_spill]] (!%p666_p9) }
  0x23   : > { %s11853_s19 = sld [smem:[#allocation30_spill]] (!%p666_p9)  ;;  %s11879_s25 = smov (!%p666_p9), 117  }
  0x24   : > { %s11860_s11 = sld [smem:[#allocation27_spill]] (!%p666_p9)  ;;  %s10097_s5 = smov (!%p666_p9), 123  }
  0x25   : > { %s731_s8 = scalar_select %p730_p10, %s10250_s6, 1  ;;  %v10057_v0 = vmov 0.0   ;;  %vm10058_vm0 = vmmov 0   ;;  %v10060_v6 = vmov 0   ;;  %vm786_vm1 = vcmask 1040384  }
  0x26   : > { %9304 = vmatprep.subr.bf16.mxu1 %v10057_v0  ;;  %736 = vst [vmem:[#allocation2] sm:$0xff] %v10057_v0  ;;  %740 = vst [vmem:[#allocation3] sm:$0xff] %v10057_v0  ;;  %9306 = vmatprep.mubr.msk.bf16.mxu1 %vm10058_vm0, %v10057_v0  ;;  %vm787_vm2 = vcmask 1041408   ;;  %v10068_v12 = vmov 65535   ;;  %vm779_vm3 = vcmask 1039360   ;;  %vm981_vm4 = vcmask 1031168  }
  0x27   : > { %s9860_s4 = smul.u32 12, %s731_s8  ;;  %831 = vmatprep.mubr.bf16.mxu0 %v10060_v6  ;;  %9946 = vset.pattern.permute.xlu0 %v10060_v6  ;;  %s11797_s8 = smov 126   ;;  %v788_v13 = vsel %vm786_vm1, 4294967295, %v10068_v12  ;;  %vm782_vm5 = vcmask 23552   ;;  %vm1088_vm6 = vcmask 900096   ;;  %vm1195_vm7 = vcmask 891904  }
  0x28   : > { %9947 = vset.pattern.permute.xlu1 %v10060_v6  ;;  %v1722_v8 = vld [vmem:[%s11851_s10] sm:$0xff]  ;;  %v8761_v9 = vld [vmem:[%s11851_s10 + $0x8] sm:$0xff]  ;;  %v10350_v16 = vsel %vm787_vm2, %v788_v13, 0  ;;  %vm1302_vm8 = vcmask 883712   ;;  %vm1409_vm9 = vcmask 752640   ;;  %vm1516_vm10 = vcmask 744448  }
  0x29   : > { %s734_s7 = scalar_lea.vmem %s11850_s0, %s9860_s4  ;;  %s11795_s4 = smov 110   ;;  %vm1623_vm11 = vcmask 736256   ;;  %vm738_vm12 = vcmask 867328   ;;  %vm1781_vm13 = vcmask 1047704   ;;  %vm1775_vm14 = vcmask 154624  }
  0x2a   : > { %v759_v1 = vld [vmem:[%s734_s7] sm:$0x77]  ;;  %v760_v4 = vld [vmem:[%s734_s7 + $0x8] sm:$0x7]  ;;  %s11791_s0 = smov 92   ;;  %s10066_s7 = smov 91  }
  0x2b   : > { %v10287_v2 = vpack.c.bf16 %v759_v1, %v759_v1  ;;  %v762_v3 = vcombine.high %v759_v1, %v759_v1  ;;  %v10298_v7 = vpack.c.bf16 %v760_v4, %v760_v4  ;;  %739 = vst.msk [vmem:[#allocation2 + $0x10] sm:$0xff] %vm738_vm12, %v10057_v0  ;;  %742 = vst.msk [vmem:[#allocation3 + $0x10] sm:$0xff] %vm738_vm12, %v10057_v0  ;;  %vm1784_vm15 = vcmask 711680   ;;  %s11861_s27 = sld [smem:[#allocation19_spill]]  ;;  %s10073_s10 = smov 38  }
  0x2c   : > { %vm1810_vm1 = vcmask 1043456   ;;  %vm1806_vm2 = vcmask 64512   ;;  %s11865_s12 = sld [smem:[#allocation28_spill]]  ;;  %vm4260_vm12 = vcmask 408912  }
  0x2d   : > { %773 = vrot.lane.b32.xlu1 %v10287_v2, %s11803_s30  ;;  %v10291_v5 = vpack.c.bf16 %v762_v3, %v762_v3  ;;  %v890_v24 = vand.u32 %v10350_v16, %v10298_v7  ;;  %v884_v28 = vand.u32 %v10350_v16, %v10287_v2  ;;  %s11876_s13 = sld [smem:[#allocation29_spill]] }
  0x2e   : > { %s11877_s20 = sld [smem:[#allocation31_spill]] }
  0x2f   : > { %775 = vrot.lane.b32.xlu0 %v10291_v5, %s11803_s30  ;;  %v887_v21 = vand.u32 %v10350_v16, %v10291_v5 }
  0x31   : > { %977 = vrot.lane.b32.xlu1 %v10291_v5, %s11797_s8  ;;  %s11862_s29 = smov %s11861_s27 }
  0x33   : > { %777 = vrot.lane.b32.xlu0 %v10298_v7, %s11803_s30 }
  0x35   : > { %975 = vrot.lane.b32.xlu1 %v10287_v2, %s11797_s8 }
  0x37   : > { %979 = vrot.lane.b32.xlu0 %v10298_v7, %s11797_s8  ;;  %s11801_s8 = smov 19  }
  0x39   : > { %1086 = vrot.lane.b32.xlu1 %v10298_v7, %s11795_s4 }
  0x3b   : > { %1084 = vrot.lane.b32.xlu0 %v10291_v5, %s11795_s4 }
  0x3d   : > { %1191 = vrot.lane.b32.xlu1 %v10291_v5, %s11789_s1 }
  0x3f   : > { %1082 = vrot.lane.b32.xlu0 %v10287_v2, %s11795_s4  ;;  %s11854_s4 = smov 126  }
  0x41   : > { %1189 = vrot.lane.b32.xlu1 %v10287_v2, %s11789_s1 }
  0x43   : > { %1193 = vrot.lane.b32.xlu0 %v10298_v7, %s11789_s1  ;;  %s11799_s1 = smov 90  }
  0x45   : > { %1300 = vrot.lane.b32.xlu1 %v10298_v7, %s11793_s2 }
  0x47   : > { %1298 = vrot.lane.b32.xlu0 %v10291_v5, %s11793_s2 }
  0x49   : > { %1405 = vrot.lane.b32.xlu1 %v10291_v5, %s11791_s0 }
  0x4b   : > { %1296 = vrot.lane.b32.xlu0 %v10287_v2, %s11793_s2  ;;  %s11852_s2 = sld [smem:[#allocation18_spill]] }
  0x4d   : > { %1403 = vrot.lane.b32.xlu1 %v10287_v2, %s11791_s0 }
  0x4f   : > { %1407 = vrot.lane.b32.xlu0 %v10298_v7, %s11791_s0  ;;  %s11856_s0 = smov 109  }
  0x51   : > { %1514 = vrot.lane.b32.xlu1 %v10298_v7, %s10066_s7  ;;  %v8735_v23 = vld [vmem:[%s11852_s2 + $0x4] sm:$0xf]  ;;  %v767_v34 = vld [vmem:[%s11852_s2] sm:$0xf]  ;;  %v8740_v43 = vld [vmem:[%s11852_s2 + $0x8] sm:$0xf] }
  0x52   : > { %v8743_v52 = vld [vmem:[%s11852_s2 + $0xc] sm:$0xf]  ;;  %v8746_v61 = vld [vmem:[%s11852_s2 + $0x10] sm:$0xf] }
  0x53   : > { %1512 = vrot.lane.b32.xlu0 %v10291_v5, %s10066_s7 }
  0x55   : > { %1619 = vrot.lane.b32.xlu1 %v10291_v5, %s11799_s1 }
  0x57   : > { %1510 = vrot.lane.b32.xlu0 %v10287_v2, %s10066_s7 }
  0x59   : > { %1617 = vrot.lane.b32.xlu1 %v10287_v2, %s11799_s1 }
  0x5b   : > { %1621 = vrot.lane.b32.xlu0 %v10298_v7, %s11799_s1  ;;  %s11855_s1 = smov 110  }
  0x5d   : > { %1735 = vperm.xlu1 %9947, %v8761_v9  }
  0x5f   : > { %1725 = vperm.xlu0 %9946, %v1722_v8   ;;  %v8749_v8 = vld [vmem:[%s11852_s2 + $0x14] sm:$0xf] }
  0x9f   : > { %v774_v10 = vpop.permute.xlu1 %773 }
  0xa1   : > { %v776_v11 = vpop.permute.xlu0 %775 }
  0xa2   : > { %v780_v17 = vsel %vm779_vm3, %v774_v10, %v776_v11 }
  0xa3   : > { %v978_v14 = vpop.permute.xlu1 %977  ;;  %v791_v22 = vand.u32 %v10350_v16, %v780_v17 }
  0xa5   : > { %v778_v15 = vpop.permute.xlu0 %777 }
  0xa6   : > { %v797_v18 = vand.u32 %v10350_v16, %v778_v15  ;;  %v781_v19 = vsel %vm779_vm3, %v776_v11, %v778_v15 }
  0xa7   : > { %v794_v20 = vand.u32 %v10350_v16, %v781_v19  ;;  %v976_v26 = vpop.permute.xlu1 %975 }
  0xa8   : > { %9305 = vmatpush3.bf16.msra.mxu1 %v797_v18  ;;  %v982_v32 = vsel %vm981_vm4, %v976_v26, %v978_v14  ;;  %v8752_v18 = vld [vmem:[%s11852_s2 + $0x18] sm:$0xf] }
  0xa9   : > { %813 = vmatprep.subr.bf16.mxu0 %v794_v20  ;;  %9310 = vmatprep.subr.bf16.mxu1 %v10057_v0  ;;  %v980_v25 = vpop.permute.xlu0 %979  ;;  %v988_v37 = vand.u32 %v982_v32, %v10350_v16 }
  0xaa   : > { %814 = vmatpush1.bf16.msra.mxu0 %v791_v22  ;;  %v983_v27 = vsel %vm981_vm4, %v978_v14, %v980_v25  ;;  %v994_v33 = vand.u32 %v980_v25, %v10350_v16  ;;  %v8755_v25 = vld [vmem:[%s11852_s2 + $0x1c] sm:$0xf] }
  0xab   : > { %9307 = vmatmul.mubr.msk.bf16.vlgmr.msra.gmra.mxu1 %vm782_vm5, %v8735_v23  ;;  %906 = vmatprep.subr.bf16.mxu0 %v887_v21  ;;  %v991_v29 = vand.u32 %v983_v27, %v10350_v16  ;;  %v1087_v31 = vpop.permute.xlu1 %1086  ;;  %v8758_v27 = vld [vmem:[%s11852_s2 + $0x20] sm:$0xf]  ;;  %s11859_s2 = smov 90  }
  0xac   : > { %9311 = vmatpush3.bf16.msra.mxu1 %v890_v24  ;;  %9312 = vmatprep.mubr.msk.bf16.mxu1 %vm10058_vm0, %v10057_v0  ;;  %v1101_v42 = vand.u32 %v1087_v31, %v10350_v16 }
  0xad   : > { %8736 = vmatmul.mubr.msk.bf16.vlgmr.msra.gmra.mxu0 %vm782_vm5, %v8735_v23  ;;  %v1085_v30 = vpop.permute.xlu0 %1084  ;;  %9316 = vmatprep.subr.bf16.mxu1 %v10057_v0 }
  0xae   : > { %907 = vmatpush1.bf16.msra.mxu0 %v884_v28  ;;  %924 = vmatprep.mubr.bf16.mxu0 %v10060_v6  ;;  %v1090_v35 = vsel %vm1088_vm6, %v1085_v30, %v1087_v31 }
  0xaf   : > { %1010 = vmatprep.subr.bf16.mxu0 %v991_v29  ;;  %v1098_v38 = vand.u32 %v1090_v35, %v10350_v16  ;;  %v1192_v39 = vpop.permute.xlu1 %1191 }
  0xb1   : > { %v1083_v36 = vpop.permute.xlu0 %1082 }
  0xb2   : > { %v1089_v41 = vsel %vm1088_vm6, %v1083_v36, %v1085_v30 }
  0xb3   : > { %9313 = vmatmul.mubr.msk.bf16.vlgmr.msra.gmra.mxu1 %vm782_vm5, %v767_v34  ;;  %v1190_v45 = vpop.permute.xlu1 %1189  ;;  %v1095_v46 = vand.u32 %v1089_v41, %v10350_v16 }
  0xb4   : > { %9317 = vmatpush3.bf16.msra.mxu1 %v994_v33  ;;  %9318 = vmatprep.mubr.msk.bf16.mxu1 %vm10058_vm0, %v10057_v0  ;;  %v1196_v50 = vsel %vm1195_vm7, %v1190_v45, %v1192_v39 }
  0xb5   : > { %8738 = vmatmul.mubr.msk.bf16.vlgmr.msra.gmra.mxu0 %vm782_vm5, %v767_v34  ;;  %9322 = vmatprep.subr.bf16.mxu1 %v10057_v0  ;;  %v1194_v40 = vpop.permute.xlu0 %1193  ;;  %v1202_v55 = vand.u32 %v1196_v50, %v10350_v16 }
  0xb6   : > { %1011 = vmatpush1.bf16.msra.mxu0 %v988_v37  ;;  %1028 = vmatprep.mubr.bf16.mxu0 %v10060_v6  ;;  %v1197_v44 = vsel %vm1195_vm7, %v1192_v39, %v1194_v40  ;;  %v1208_v51 = vand.u32 %v1194_v40, %v10350_v16 }
  0xb7   : > { %1117 = vmatprep.subr.bf16.mxu0 %v1098_v38  ;;  %v1205_v47 = vand.u32 %v1197_v44, %v10350_v16  ;;  %v1301_v49 = vpop.permute.xlu1 %1300 }
  0xb8   : > { %v1315_v60 = vand.u32 %v1301_v49, %v10350_v16 }
  0xb9   : > { %v1299_v48 = vpop.permute.xlu0 %1298 }
  0xba   : > { %v1304_v53 = vsel %vm1302_vm8, %v1299_v48, %v1301_v49 }
  0xbb   : > { %9319 = vmatmul.mubr.msk.bf16.vlgmr.msra.gmra.mxu1 %vm782_vm5, %v8740_v43  ;;  %v1312_v56 = vand.u32 %v1304_v53, %v10350_v16  ;;  %v1406_v57 = vpop.permute.xlu1 %1405 }
  0xbc   : > { %9323 = vmatpush3.bf16.msra.mxu1 %v1101_v42  ;;  %9324 = vmatprep.mubr.msk.bf16.mxu1 %vm10058_vm0, %v10057_v0 }
  0xbd   : > { %8741 = vmatmul.mubr.msk.bf16.vlgmr.msra.gmra.mxu0 %vm782_vm5, %v8740_v43  ;;  %9328 = vmatprep.subr.bf16.mxu1 %v10057_v0  ;;  %v1297_v54 = vpop.permute.xlu0 %1296 }
  0xbe   : > { %1118 = vmatpush1.bf16.msra.mxu0 %v1095_v46  ;;  %1135 = vmatprep.mubr.bf16.mxu0 %v10060_v6  ;;  %v1303_v59 = vsel %vm1302_vm8, %v1297_v54, %v1299_v48 }
  0xbf   : > { %1224 = vmatprep.subr.bf16.mxu0 %v1205_v47  ;;  %v1404_v63 = vpop.permute.xlu1 %1403  ;;  %v1309_v1 = vand.u32 %v1303_v59, %v10350_v16 }
  0xc0   : > { %v1410_v5 = vsel %vm1409_vm9, %v1404_v63, %v1406_v57 }
  0xc1   : > { %v1408_v58 = vpop.permute.xlu0 %1407  ;;  %v1416_v11 = vand.u32 %v1410_v5, %v10350_v16 }
  0xc2   : > { %v1411_v62 = vsel %vm1409_vm9, %v1406_v57, %v1408_v58  ;;  %v1422_v7 = vand.u32 %v1408_v58, %v10350_v16 }
  0xc3   : > { %9325 = vmatmul.mubr.msk.bf16.vlgmr.msra.gmra.mxu1 %vm782_vm5, %v8743_v52  ;;  %v1419_v2 = vand.u32 %v1411_v62, %v10350_v16  ;;  %v1515_v4 = vpop.permute.xlu1 %1514 }
  0xc4   : > { %9329 = vmatpush3.bf16.msra.mxu1 %v1208_v51  ;;  %9330 = vmatprep.mubr.msk.bf16.mxu1 %vm10058_vm0, %v10057_v0  ;;  %v1529_v17 = vand.u32 %v1515_v4, %v10350_v16 }
  0xc5   : > { %8744 = vmatmul.mubr.msk.bf16.vlgmr.msra.gmra.mxu0 %vm782_vm5, %v8743_v52  ;;  %9334 = vmatprep.subr.bf16.mxu1 %v10057_v0  ;;  %v1513_v3 = vpop.permute.xlu0 %1512 }
  0xc6   : > { %1225 = vmatpush1.bf16.msra.mxu0 %v1202_v55  ;;  %1242 = vmatprep.mubr.bf16.mxu0 %v10060_v6  ;;  %v1518_v9 = vsel %vm1516_vm10, %v1513_v3, %v1515_v4 }
  0xc7   : > { %1331 = vmatprep.subr.bf16.mxu0 %v1312_v56  ;;  %v1526_v12 = vand.u32 %v1518_v9, %v10350_v16  ;;  %v1620_v14 = vpop.permute.xlu1 %1619 }
  0xc9   : > { %v1511_v10 = vpop.permute.xlu0 %1510 }
  0xca   : > { %v1517_v15 = vsel %vm1516_vm10, %v1511_v10, %v1513_v3 }
  0xcb   : > { %9331 = vmatmul.mubr.msk.bf16.vlgmr.msra.gmra.mxu1 %vm782_vm5, %v8746_v61  ;;  %v1523_v20 = vand.u32 %v1517_v15, %v10350_v16  ;;  %v1618_v22 = vpop.permute.xlu1 %1617 }
  0xcc   : > { %9335 = vmatpush3.bf16.msra.mxu1 %v1315_v60  ;;  %9336 = vmatprep.mubr.msk.bf16.mxu1 %vm10058_vm0, %v10057_v0  ;;  %v1624_v23 = vsel %vm1623_vm11, %v1618_v22, %v1620_v14 }
  0xcd   : > { %8747 = vmatmul.mubr.msk.bf16.vlgmr.msra.gmra.mxu0 %vm782_vm5, %v8746_v61  ;;  %9340 = vmatprep.subr.bf16.mxu1 %v10057_v0  ;;  %v1622_v13 = vpop.permute.xlu0 %1621  ;;  %v1630_v26 = vand.u32 %v1624_v23, %v10350_v16 }
  0xce   : > { %1332 = vmatpush1.bf16.msra.mxu0 %v1309_v1  ;;  %1349 = vmatprep.mubr.bf16.mxu0 %v10060_v6  ;;  %v1625_v19 = vsel %vm1623_vm11, %v1620_v14, %v1622_v13  ;;  %v1636_v24 = vand.u32 %v1622_v13, %v10350_v16 }
  0xcf   : > { %1438 = vmatprep.subr.bf16.mxu0 %v1419_v2  ;;  %v1633_v21 = vand.u32 %v1625_v19, %v10350_v16 }
  0xd3   : > { %9337 = vmatmul.mubr.msk.bf16.vlgmr.msra.gmra.mxu1 %vm782_vm5, %v8749_v8 }
  0xd4   : > { %9341 = vmatpush3.bf16.msra.mxu1 %v1422_v7  ;;  %9342 = vmatprep.mubr.msk.bf16.mxu1 %vm10058_vm0, %v10057_v0 }
  0xd5   : > { %8750 = vmatmul.mubr.msk.bf16.vlgmr.msra.gmra.mxu0 %vm782_vm5, %v8749_v8  ;;  %9346 = vmatprep.subr.bf16.mxu1 %v10057_v0 }
  0xd6   : > { %1439 = vmatpush1.bf16.msra.mxu0 %v1416_v11  ;;  %1456 = vmatprep.mubr.bf16.mxu0 %v10060_v6 }
  0xd7   : > { %1545 = vmatprep.subr.bf16.mxu0 %v1526_v12 }
  0xdb   : > { %9343 = vmatmul.mubr.msk.bf16.vlgmr.msra.gmra.mxu1 %vm782_vm5, %v8752_v18 }
  0xdc   : > { %9347 = vmatpush3.bf16.msra.mxu1 %v1529_v17  ;;  %9348 = vmatprep.mubr.msk.bf16.mxu1 %vm10058_vm0, %v10057_v0 }
  0xdd   : > { %8753 = vmatmul.mubr.msk.bf16.vlgmr.msra.gmra.mxu0 %vm782_vm5, %v8752_v18  ;;  %9352 = vmatprep.subr.bf16.mxu1 %v10057_v0 }
  0xde   : > { %1546 = vmatpush1.bf16.msra.mxu0 %v1523_v20  ;;  %1563 = vmatprep.mubr.bf16.mxu0 %v10060_v6 }
  0xdf   : > { %1652 = vmatprep.subr.bf16.mxu0 %v1633_v21 }
  0xe3   : > { %9349 = vmatmul.mubr.msk.bf16.vlgmr.msra.gmra.mxu1 %vm782_vm5, %v8755_v25 }
  0xe4   : > { %9353 = vmatpush3.bf16.msra.mxu1 %v1636_v24  ;;  %9354 = vmatprep.mubr.msk.bf16.mxu1 %vm10058_vm0, %v10057_v0 }
  0xe5   : > { %8756 = vmatmul.mubr.msk.bf16.vlgmr.msra.gmra.mxu0 %vm782_vm5, %v8755_v25  ;;  %9358 = vmatprep.subr.bf16.mxu1 %v10057_v0 }
  0xe6   : > { %1653 = vmatpush1.bf16.msra.mxu0 %v1630_v26  ;;  %1670 = vmatprep.mubr.bf16.mxu0 %v10060_v6 }
  0xeb   : > { %9355 = vmatmul.mubr.msk.bf16.vlgmr.msra.gmra.mxu1 %vm782_vm5, %v8758_v27 }
  0xec   : > { %9360 = vmatprep.mubr.msk.bf16.mxu1 %vm10058_vm0, %v10057_v0 }
  0xed   : > { %8759 = vmatmul.mubr.msk.bf16.vlgmr.msra.gmra.mxu0 %vm782_vm5, %v8758_v27 }
  0xee   : > { %1852 = vmatprep.mubr.bf16.mxu0 %v10060_v6 }
 0x16b   : > { %v874_v16 = vpop.f32.mrf.mxu1 }
 0x16d   : > { %v833_v28 = vpop.f32.mrf.mxu0  ;;  %v9308_v29 = vpop.f32.mrf.mxu1 }
 0x16f   : > { %v835_v30 = vpop.f32.mrf.mxu0  ;;  %v877_v31 = vpop.f32.mrf.mxu1 }
 0x171   : > { %v837_v32 = vpop.f32.mrf.mxu0  ;;  %v9309_v33 = vpop.f32.mrf.mxu1 }
 0x173   : > { %v838_v34 = vpop.f32.mrf.mxu0  ;;  %v967_v35 = vpop.f32.mrf.mxu1 }
 0x174   : > { %v968_v17 = vadd.f32 %v967_v35, %v874_v16 }
 0x175   : > { %v926_v36 = vpop.f32.mrf.mxu0  ;;  %v9314_v37 = vpop.f32.mrf.mxu1 }
 0x176   : > { %v927_v20 = vadd.f32 %v926_v36, %v833_v28 }
 0x177   : > { %v928_v38 = vpop.f32.mrf.mxu0  ;;  %v970_v39 = vpop.f32.mrf.mxu1 }
 0x178   : > { %v929_v24 = vadd.f32 %v928_v38, %v835_v30  ;;  %v1748_v30 = vlaneseq }
 0x179   : > { %v930_v40 = vpop.f32.mrf.mxu0  ;;  %v9315_v41 = vpop.f32.mrf.mxu1 }
 0x17b   : > { %v931_v42 = vpop.f32.mrf.mxu0  ;;  %v1071_v43 = vpop.f32.mrf.mxu1 }
 0x17c   : > { %v1079_v21 = vadd.f32 %v1071_v43, %v968_v17 }
 0x17d   : > { %v1030_v44 = vpop.f32.mrf.mxu0  ;;  %v9320_v45 = vpop.f32.mrf.mxu1 }
 0x17e   : > { %v1077_v25 = vadd.f32 %v1030_v44, %v927_v20 }
 0x17f   : > { %v1032_v46 = vpop.f32.mrf.mxu0  ;;  %v1074_v47 = vpop.f32.mrf.mxu1 }
 0x180   : > { %v1078_v31 = vadd.f32 %v1032_v46, %v929_v24 }
 0x181   : > { %v1034_v48 = vpop.f32.mrf.mxu0  ;;  %v9321_v49 = vpop.f32.mrf.mxu1 }
 0x182   : > { %v1726_v48 = vpop.permute.xlu0 %1725 }
 0x183   : > { %v1035_v50 = vpop.f32.mrf.mxu0  ;;  %v1178_v51 = vpop.f32.mrf.mxu1 }
 0x184   : > { %v1186_v26 = vadd.f32 %v1178_v51, %v1079_v21 }
 0x185   : > { %v1137_v52 = vpop.f32.mrf.mxu0  ;;  %v9326_v53 = vpop.f32.mrf.mxu1 }
 0x186   : > { %v1184_v32 = vadd.f32 %v1137_v52, %v1077_v25  ;;  %v1736_v53 = vpop.permute.xlu1 %1735 }
 0x187   : > { %v1139_v54 = vpop.f32.mrf.mxu0  ;;  %v1181_v55 = vpop.f32.mrf.mxu1 }
 0x188   : > { %v1185_v39 = vadd.f32 %v1139_v54, %v1078_v31 }
 0x189   : > { %v1141_v56 = vpop.f32.mrf.mxu0  ;;  %v9327_v57 = vpop.f32.mrf.mxu1 }
 0x18a   : > { %v10480_v56 = vshrl.u32 %v1748_v30, 7 }
 0x18b   : > { %v1142_v58 = vpop.f32.mrf.mxu0  ;;  %v1285_v59 = vpop.f32.mrf.mxu1 }
 0x18c   : > { %v1293_v33 = vadd.f32 %v1285_v59, %v1186_v26 }
 0x18d   : > { %v1244_v60 = vpop.f32.mrf.mxu0  ;;  %v9332_v61 = vpop.f32.mrf.mxu1 }
 0x18e   : > { %v1291_v40 = vadd.f32 %v1244_v60, %v1184_v32 }
 0x18f   : > { %v1246_v62 = vpop.f32.mrf.mxu0  ;;  %v1288_v63 = vpop.f32.mrf.mxu1 }
 0x190   : > { %v1292_v42 = vadd.f32 %v1246_v62, %v1185_v39  ;;  %v1750_v62 = vsub.s32 0, %v10480_v56 }
 0x191   : > { %v1248_v1 = vpop.f32.mrf.mxu0  ;;  %v9333_v2 = vpop.f32.mrf.mxu1 }
 0x193   : > { %v1249_v3 = vpop.f32.mrf.mxu0  ;;  %v1392_v4 = vpop.f32.mrf.mxu1 }
 0x194   : > { %v1400_v41 = vadd.f32 %v1392_v4, %v1293_v33 }
 0x195   : > { %v1351_v5 = vpop.f32.mrf.mxu0  ;;  %v9338_v7 = vpop.f32.mrf.mxu1 }
 0x196   : > { %v1398_v28 = vadd.f32 %v1351_v5, %v1291_v40 }
 0x197   : > { %v1353_v8 = vpop.f32.mrf.mxu0  ;;  %v1395_v9 = vpop.f32.mrf.mxu1 }
 0x198   : > { %v1399_v38 = vadd.f32 %v1353_v8, %v1292_v42  ;;  %v1754_v8 = vsub.s32 1, %v10480_v56 }
 0x199   : > { %v1355_v10 = vpop.f32.mrf.mxu0  ;;  %v9339_v11 = vpop.f32.mrf.mxu1 }
 0x19a   : > { %v756_v10 = vld [vmem:[%s11853_s19] sm:$0x7]  ;;  %v1758_v11 = vsub.s32 2, %v10480_v56  ;;  %s11863_s19 = smov 19  }
 0x19b   : > { %v1356_v12 = vpop.f32.mrf.mxu0  ;;  %v1499_v13 = vpop.f32.mrf.mxu1 }
 0x19c   : > { %v1507_v36 = vadd.f32 %v1499_v13, %v1400_v41  ;;  %v8797_v41 = vld [vmem:[%s11860_s11 + $0x8] sm:$0xff] }
 0x19d   : > { %v1458_v14 = vpop.f32.mrf.mxu0  ;;  %v9344_v15 = vpop.f32.mrf.mxu1 }
 0x19e   : > { %v1505_v44 = vadd.f32 %v1458_v14, %v1398_v28  ;;  %v10490_v15 = vrot.slane %v756_v10, %v1750_v62 }
 0x19f   : > { %v1460_v18 = vpop.f32.mrf.mxu0  ;;  %v1502_v19 = vpop.f32.mrf.mxu1 }
 0x1a0   : > { %v1506_v50 = vadd.f32 %v1460_v18, %v1399_v38  ;;  %v10492_v19 = vrot.slane %v756_v10, %v1754_v8 }
 0x1a1   : > { %v1462_v22 = vpop.f32.mrf.mxu0  ;;  %v9345_v23 = vpop.f32.mrf.mxu1 }
 0x1a2   : > { %v10495_v23 = vrot.slane %v756_v10, %v1758_v11  ;;  %v8773_v10 = vld [vmem:[%s11862_s29 + $0xc] sm:$0xf] }
 0x1a3   : > { %v1463_v27 = vpop.f32.mrf.mxu0  ;;  %v1606_v29 = vpop.f32.mrf.mxu1 }
 0x1a4   : > { %v1614_v47 = vadd.f32 %v1606_v29, %v1507_v36 }
 0x1a5   : > { %v1565_v34 = vpop.f32.mrf.mxu0  ;;  %v9350_v37 = vpop.f32.mrf.mxu1 }
 0x1a6   : > { %v1612_v51 = vadd.f32 %v1565_v34, %v1505_v44 }
 0x1a7   : > { %v1567_v16 = vpop.f32.mrf.mxu0  ;;  %v1609_v35 = vpop.f32.mrf.mxu1 }
 0x1a8   : > { %v1613_v57 = vadd.f32 %v1567_v16, %v1506_v50  ;;  %v2736_v16 = vld [vmem:[%s11860_s11] sm:$0xff]  ;;  %s10075_s11 = smov 2  }
 0x1a9   : > { %v1569_v43 = vpop.f32.mrf.mxu0  ;;  %v9351_v45 = vpop.f32.mrf.mxu1 }
 0x1ab   : > { %v1570_v46 = vpop.f32.mrf.mxu0  ;;  %v1713_v49 = vpop.f32.mrf.mxu1 }
 0x1ac   : > { %v1721_v52 = vadd.f32 %v1713_v49, %v1614_v47 }
 0x1ad   : > { %v9356_v54 = vpop.f32.mrf.mxu1  ;;  %v1672_v55 = vpop.f32.mrf.mxu0 }
 0x1ae   : > { %v1730_v58 = vmul.f32 %v1726_v48, %v1721_v52  ;;  %v1719_v59 = vadd.f32 %v1672_v55, %v1612_v51  ;;  %v1792_v54 = vld [vmem:[%s11862_s29] sm:$0xf] }
 0x1af   : > { %v1674_v60 = vpop.f32.mrf.mxu0  ;;  %v1716_v61 = vpop.f32.mrf.mxu1 }
 0x1b0   : > { %v1728_v63 = vmul.f32 %v1726_v48, %v1719_v59  ;;  %v1740_v1 = vadd.f32 %v1736_v53, %v1730_v58  ;;  %v1720_v2 = vadd.f32 %v1674_v60, %v1613_v57  ;;  %v10565_v61 = vld [vmem:[#allocation3] sm:$0xff] }
 0x1b1   : > { %v1676_v3 = vpop.f32.mrf.mxu0  ;;  %v9357_v4 = vpop.f32.mrf.mxu1 }
 0x1b2   : > { %v1738_v5 = vadd.f32 %v1736_v53, %v1728_v63  ;;  %v1729_v7 = vmul.f32 %v1726_v48, %v1720_v2  ;;  %v1743_v13 = vmul.f32 0.1, %v1740_v1  ;;  %v8762_v48 = vld [vmem:[%s11861_s27 + $0x4] sm:$0xf]  ;;  %s11864_s27 = smov 127  }
 0x1b3   : > { %v1677_v9 = vpop.f32.mrf.mxu0 }
 0x1b4   : > { %v1741_v12 = vmul.f32 0.1, %v1738_v5  ;;  %v1739_v14 = vadd.f32 %v1736_v53, %v1729_v7  ;;  %v1746_v22 = vmax.f32 %v1740_v1, %v1743_v13  ;;  %v8769_v1 = vld [vmem:[%s11862_s29 + $0x8] sm:$0xf] }
 0x1b6   : > { %v1742_v17 = vmul.f32 0.1, %v1739_v14  ;;  %v1744_v18 = vmax.f32 %v1738_v5, %v1741_v12  ;;  %v1765_v25 = vmul.f32 %v10495_v23, %v1746_v22 }
 0x1b8   : > { %v1763_v20 = vmul.f32 %v10490_v15, %v1744_v18  ;;  %v1745_v21 = vmax.f32 %v1739_v14, %v1742_v17 }
 0x1ba   : > { %1769 = vrot.lane.b32.xlu1 %v1763_v20, %s11801_s8  ;;  %v1764_v24 = vmul.f32 %v10492_v19, %v1745_v21  ;;  %v8777_v20 = vld [vmem:[%s11862_s29 + $0x10] sm:$0xf] }
 0x1bc   : > { %1771 = vrot.lane.b32.xlu0 %v1764_v24, %s11801_s8 }
 0x1be   : > { %1773 = vrot.lane.b32.xlu1 %v1765_v25, %s11801_s8  ;;  %s11857_s8 = smov 108  }
 0x22c   : > { %v1770_v26 = vpop.permute.xlu1 %1769 }
 0x22d   : > { %1782 = vst.msk [vmem:[#allocation2] sm:$0xff] %vm1781_vm13, %v1770_v26 }
 0x22e   : > { %v1772_v27 = vpop.permute.xlu0 %1771 }
 0x22f   : > { %v1776_v29 = vsel %vm1775_vm14, %v1770_v26, %v1772_v27 }
 0x230   : > { %v1790_v31 = vpack.c.bf16 %v1776_v29, %v1776_v29  ;;  %v1774_v32 = vpop.permute.xlu1 %1773 }
 0x231   : > { %v1777_v33 = vsel %vm1775_vm14, %v1772_v27, %v1774_v32 }
 0x232   : > { %1785 = vst.msk [vmem:[#allocation2 + $0x10] sm:$0xff] %vm1784_vm15, %v1777_v33  ;;  %1800 = vrot.lane.b32.xlu1 %v1790_v31, %s11803_s30 }
 0x234   : > { %v1786_v34 = vld [vmem:[#allocation2] sm:$0xff] }
 0x235   : > { %v1789_v37 = vpack.c.bf16 %v1786_v34, %v1786_v34 }
 0x237   : > { %1798 = vrot.lane.b32.xlu0 %v1789_v37, %s11803_s30  ;;  %1996 = vrot.lane.b32.xlu1 %v1789_v37, %s11854_s4  ;;  %v1905_v50 = vsel %vm1810_vm1, %v1789_v37, 0 }
 0x239   : > { %v1788_v39 = vld [vmem:[#allocation2 + $0x10] sm:$0xff] }
 0x23a   : > { %v1791_v40 = vpack.c.bf16 %v1788_v39, %v1788_v39 }
 0x23c   : > { %1802 = vrot.lane.b32.xlu0 %v1791_v40, %s11803_s30  ;;  %2000 = vrot.lane.b32.xlu1 %v1791_v40, %s11854_s4  ;;  %s11858_s30 = smov 92   ;;  %v1911_v49 = vsel %vm1810_vm1, %v1791_v40, 0 }
 0x240   : > { %1998 = vrot.lane.b32.xlu0 %v1790_v31, %s11854_s4  ;;  %2104 = vrot.lane.b32.xlu1 %v1790_v31, %s11855_s1 }
 0x244   : > { %2102 = vrot.lane.b32.xlu0 %v1789_v37, %s11855_s1  ;;  %2208 = vrot.lane.b32.xlu1 %v1789_v37, %s11856_s0 }
 0x248   : > { %2106 = vrot.lane.b32.xlu0 %v1791_v40, %s11855_s1  ;;  %2212 = vrot.lane.b32.xlu1 %v1791_v40, %s11856_s0 }
 0x24c   : > { %2210 = vrot.lane.b32.xlu0 %v1790_v31, %s11856_s0  ;;  %2316 = vrot.lane.b32.xlu1 %v1790_v31, %s11857_s8 }
 0x250   : > { %2314 = vrot.lane.b32.xlu0 %v1789_v37, %s11857_s8  ;;  %2420 = vrot.lane.b32.xlu1 %v1789_v37, %s11858_s30 }
 0x254   : > { %2318 = vrot.lane.b32.xlu0 %v1791_v40, %s11857_s8  ;;  %2424 = vrot.lane.b32.xlu1 %v1791_v40, %s11858_s30 }
 0x258   : > { %2422 = vrot.lane.b32.xlu0 %v1790_v31, %s11858_s30  ;;  %2528 = vrot.lane.b32.xlu1 %v1790_v31, %s10066_s7 }
 0x25c   : > { %2526 = vrot.lane.b32.xlu0 %v1789_v37, %s10066_s7  ;;  %2632 = vrot.lane.b32.xlu1 %v1789_v37, %s11859_s2 }
 0x260   : > { %2530 = vrot.lane.b32.xlu0 %v1791_v40, %s10066_s7  ;;  %2636 = vrot.lane.b32.xlu1 %v1791_v40, %s11859_s2 }
 0x264   : > { %2634 = vrot.lane.b32.xlu0 %v1790_v31, %s11859_s2  ;;  %2749 = vperm.xlu1 %9947, %v8797_v41   ;;  %v8785_v41 = vld [vmem:[%s11862_s29 + $0x18] sm:$0xf] }
 0x268   : > { %2739 = vperm.xlu0 %9946, %v2736_v16  }
 0x2a4   : > { %v1801_v35 = vpop.permute.xlu1 %1800 }
 0x2a9   : > { %v1799_v42 = vpop.permute.xlu0 %1798  ;;  %v1997_v28 = vpop.permute.xlu1 %1996 }
 0x2aa   : > { %v1804_v36 = vsel %vm779_vm3, %v1799_v42, %v1801_v35 }
 0x2ab   : > { %v1812_v47 = vsel %vm1810_vm1, %v1804_v36, 0 }
 0x2ae   : > { %v1803_v43 = vpop.permute.xlu0 %1802  ;;  %v2001_v45 = vpop.permute.xlu1 %2000 }
 0x2af   : > { %v1805_v38 = vsel %vm779_vm3, %v1801_v35, %v1803_v43  ;;  %v1818_v44 = vsel %vm1810_vm1, %v1803_v43, 0  ;;  %v2014_v59 = vsel %vm1810_vm1, %v2001_v45, 0 }
 0x2b0   : > { %8763 = vmatprep.subr.msk.bf16.mxu0 %vm1810_vm1, %v1805_v38  ;;  %9359 = vmatpush3.bf16.msra.mxu1 %v1818_v44 }
 0x2b1   : > { %1835 = vmatpush1.bf16.msra.mxu0 %v1812_v47  ;;  %9364 = vmatprep.subr.bf16.mxu1 %v10057_v0 }
 0x2b2   : > { %v1999_v46 = vpop.permute.xlu0 %1998  ;;  %8766 = vmatprep.subr.msk.bf16.mxu0 %vm1810_vm1, %v1790_v31  ;;  %v2105_v51 = vpop.permute.xlu1 %2104  ;;  %v8781_v31 = vld [vmem:[%s11862_s29 + $0x14] sm:$0xf] }
 0x2b3   : > { %9361 = vmatmul.mubr.msk.bf16.vlgmr.msra.gmra.mxu1 %vm1806_vm2, %v8762_v48  ;;  %v2003_v52 = vsel %vm981_vm4, %v1999_v46, %v2001_v45  ;;  %v2002_v55 = vsel %vm981_vm4, %v1997_v28, %v1999_v46  ;;  %v8789_v45 = vld [vmem:[%s11862_s29 + $0x1c] sm:$0xf] }
 0x2b4   : > { %8764 = vmatmul.mubr.msk.bf16.vlgmr.msra.gmra.mxu0 %vm1806_vm2, %v8762_v48  ;;  %9365 = vmatpush3.bf16.msra.mxu1 %v1911_v49  ;;  %v8793_v48 = vld [vmem:[%s11862_s29 + $0x20] sm:$0xf]  ;;  %s11866_s29 = sld [smem:[#allocation20_spill]] }
 0x2b5   : > { %1928 = vmatpush1.bf16.msra.mxu0 %v1905_v50  ;;  %9366 = vmatprep.mubr.msk.bf16.mxu1 %vm10058_vm0, %v10057_v0 }
 0x2b6   : > { %v2103_v53 = vpop.permute.xlu0 %2102  ;;  %8770 = vmatprep.subr.msk.bf16.mxu0 %vm1810_vm1, %v2003_v52  ;;  %9370 = vmatprep.subr.bf16.mxu1 %v10057_v0  ;;  %v2209_v58 = vpop.permute.xlu1 %2208  ;;  %v2008_v0 = vsel %vm1810_vm1, %v2002_v55, 0 }
 0x2b7   : > { %1945 = vmatprep.mubr.bf16.mxu0 %v10060_v6  ;;  %v2108_v2 = vsel %vm1088_vm6, %v2103_v53, %v2105_v51 }
 0x2b8   : > { %v2114_v5 = vsel %vm1810_vm1, %v2108_v2, 0 }
 0x2ba   : > { %v2107_v57 = vpop.permute.xlu0 %2106  ;;  %v2213_v63 = vpop.permute.xlu1 %2212 }
 0x2bb   : > { %9367 = vmatmul.mubr.msk.bf16.vlgmr.msra.gmra.mxu1 %vm1806_vm2, %v1792_v54  ;;  %v2109_v60 = vsel %vm1088_vm6, %v2105_v51, %v2107_v57  ;;  %v2120_v4 = vsel %vm1810_vm1, %v2107_v57, 0  ;;  %v2226_v12 = vsel %vm1810_vm1, %v2213_v63, 0 }
 0x2bc   : > { %9371 = vmatpush3.bf16.msra.mxu1 %v2014_v59  ;;  %8767 = vmatmul.mubr.msk.bf16.vlgmr.msra.gmra.mxu0 %vm1806_vm2, %v1792_v54 }
 0x2bd   : > { %2031 = vmatpush1.bf16.msra.mxu0 %v2008_v0  ;;  %9372 = vmatprep.mubr.msk.bf16.mxu1 %vm10058_vm0, %v10565_v61 }
 0x2be   : > { %8774 = vmatprep.subr.msk.bf16.mxu0 %vm1810_vm1, %v2109_v60  ;;  %v2211_v62 = vpop.permute.xlu0 %2210  ;;  %9376 = vmatprep.subr.bf16.mxu1 %v10565_v61  ;;  %v2317_v8 = vpop.permute.xlu1 %2316 }
 0x2bf   : > { %2048 = vmatprep.mubr.bf16.mxu0 %v10060_v6  ;;  %v2215_v7 = vsel %vm1195_vm7, %v2211_v62, %v2213_v63  ;;  %v2214_v11 = vsel %vm1195_vm7, %v2209_v58, %v2211_v62 }
 0x2c0   : > { %v2220_v14 = vsel %vm1810_vm1, %v2214_v11, 0 }
 0x2c2   : > { %v2315_v3 = vpop.permute.xlu0 %2314  ;;  %v2421_v13 = vpop.permute.xlu1 %2420 }
 0x2c3   : > { %9373 = vmatmul.mubr.msk.bf16.vlgmr.msra.gmra.mxu1 %vm1806_vm2, %v8769_v1  ;;  %v2320_v21 = vsel %vm1302_vm8, %v2315_v3, %v2317_v8 }
 0x2c4   : > { %9377 = vmatpush3.bf16.msra.mxu1 %v2120_v4  ;;  %8771 = vmatmul.mubr.msk.bf16.vlgmr.msra.gmra.mxu0 %vm1806_vm2, %v8769_v1  ;;  %v2326_v26 = vsel %vm1810_vm1, %v2320_v21, 0 }
 0x2c5   : > { %2137 = vmatpush1.bf16.msra.mxu0 %v2114_v5  ;;  %9378 = vmatprep.mubr.msk.bf16.mxu1 %vm10058_vm0, %v10565_v61 }
 0x2c6   : > { %8778 = vmatprep.subr.msk.bf16.mxu0 %vm1810_vm1, %v2215_v7  ;;  %9382 = vmatprep.subr.bf16.mxu1 %v10565_v61  ;;  %v2319_v9 = vpop.permute.xlu0 %2318  ;;  %v2425_v22 = vpop.permute.xlu1 %2424 }
 0x2c7   : > { %2154 = vmatprep.mubr.bf16.mxu0 %v10060_v6  ;;  %v2321_v17 = vsel %vm1302_vm8, %v2317_v8, %v2319_v9  ;;  %v2332_v24 = vsel %vm1810_vm1, %v2319_v9, 0  ;;  %v2438_v34 = vsel %vm1810_vm1, %v2425_v22, 0 }
 0x2ca   : > { %v2423_v18 = vpop.permute.xlu0 %2422  ;;  %v2529_v29 = vpop.permute.xlu1 %2528 }
 0x2cb   : > { %9379 = vmatmul.mubr.msk.bf16.vlgmr.msra.gmra.mxu1 %vm1806_vm2, %v8773_v10  ;;  %v2427_v27 = vsel %vm1409_vm9, %v2423_v18, %v2425_v22  ;;  %v2426_v32 = vsel %vm1409_vm9, %v2421_v13, %v2423_v18 }
 0x2cc   : > { %9383 = vmatpush3.bf16.msra.mxu1 %v2226_v12  ;;  %8775 = vmatmul.mubr.msk.bf16.vlgmr.msra.gmra.mxu0 %vm1806_vm2, %v8773_v10  ;;  %v2432_v37 = vsel %vm1810_vm1, %v2426_v32, 0 }
 0x2cd   : > { %2243 = vmatpush1.bf16.msra.mxu0 %v2220_v14  ;;  %9384 = vmatprep.mubr.msk.bf16.mxu1 %vm10058_vm0, %v10565_v61 }
 0x2ce   : > { %8782 = vmatprep.subr.msk.bf16.mxu0 %vm1810_vm1, %v2321_v17  ;;  %9388 = vmatprep.subr.bf16.mxu1 %v10565_v61  ;;  %v2527_v25 = vpop.permute.xlu0 %2526  ;;  %v2633_v40 = vpop.permute.xlu1 %2632 }
 0x2cf   : > { %2260 = vmatprep.mubr.bf16.mxu0 %v10060_v6  ;;  %v2532_v16 = vsel %vm1516_vm10, %v2527_v25, %v2529_v29 }
 0x2d0   : > { %v2538_v36 = vsel %vm1810_vm1, %v2532_v16, 0 }
 0x2d2   : > { %v2531_v33 = vpop.permute.xlu0 %2530  ;;  %v2637_v28 = vpop.permute.xlu1 %2636 }
 0x2d3   : > { %9385 = vmatmul.mubr.msk.bf16.vlgmr.msra.gmra.mxu1 %vm1806_vm2, %v8777_v20  ;;  %v2533_v39 = vsel %vm1516_vm10, %v2529_v29, %v2531_v33  ;;  %v2544_v42 = vsel %vm1810_vm1, %v2531_v33, 0  ;;  %v2650_v44 = vsel %vm1810_vm1, %v2637_v28, 0 }
 0x2d4   : > { %9389 = vmatpush3.bf16.msra.mxu1 %v2332_v24  ;;  %8779 = vmatmul.mubr.msk.bf16.vlgmr.msra.gmra.mxu0 %vm1806_vm2, %v8777_v20 }
 0x2d5   : > { %2349 = vmatpush1.bf16.msra.mxu0 %v2326_v26  ;;  %9390 = vmatprep.mubr.msk.bf16.mxu1 %vm10058_vm0, %v10565_v61 }
 0x2d6   : > { %8786 = vmatprep.subr.msk.bf16.mxu0 %vm1810_vm1, %v2427_v27  ;;  %9394 = vmatprep.subr.bf16.mxu1 %v10565_v61  ;;  %v2635_v35 = vpop.permute.xlu0 %2634 }
 0x2d7   : > { %2366 = vmatprep.mubr.bf16.mxu0 %v10060_v6  ;;  %v2639_v43 = vsel %vm1623_vm11, %v2635_v35, %v2637_v28  ;;  %v2638_v38 = vsel %vm1623_vm11, %v2633_v40, %v2635_v35 }
 0x2d8   : > { %v2644_v47 = vsel %vm1810_vm1, %v2638_v38, 0 }
 0x2db   : > { %9391 = vmatmul.mubr.msk.bf16.vlgmr.msra.gmra.mxu1 %vm1806_vm2, %v8781_v31 }
 0x2dc   : > { %9395 = vmatpush3.bf16.msra.mxu1 %v2438_v34  ;;  %8783 = vmatmul.mubr.msk.bf16.vlgmr.msra.gmra.mxu0 %vm1806_vm2, %v8781_v31 }
 0x2dd   : > { %2455 = vmatpush1.bf16.msra.mxu0 %v2432_v37  ;;  %9396 = vmatprep.mubr.msk.bf16.mxu1 %vm10058_vm0, %v10565_v61 }
 0x2de   : > { %8790 = vmatprep.subr.msk.bf16.mxu0 %vm1810_vm1, %v2533_v39  ;;  %9400 = vmatprep.subr.bf16.mxu1 %v10565_v61 }
 0x2df   : > { %2472 = vmatprep.mubr.bf16.mxu0 %v10060_v6 }
 0x2e3   : > { %9397 = vmatmul.mubr.msk.bf16.vlgmr.msra.gmra.mxu1 %vm1806_vm2, %v8785_v41 }
 0x2e4   : > { %9401 = vmatpush3.bf16.msra.mxu1 %v2544_v42  ;;  %8787 = vmatmul.mubr.msk.bf16.vlgmr.msra.gmra.mxu0 %vm1806_vm2, %v8785_v41 }
 0x2e5   : > { %2561 = vmatpush1.bf16.msra.mxu0 %v2538_v36  ;;  %9402 = vmatprep.mubr.msk.bf16.mxu1 %vm10058_vm0, %v10565_v61 }
 0x2e6   : > { %8794 = vmatprep.subr.msk.bf16.mxu0 %vm1810_vm1, %v2639_v43  ;;  %9406 = vmatprep.subr.bf16.mxu1 %v10565_v61 }
 0x2e7   : > { %2578 = vmatprep.mubr.bf16.mxu0 %v10060_v6 }
 0x2eb   : > { %9403 = vmatmul.mubr.msk.bf16.vlgmr.msra.gmra.mxu1 %vm1806_vm2, %v8789_v45 }
 0x2ec   : > { %9407 = vmatpush3.bf16.msra.mxu1 %v2650_v44  ;;  %8791 = vmatmul.mubr.msk.bf16.vlgmr.msra.gmra.mxu0 %vm1806_vm2, %v8789_v45 }
 0x2ed   : > { %2667 = vmatpush1.bf16.msra.mxu0 %v2644_v47  ;;  %9408 = vmatprep.mubr.msk.bf16.mxu1 %vm10058_vm0, %v10565_v61 }
 0x2ee   : > { %2684 = vmatprep.mubr.bf16.mxu0 %v10060_v6  ;;  %9412 = vmatprep.subr.bf16.mxu1 %v10565_v61 }
 0x2f3   : > { %9409 = vmatmul.mubr.msk.bf16.vlgmr.msra.gmra.mxu1 %vm1806_vm2, %v8793_v48 }
 0x2f4   : > { %8795 = vmatmul.mubr.msk.bf16.vlgmr.msra.gmra.mxu0 %vm1806_vm2, %v8793_v48  ;;  %9414 = vmatprep.mubr.msk.bf16.mxu1 %vm10058_vm0, %v10565_v61 }
 0x2f5   : > { %2845 = vmatprep.mubr.bf16.mxu0 %v10060_v6 }
 0x373   : > { %v1895_v46 = vpop.f32.mrf.mxu1 }
 0x374   : > { %v1854_v49 = vpop.f32.mrf.mxu0 }
 0x375   : > { %v9362_v50 = vpop.f32.mrf.mxu1 }
 0x376   : > { %v1856_v51 = vpop.f32.mrf.mxu0 }
 0x377   : > { %v1898_v52 = vpop.f32.mrf.mxu1 }
 0x378   : > { %v1858_v53 = vpop.f32.mrf.mxu0 }
 0x379   : > { %v9363_v54 = vpop.f32.mrf.mxu1 }
 0x37a   : > { %v1859_v55 = vpop.f32.mrf.mxu0 }
 0x37b   : > { %v1988_v57 = vpop.f32.mrf.mxu1 }
 0x37c   : > { %v1947_v58 = vpop.f32.mrf.mxu0  ;;  %v1989_v43 = vadd.f32 %v1988_v57, %v1895_v46 }
 0x37d   : > { %v9368_v59 = vpop.f32.mrf.mxu1  ;;  %v1948_v38 = vadd.f32 %v1947_v58, %v1854_v49 }
 0x37e   : > { %v1949_v60 = vpop.f32.mrf.mxu0 }
 0x37f   : > { %v1991_v0 = vpop.f32.mrf.mxu1  ;;  %v1950_v50 = vadd.f32 %v1949_v60, %v1856_v51 }
 0x380   : > { %v1951_v62 = vpop.f32.mrf.mxu0 }
 0x381   : > { %v9369_v63 = vpop.f32.mrf.mxu1 }
 0x382   : > { %v1952_v1 = vpop.f32.mrf.mxu0 }
 0x383   : > { %v2091_v2 = vpop.f32.mrf.mxu1 }
 0x384   : > { %v2050_v3 = vpop.f32.mrf.mxu0  ;;  %v2099_v47 = vadd.f32 %v2091_v2, %v1989_v43 }
 0x385   : > { %v9374_v4 = vpop.f32.mrf.mxu1  ;;  %v2097_v52 = vadd.f32 %v2050_v3, %v1948_v38 }
 0x386   : > { %v2052_v5 = vpop.f32.mrf.mxu0 }
 0x387   : > { %v2094_v7 = vpop.f32.mrf.mxu1  ;;  %v2098_v59 = vadd.f32 %v2052_v5, %v1950_v50 }
 0x388   : > { %v2054_v8 = vpop.f32.mrf.mxu0 }
 0x389   : > { %v9375_v9 = vpop.f32.mrf.mxu1 }
 0x38a   : > { %v2055_v10 = vpop.f32.mrf.mxu0 }
 0x38b   : > { %v2197_v11 = vpop.f32.mrf.mxu1 }
 0x38c   : > { %v2156_v12 = vpop.f32.mrf.mxu0  ;;  %v2205_v54 = vadd.f32 %v2197_v11, %v2099_v47 }
 0x38d   : > { %v9380_v13 = vpop.f32.mrf.mxu1  ;;  %v2203_v0 = vadd.f32 %v2156_v12, %v2097_v52 }
 0x38e   : > { %v2158_v14 = vpop.f32.mrf.mxu0 }
 0x38f   : > { %v2200_v17 = vpop.f32.mrf.mxu1  ;;  %v2204_v4 = vadd.f32 %v2158_v14, %v2098_v59  ;;  %v2740_v14 = vpop.permute.xlu0 %2739 }
 0x390   : > { %v2160_v18 = vpop.f32.mrf.mxu0 }
 0x391   : > { %v9381_v20 = vpop.f32.mrf.mxu1 }
 0x392   : > { %v2161_v21 = vpop.f32.mrf.mxu0 }
 0x393   : > { %v2303_v22 = vpop.f32.mrf.mxu1 }
 0x394   : > { %v2262_v24 = vpop.f32.mrf.mxu0  ;;  %v2311_v63 = vadd.f32 %v2303_v22, %v2205_v54 }
 0x395   : > { %v9386_v25 = vpop.f32.mrf.mxu1  ;;  %v2309_v7 = vadd.f32 %v2262_v24, %v2203_v0 }
 0x396   : > { %v2264_v26 = vpop.f32.mrf.mxu0 }
 0x397   : > { %v2306_v27 = vpop.f32.mrf.mxu1  ;;  %v2310_v57 = vadd.f32 %v2264_v26, %v2204_v4  ;;  %v3729_v4 = vld [vmem:[%s11865_s12] sm:$0xff] }
 0x398   : > { %v2266_v29 = vpop.f32.mrf.mxu0  ;;  %v2750_v27 = vpop.permute.xlu1 %2749 }
 0x399   : > { %v9387_v31 = vpop.f32.mrf.mxu1 }
 0x39a   : > { %v2267_v32 = vpop.f32.mrf.mxu0 }
 0x39b   : > { %v2409_v33 = vpop.f32.mrf.mxu1 }
 0x39c   : > { %v2368_v34 = vpop.f32.mrf.mxu0  ;;  %v2417_v9 = vadd.f32 %v2409_v33, %v2311_v63 }
 0x39d   : > { %v9392_v37 = vpop.f32.mrf.mxu1  ;;  %v2415_v49 = vadd.f32 %v2368_v34, %v2309_v7 }
 0x39e   : > { %v2370_v39 = vpop.f32.mrf.mxu0 }
 0x39f   : > { %v2412_v40 = vpop.f32.mrf.mxu1  ;;  %v2416_v51 = vadd.f32 %v2370_v39, %v2310_v57 }
 0x3a0   : > { %v2372_v41 = vpop.f32.mrf.mxu0 }
 0x3a1   : > { %v9393_v16 = vpop.f32.mrf.mxu1 }
 0x3a2   : > { %v2373_v35 = vpop.f32.mrf.mxu0 }
 0x3a3   : > { %v2515_v42 = vpop.f32.mrf.mxu1 }
 0x3a4   : > { %v2474_v28 = vpop.f32.mrf.mxu0  ;;  %v2523_v2 = vadd.f32 %v2515_v42, %v2417_v9 }
 0x3a5   : > { %v9398_v36 = vpop.f32.mrf.mxu1  ;;  %v2521_v60 = vadd.f32 %v2474_v28, %v2415_v49 }
 0x3a6   : > { %v2476_v45 = vpop.f32.mrf.mxu0 }
 0x3a7   : > { %v2518_v44 = vpop.f32.mrf.mxu1  ;;  %v2522_v5 = vadd.f32 %v2476_v45, %v2416_v51  ;;  %v8798_v51 = vld [vmem:[%s11866_s29 + $0x4] sm:$0xf] }
 0x3a8   : > { %v2478_v48 = vpop.f32.mrf.mxu0 }
 0x3a9   : > { %v9399_v53 = vpop.f32.mrf.mxu1 }
 0x3aa   : > { %v2479_v55 = vpop.f32.mrf.mxu0 }
 0x3ab   : > { %v2621_v62 = vpop.f32.mrf.mxu1 }
 0x3ac   : > { %v2580_v1 = vpop.f32.mrf.mxu0  ;;  %v2629_v11 = vadd.f32 %v2621_v62, %v2523_v2 }
 0x3ad   : > { %v9404_v8 = vpop.f32.mrf.mxu1  ;;  %v2627_v12 = vadd.f32 %v2580_v1, %v2521_v60  ;;  %v8833_v1 = vld [vmem:[%s11865_s12 + $0x8] sm:$0xff]  ;;  %s10076_s12 = smov 94  }
 0x3ae   : > { %v2582_v46 = vpop.f32.mrf.mxu0 }
 0x3af   : > { %v2624_v58 = vpop.f32.mrf.mxu1  ;;  %v2628_v21 = vadd.f32 %v2582_v46, %v2522_v5 }
 0x3b0   : > { %v2584_v10 = vpop.f32.mrf.mxu0 }
 0x3b1   : > { %v9405_v3 = vpop.f32.mrf.mxu1 }
 0x3b2   : > { %v2585_v13 = vpop.f32.mrf.mxu0 }
 0x3b3   : > { %v2727_v17 = vpop.f32.mrf.mxu1 }
 0x3b4   : > { %v2735_v18 = vadd.f32 %v2727_v17, %v2629_v11  ;;  %v2686_v20 = vpop.f32.mrf.mxu0  ;;  %v2787_v17 = vld [vmem:[%s11866_s29] sm:$0xf] }
 0x3b5   : > { %v2733_v22 = vadd.f32 %v2686_v20, %v2627_v12  ;;  %v9410_v24 = vpop.f32.mrf.mxu1 }
 0x3b6   : > { %v2744_v25 = vmul.f32 %v2740_v14, %v2735_v18  ;;  %v2688_v26 = vpop.f32.mrf.mxu0 }
 0x3b7   : > { %v2742_v29 = vmul.f32 %v2740_v14, %v2733_v22  ;;  %v2734_v31 = vadd.f32 %v2688_v26, %v2628_v21  ;;  %v2730_v32 = vpop.f32.mrf.mxu1 }
 0x3b8   : > { %v2754_v33 = vadd.f32 %v2750_v27, %v2744_v25  ;;  %v2690_v34 = vpop.f32.mrf.mxu0 }
 0x3b9   : > { %v2752_v37 = vadd.f32 %v2750_v27, %v2742_v29  ;;  %v2743_v39 = vmul.f32 %v2740_v14, %v2734_v31  ;;  %v9411_v40 = vpop.f32.mrf.mxu1 }
 0x3ba   : > { %v2691_v41 = vpop.f32.mrf.mxu0  ;;  %v2757_v16 = vmul.f32 0.1, %v2754_v33  ;;  %v8809_v40 = vld [vmem:[%s11866_s29 + $0xc] sm:$0xf] }
 0x3bb   : > { %v2755_v35 = vmul.f32 0.1, %v2752_v37  ;;  %v2753_v42 = vadd.f32 %v2750_v27, %v2743_v39  ;;  %v8805_v27 = vld [vmem:[%s11866_s29 + $0x8] sm:$0xf] }
 0x3bc   : > { %v2760_v38 = vmax.f32 %v2754_v33, %v2757_v16 }
 0x3bd   : > { %v2756_v28 = vmul.f32 0.1, %v2753_v42  ;;  %v2758_v36 = vmax.f32 %v2752_v37, %v2755_v35 }
 0x3be   : > { %v2763_v47 = vmul.f32 %v2760_v38, %v10495_v23 }
 0x3bf   : > { %v2761_v43 = vmul.f32 %v2758_v36, %v10490_v15  ;;  %v2759_v45 = vmax.f32 %v2753_v42, %v2756_v28 }
 0x3c1   : > { %2767 = vrot.lane.b32.xlu0 %v2761_v43, %s11863_s19  ;;  %v2762_v44 = vmul.f32 %v2759_v45, %v10492_v19  ;;  %v8813_v43 = vld [vmem:[%s11866_s29 + $0x10] sm:$0xf] }
 0x3c3   : > { %2769 = vrot.lane.b32.xlu1 %v2762_v44, %s11863_s19 }
 0x3c5   : > { %2771 = vrot.lane.b32.xlu0 %v2763_v47, %s11863_s19 }
 0x433   : > { %v2768_v48 = vpop.permute.xlu0 %2767 }
 0x434   : > { %2778 = vst.msk [vmem:[#allocation3] sm:$0xff] %vm1781_vm13, %v2768_v48 }
 0x435   : > { %v2770_v50 = vpop.permute.xlu1 %2769 }
 0x436   : > { %v2773_v52 = vsel %vm1775_vm14, %v2768_v48, %v2770_v50 }
 0x437   : > { %v2785_v53 = vpack.c.bf16 %v2773_v52, %v2773_v52  ;;  %v2772_v54 = vpop.permute.xlu0 %2771 }
 0x438   : > { %v2774_v55 = vsel %vm1775_vm14, %v2770_v50, %v2772_v54 }
 0x439   : > { %2780 = vst.msk [vmem:[#allocation3 + $0x10] sm:$0xff] %vm1784_vm15, %v2774_v55  ;;  %2795 = vrot.lane.b32.xlu0 %v2785_v53, %s11864_s27 }
 0x43b   : > { %v2781_v59 = vld [vmem:[#allocation3] sm:$0xff] }
 0x43c   : > { %v2784_v0 = vpack.c.bf16 %v2781_v59, %v2781_v59 }
 0x43e   : > { %2793 = vrot.lane.b32.xlu1 %v2784_v0, %s11864_s27  ;;  %2989 = vrot.lane.b32.xlu0 %v2784_v0, %s11854_s4  ;;  %v2898_v11 = vsel %vm1810_vm1, %v2784_v0, 0 }
 0x440   : > { %v2783_v62 = vld [vmem:[#allocation3 + $0x10] sm:$0xff] }
 0x441   : > { %v2786_v63 = vpack.c.bf16 %v2783_v62, %v2783_v62 }
 0x443   : > { %2797 = vrot.lane.b32.xlu1 %v2786_v63, %s11864_s27  ;;  %2993 = vrot.lane.b32.xlu0 %v2786_v63, %s11854_s4  ;;  %v2904_v3 = vsel %vm1810_vm1, %v2786_v63, 0 }
 0x447   : > { %2991 = vrot.lane.b32.xlu1 %v2785_v53, %s11854_s4  ;;  %3097 = vrot.lane.b32.xlu0 %v2785_v53, %s11855_s1 }
 0x44b   : > { %3095 = vrot.lane.b32.xlu1 %v2784_v0, %s11855_s1  ;;  %3201 = vrot.lane.b32.xlu0 %v2784_v0, %s11856_s0 }
 0x44f   : > { %3099 = vrot.lane.b32.xlu1 %v2786_v63, %s11855_s1  ;;  %3205 = vrot.lane.b32.xlu0 %v2786_v63, %s11856_s0 }
 0x453   : > { %3203 = vrot.lane.b32.xlu1 %v2785_v53, %s11856_s0  ;;  %3309 = vrot.lane.b32.xlu0 %v2785_v53, %s11857_s8  ;;  %s10072_s0 = smov 18  }
 0x457   : > { %3307 = vrot.lane.b32.xlu1 %v2784_v0, %s11857_s8  ;;  %3413 = vrot.lane.b32.xlu0 %v2784_v0, %s11858_s30 }
 0x45b   : > { %3311 = vrot.lane.b32.xlu1 %v2786_v63, %s11857_s8  ;;  %3417 = vrot.lane.b32.xlu0 %v2786_v63, %s11858_s30 }
 0x45f   : > { %3415 = vrot.lane.b32.xlu1 %v2785_v53, %s11858_s30  ;;  %3521 = vrot.lane.b32.xlu0 %v2785_v53, %s10066_s7 }
 0x463   : > { %3519 = vrot.lane.b32.xlu1 %v2784_v0, %s10066_s7  ;;  %3625 = vrot.lane.b32.xlu0 %v2784_v0, %s11859_s2 }
 0x467   : > { %3523 = vrot.lane.b32.xlu1 %v2786_v63, %s10066_s7  ;;  %3629 = vrot.lane.b32.xlu0 %v2786_v63, %s11859_s2  ;;  %s10074_s7 = smov 74  }
 0x46b   : > { %3627 = vrot.lane.b32.xlu1 %v2785_v53, %s11859_s2  ;;  %3742 = vperm.xlu0 %9946, %v8833_v1   ;;  %v8821_v1 = vld [vmem:[%s11866_s29 + $0x18] sm:$0xf] }
 0x46f   : > { %3732 = vperm.xlu1 %9947, %v3729_v4  }
 0x4ab   : > { %v2796_v7 = vpop.permute.xlu0 %2795 }
 0x4b0   : > { %v2794_v8 = vpop.permute.xlu1 %2793  ;;  %v2990_v9 = vpop.permute.xlu0 %2989 }
 0x4b1   : > { %v2799_v46 = vsel %vm779_vm3, %v2794_v8, %v2796_v7 }
 0x4b2   : > { %v2805_v10 = vsel %vm1810_vm1, %v2799_v46, 0 }
 0x4b5   : > { %v2798_v57 = vpop.permute.xlu1 %2797  ;;  %v2994_v49 = vpop.permute.xlu0 %2993 }
 0x4b6   : > { %v2800_v58 = vsel %vm779_vm3, %v2796_v7, %v2798_v57  ;;  %v2811_v2 = vsel %vm1810_vm1, %v2798_v57, 0  ;;  %v3007_v21 = vsel %vm1810_vm1, %v2994_v49, 0 }
 0x4b7   : > { %8799 = vmatprep.subr.msk.bf16.mxu0 %vm1810_vm1, %v2800_v58  ;;  %9413 = vmatpush3.bf16.msra.mxu1 %v2811_v2 }
 0x4b8   : > { %2828 = vmatpush1.bf16.msra.mxu0 %v2805_v10  ;;  %9418 = vmatprep.subr.bf16.mxu1 %v10565_v61 }
 0x4b9   : > { %v2992_v60 = vpop.permute.xlu1 %2991  ;;  %8802 = vmatprep.subr.msk.bf16.mxu0 %vm1810_vm1, %v2785_v53  ;;  %v3098_v13 = vpop.permute.xlu0 %3097  ;;  %v8817_v53 = vld [vmem:[%s11866_s29 + $0x14] sm:$0xf] }
 0x4ba   : > { %9415 = vmatmul.mubr.msk.bf16.vlgmr.msra.gmra.mxu1 %vm1806_vm2, %v8798_v51  ;;  %v2996_v5 = vsel %vm981_vm4, %v2992_v60, %v2994_v49  ;;  %v2995_v18 = vsel %vm981_vm4, %v2990_v9, %v2992_v60  ;;  %v8825_v49 = vld [vmem:[%s11866_s29 + $0x1c] sm:$0xf] }
 0x4bb   : > { %8800 = vmatmul.mubr.msk.bf16.vlgmr.msra.gmra.mxu0 %vm1806_vm2, %v8798_v51  ;;  %9419 = vmatpush3.bf16.msra.mxu1 %v2904_v3  ;;  %v3001_v24 = vsel %vm1810_vm1, %v2995_v18, 0  ;;  %v8829_v51 = vld [vmem:[%s11866_s29 + $0x20] sm:$0xf]  ;;  %s10096_s29 = smov 17  }
 0x4bc   : > { %2921 = vmatpush1.bf16.msra.mxu0 %v2898_v11  ;;  %9420 = vmatprep.mubr.msk.bf16.mxu1 %vm10058_vm0, %v10565_v61 }
 0x4bd   : > { %v3096_v12 = vpop.permute.xlu1 %3095  ;;  %8806 = vmatprep.subr.msk.bf16.mxu0 %vm1810_vm1, %v2996_v5  ;;  %9424 = vmatprep.subr.bf16.mxu1 %v10565_v61  ;;  %v3202_v14 = vpop.permute.xlu0 %3201 }
 0x4be   : > { %2938 = vmatprep.mubr.bf16.mxu0 %v10060_v6  ;;  %v3101_v29 = vsel %vm1088_vm6, %v3096_v12, %v3098_v13 }
 0x4bf   : > { %v3107_v33 = vsel %vm1810_vm1, %v3101_v29, 0 }
 0x4c1   : > { %v3100_v20 = vpop.permute.xlu1 %3099  ;;  %v3206_v26 = vpop.permute.xlu0 %3205 }
 0x4c2   : > { %9421 = vmatmul.mubr.msk.bf16.vlgmr.msra.gmra.mxu1 %vm1806_vm2, %v2787_v17  ;;  %v3102_v22 = vsel %vm1088_vm6, %v3098_v13, %v3100_v20  ;;  %v3113_v32 = vsel %vm1810_vm1, %v3100_v20, 0  ;;  %v3219_v16 = vsel %vm1810_vm1, %v3206_v26, 0 }
 0x4c3   : > { %9425 = vmatpush3.bf16.msra.mxu1 %v3007_v21  ;;  %8803 = vmatmul.mubr.msk.bf16.vlgmr.msra.gmra.mxu0 %vm1806_vm2, %v2787_v17 }
 0x4c4   : > { %3024 = vmatpush1.bf16.msra.mxu0 %v3001_v24  ;;  %9426 = vmatprep.mubr.msk.bf16.mxu1 %vm10058_vm0, %v10565_v61 }
 0x4c5   : > { %8810 = vmatprep.subr.msk.bf16.mxu0 %vm1810_vm1, %v3102_v22  ;;  %v3204_v25 = vpop.permute.xlu1 %3203  ;;  %9430 = vmatprep.subr.bf16.mxu1 %v10565_v61  ;;  %v3310_v37 = vpop.permute.xlu0 %3309 }
 0x4c6   : > { %3041 = vmatprep.mubr.bf16.mxu0 %v10060_v6  ;;  %v3208_v34 = vsel %vm1195_vm7, %v3204_v25, %v3206_v26  ;;  %v3207_v41 = vsel %vm1195_vm7, %v3202_v14, %v3204_v25  ;;  %vm3804_vm7 = vcmask 130048  }
 0x4c7   : > { %v3213_v42 = vsel %vm1810_vm1, %v3207_v41, 0 }
 0x4c9   : > { %v3308_v31 = vpop.permute.xlu1 %3307  ;;  %v3414_v35 = vpop.permute.xlu0 %3413 }
 0x4ca   : > { %9427 = vmatmul.mubr.msk.bf16.vlgmr.msra.gmra.mxu1 %vm1806_vm2, %v8805_v27  ;;  %v3313_v45 = vsel %vm1302_vm8, %v3308_v31, %v3310_v37 }
 0x4cb   : > { %9431 = vmatpush3.bf16.msra.mxu1 %v3113_v32  ;;  %8807 = vmatmul.mubr.msk.bf16.vlgmr.msra.gmra.mxu0 %vm1806_vm2, %v8805_v27  ;;  %v3319_v48 = vsel %vm1810_vm1, %v3313_v45, 0 }
 0x4cc   : > { %3130 = vmatpush1.bf16.msra.mxu0 %v3107_v33  ;;  %9432 = vmatprep.mubr.msk.bf16.mxu1 %vm10058_vm0, %v10565_v61 }
 0x4cd   : > { %8814 = vmatprep.subr.msk.bf16.mxu0 %vm1810_vm1, %v3208_v34  ;;  %9436 = vmatprep.subr.bf16.mxu1 %v10565_v61  ;;  %v3312_v39 = vpop.permute.xlu1 %3311  ;;  %v3418_v38 = vpop.permute.xlu0 %3417 }
 0x4ce   : > { %3147 = vmatprep.mubr.bf16.mxu0 %v10060_v6  ;;  %v3314_v28 = vsel %vm1302_vm8, %v3310_v37, %v3312_v39  ;;  %v3325_v44 = vsel %vm1810_vm1, %v3312_v39, 0  ;;  %v3431_v59 = vsel %vm1810_vm1, %v3418_v38, 0  ;;  %vm4729_vm8 = vcmask 15360  }
 0x4d1   : > { %v3416_v36 = vpop.permute.xlu1 %3415  ;;  %v3522_v52 = vpop.permute.xlu0 %3521 }
 0x4d2   : > { %9433 = vmatmul.mubr.msk.bf16.vlgmr.msra.gmra.mxu1 %vm1806_vm2, %v8809_v40  ;;  %v3420_v50 = vsel %vm1409_vm9, %v3416_v36, %v3418_v38  ;;  %v3419_v54 = vsel %vm1409_vm9, %v3414_v35, %v3416_v36  ;;  %vm743_vm9 = vcmask 998400  }
 0x4d3   : > { %9437 = vmatpush3.bf16.msra.mxu1 %v3219_v16  ;;  %8811 = vmatmul.mubr.msk.bf16.vlgmr.msra.gmra.mxu0 %vm1806_vm2, %v8809_v40  ;;  %v3425_v0 = vsel %vm1810_vm1, %v3419_v54, 0  ;;  %744 = vst.msk [vmem:[#allocation4] sm:$0xff] %vm743_vm9, %v10565_v61  ;;  %745 = vst.msk [vmem:[#allocation4 + $0x8] sm:$0xff] %vm743_vm9, %v10565_v61 }
 0x4d4   : > { %3236 = vmatpush1.bf16.msra.mxu0 %v3213_v42  ;;  %9438 = vmatprep.mubr.msk.bf16.mxu1 %vm10058_vm0, %v10565_v61  ;;  %746 = vst.msk [vmem:[#allocation5] sm:$0xff] %vm743_vm9, %v10565_v61  ;;  %747 = vst.msk [vmem:[#allocation5 + $0x8] sm:$0xff] %vm743_vm9, %v10565_v61  ;;  %vm7395_vm9 = vcmask 171144  }
 0x4d5   : > { %8818 = vmatprep.subr.msk.bf16.mxu0 %vm1810_vm1, %v3314_v28  ;;  %9442 = vmatprep.subr.bf16.mxu1 %v10565_v61  ;;  %v3520_v47 = vpop.permute.xlu1 %3519  ;;  %v3626_v63 = vpop.permute.xlu0 %3625 }
 0x4d6   : > { %3253 = vmatprep.mubr.bf16.mxu0 %v10060_v6  ;;  %v3525_v4 = vsel %vm1516_vm10, %v3520_v47, %v3522_v52 }
 0x4d7   : > { %v3531_v46 = vsel %vm1810_vm1, %v3525_v4, 0 }
 0x4d9   : > { %v3524_v55 = vpop.permute.xlu1 %3523  ;;  %v3630_v9 = vpop.permute.xlu0 %3629 }
 0x4da   : > { %9439 = vmatmul.mubr.msk.bf16.vlgmr.msra.gmra.mxu1 %vm1806_vm2, %v8813_v43  ;;  %v3526_v62 = vsel %vm1516_vm10, %v3522_v52, %v3524_v55  ;;  %v3537_v8 = vsel %vm1810_vm1, %v3524_v55, 0  ;;  %v3643_v2 = vsel %vm1810_vm1, %v3630_v9, 0  ;;  %vm3952_vm10 = vcmask 244912  }
 0x4db   : > { %9443 = vmatpush3.bf16.msra.mxu1 %v3325_v44  ;;  %8815 = vmatmul.mubr.msk.bf16.vlgmr.msra.gmra.mxu0 %vm1806_vm2, %v8813_v43 }
 0x4dc   : > { %3342 = vmatpush1.bf16.msra.mxu0 %v3319_v48  ;;  %9444 = vmatprep.mubr.msk.bf16.mxu1 %vm10058_vm0, %v10565_v61 }
 0x4dd   : > { %8822 = vmatprep.subr.msk.bf16.mxu0 %vm1810_vm1, %v3420_v50  ;;  %9448 = vmatprep.subr.bf16.mxu1 %v10565_v61  ;;  %v3628_v7 = vpop.permute.xlu1 %3627 }
 0x4de   : > { %3359 = vmatprep.mubr.bf16.mxu0 %v10060_v6  ;;  %v3632_v57 = vsel %vm1623_vm11, %v3628_v7, %v3630_v9  ;;  %v3631_v58 = vsel %vm1623_vm11, %v3626_v63, %v3628_v7  ;;  %vm4103_vm11 = vcmask 326912  }
 0x4df   : > { %v3637_v10 = vsel %vm1810_vm1, %v3631_v58, 0 }
 0x4e2   : > { %9445 = vmatmul.mubr.msk.bf16.vlgmr.msra.gmra.mxu1 %vm1806_vm2, %v8817_v53 }
 0x4e3   : > { %9449 = vmatpush3.bf16.msra.mxu1 %v3431_v59  ;;  %8819 = vmatmul.mubr.msk.bf16.vlgmr.msra.gmra.mxu0 %vm1806_vm2, %v8817_v53 }
 0x4e4   : > { %3448 = vmatpush1.bf16.msra.mxu0 %v3425_v0  ;;  %9450 = vmatprep.mubr.msk.bf16.mxu1 %vm10058_vm0, %v10565_v61 }
 0x4e5   : > { %8826 = vmatprep.subr.msk.bf16.mxu0 %vm1810_vm1, %v3526_v62  ;;  %9454 = vmatprep.subr.bf16.mxu1 %v10565_v61 }
 0x4e6   : > { %3465 = vmatprep.mubr.bf16.mxu0 %v10060_v6 }
 0x4ea   : > { %9451 = vmatmul.mubr.msk.bf16.vlgmr.msra.gmra.mxu1 %vm1806_vm2, %v8821_v1 }
 0x4eb   : > { %9455 = vmatpush3.bf16.msra.mxu1 %v3537_v8  ;;  %8823 = vmatmul.mubr.msk.bf16.vlgmr.msra.gmra.mxu0 %vm1806_vm2, %v8821_v1 }
 0x4ec   : > { %3554 = vmatpush1.bf16.msra.mxu0 %v3531_v46  ;;  %9456 = vmatprep.mubr.msk.bf16.mxu1 %vm10058_vm0, %v10565_v61 }
 0x4ed   : > { %8830 = vmatprep.subr.msk.bf16.mxu0 %vm1810_vm1, %v3632_v57  ;;  %9460 = vmatprep.subr.bf16.mxu1 %v10565_v61  ;;  %vm4878_vm1 = vcmask 736912  }
 0x4ee   : > { %3571 = vmatprep.mubr.bf16.mxu0 %v10060_v6 }
 0x4f2   : > { %9457 = vmatmul.mubr.msk.bf16.vlgmr.msra.gmra.mxu1 %vm1806_vm2, %v8825_v49 }
 0x4f3   : > { %9461 = vmatpush3.bf16.msra.mxu1 %v3643_v2  ;;  %8827 = vmatmul.mubr.msk.bf16.vlgmr.msra.gmra.mxu0 %vm1806_vm2, %v8825_v49 }
 0x4f4   : > { %3660 = vmatpush1.bf16.msra.mxu0 %v3637_v10  ;;  %9462 = vmatprep.mubr.msk.bf16.mxu1 %vm10058_vm0, %v10565_v61 }
 0x4f5   : > { %3677 = vmatprep.mubr.bf16.mxu0 %v10060_v6  ;;  %9466 = vmatprep.subr.mxu0 %v10565_v61 }
 0x4f6   : > { %9473 = vmatprep.subr.mxu1 %v10565_v61 }
 0x4fa   : > { %9463 = vmatmul.mubr.msk.bf16.vlgmr.msra.gmra.mxu1 %vm1806_vm2, %v8829_v51 }
 0x4fb   : > { %8831 = vmatmul.mubr.msk.bf16.vlgmr.msra.gmra.mxu0 %vm1806_vm2, %v8829_v51  ;;  %9477 = vmatprep.mubr.msk.f32.mxu1 %vm10058_vm0, %v10565_v61 }
 0x4fc   : > { %9470 = vmatprep.mubr.msk.f32.mxu0 %vm10058_vm0, %v10565_v61 }
 0x57a   : > { %v2888_v60 = vpop.f32.mrf.mxu1 }
 0x57b   : > { %v2847_v6 = vpop.f32.mrf.mxu0 }
 0x57c   : > { %v9416_v3 = vpop.f32.mrf.mxu1 }
 0x57d   : > { %v2849_v11 = vpop.f32.mrf.mxu0 }
 0x57e   : > { %v2891_v13 = vpop.f32.mrf.mxu1 }
 0x57f   : > { %v2851_v5 = vpop.f32.mrf.mxu0 }
 0x580   : > { %v9417_v12 = vpop.f32.mrf.mxu1 }
 0x581   : > { %v2852_v17 = vpop.f32.mrf.mxu0 }
 0x582   : > { %v2981_v18 = vpop.f32.mrf.mxu1 }
 0x583   : > { %v2940_v20 = vpop.f32.mrf.mxu0  ;;  %v2982_v4 = vadd.f32 %v2981_v18, %v2888_v60 }
 0x584   : > { %v9422_v14 = vpop.f32.mrf.mxu1  ;;  %v2941_v58 = vadd.f32 %v2940_v20, %v2847_v6 }
 0x585   : > { %v2942_v21 = vpop.f32.mrf.mxu0 }
 0x586   : > { %v2984_v22 = vpop.f32.mrf.mxu1  ;;  %v2943_v51 = vadd.f32 %v2942_v21, %v2849_v11 }
 0x587   : > { %v2944_v24 = vpop.f32.mrf.mxu0 }
 0x588   : > { %v9423_v25 = vpop.f32.mrf.mxu1 }
 0x589   : > { %v2945_v26 = vpop.f32.mrf.mxu0 }
 0x58a   : > { %v3084_v27 = vpop.f32.mrf.mxu1 }
 0x58b   : > { %v3043_v29 = vpop.f32.mrf.mxu0  ;;  %v3092_v57 = vadd.f32 %v3084_v27, %v2982_v4 }
 0x58c   : > { %v9428_v31 = vpop.f32.mrf.mxu1  ;;  %v3090_v3 = vadd.f32 %v3043_v29, %v2941_v58 }
 0x58d   : > { %v3045_v32 = vpop.f32.mrf.mxu0 }
 0x58e   : > { %v3087_v33 = vpop.f32.mrf.mxu1  ;;  %v3091_v17 = vadd.f32 %v3045_v32, %v2943_v51 }
 0x58f   : > { %v3047_v34 = vpop.f32.mrf.mxu0 }
 0x590   : > { %v9429_v37 = vpop.f32.mrf.mxu1 }
 0x591   : > { %v3048_v39 = vpop.f32.mrf.mxu0 }
 0x592   : > { %v3190_v40 = vpop.f32.mrf.mxu1 }
 0x593   : > { %v3149_v41 = vpop.f32.mrf.mxu0  ;;  %v3198_v5 = vadd.f32 %v3190_v40, %v3092_v57 }
 0x594   : > { %v9434_v16 = vpop.f32.mrf.mxu1  ;;  %v3196_v14 = vadd.f32 %v3149_v41, %v3090_v3 }
 0x595   : > { %v3151_v35 = vpop.f32.mrf.mxu0 }
 0x596   : > { %v3193_v42 = vpop.f32.mrf.mxu1  ;;  %v3197_v60 = vadd.f32 %v3151_v35, %v3091_v17  ;;  %v3733_v35 = vpop.permute.xlu1 %3732 }
 0x597   : > { %v3153_v28 = vpop.f32.mrf.mxu0 }
 0x598   : > { %v9435_v36 = vpop.f32.mrf.mxu1 }
 0x599   : > { %v3154_v43 = vpop.f32.mrf.mxu0 }
 0x59a   : > { %v3296_v45 = vpop.f32.mrf.mxu1 }
 0x59b   : > { %v3255_v38 = vpop.f32.mrf.mxu0  ;;  %v3304_v24 = vadd.f32 %v3296_v45, %v3198_v5  ;;  %v3781_v5 = vand.u32 127, %v1748_v30 }
 0x59c   : > { %v9440_v44 = vpop.f32.mrf.mxu1  ;;  %v3302_v18 = vadd.f32 %v3255_v38, %v3196_v14 }
 0x59d   : > { %v3257_v47 = vpop.f32.mrf.mxu0 }
 0x59e   : > { %v3299_v48 = vpop.f32.mrf.mxu1  ;;  %v3303_v27 = vadd.f32 %v3257_v47, %v3197_v60  ;;  %v3743_v47 = vpop.permute.xlu0 %3742 }
 0x59f   : > { %v3259_v50 = vpop.f32.mrf.mxu0 }
 0x5a0   : > { %v9441_v52 = vpop.f32.mrf.mxu1 }
 0x5a1   : > { %v3260_v53 = vpop.f32.mrf.mxu0 }
 0x5a2   : > { %v3402_v54 = vpop.f32.mrf.mxu1 }
 0x5a3   : > { %v3361_v55 = vpop.f32.mrf.mxu0  ;;  %v3410_v31 = vadd.f32 %v3402_v54, %v3304_v24  ;;  %v10070_v24 = vmov 1.0  }
 0x5a4   : > { %v9446_v59 = vpop.f32.mrf.mxu1  ;;  %v3408_v34 = vadd.f32 %v3361_v55, %v3302_v18 }
 0x5a5   : > { %v3363_v0 = vpop.f32.mrf.mxu0 }
 0x5a6   : > { %v3405_v62 = vpop.f32.mrf.mxu1  ;;  %v3409_v11 = vadd.f32 %v3363_v0, %v3303_v27 }
 0x5a7   : > { %v3365_v63 = vpop.f32.mrf.mxu0 }
 0x5a8   : > { %v9447_v1 = vpop.f32.mrf.mxu1 }
 0x5a9   : > { %v3366_v7 = vpop.f32.mrf.mxu0 }
 0x5aa   : > { %v3508_v8 = vpop.f32.mrf.mxu1 }
 0x5ab   : > { %v3467_v9 = vpop.f32.mrf.mxu0  ;;  %v3516_v20 = vadd.f32 %v3508_v8, %v3410_v31 }
 0x5ac   : > { %v9452_v46 = vpop.f32.mrf.mxu1  ;;  %v3514_v21 = vadd.f32 %v3467_v9, %v3408_v34 }
 0x5ad   : > { %v3469_v49 = vpop.f32.mrf.mxu0 }
 0x5ae   : > { %v3511_v2 = vpop.f32.mrf.mxu1  ;;  %v3515_v32 = vadd.f32 %v3469_v49, %v3409_v11 }
 0x5af   : > { %v3471_v10 = vpop.f32.mrf.mxu0 }
 0x5b0   : > { %v9453_v13 = vpop.f32.mrf.mxu1 }
 0x5b1   : > { %v3472_v12 = vpop.f32.mrf.mxu0 }
 0x5b2   : > { %v3614_v22 = vpop.f32.mrf.mxu1  ;;  %v3782_v12 = vmul.u32 2, %v3781_v5 }
 0x5b3   : > { %v3573_v25 = vpop.f32.mrf.mxu0  ;;  %v3622_v39 = vadd.f32 %v3614_v22, %v3516_v20 }
 0x5b4   : > { %v9458_v26 = vpop.f32.mrf.mxu1  ;;  %v3620_v41 = vadd.f32 %v3573_v25, %v3514_v21  ;;  %vm10844_vm3 = vcmp.eq.s32.totalorder %v10480_v56, %v3782_v12  ;;  %v3789_v22 = vadd.s32 1, %v3782_v12 }
 0x5b5   : > { %v3575_v33 = vpop.f32.mrf.mxu0 }
 0x5b6   : > { %v3617_v6 = vpop.f32.mrf.mxu1  ;;  %v3621_v36 = vadd.f32 %v3575_v33, %v3515_v32  ;;  %vm10856_vm5 = vcmp.eq.s32.totalorder %v10480_v56, %v3789_v22 }
 0x5b7   : > { %v3577_v37 = vpop.f32.mrf.mxu0 }
 0x5b8   : > { %v9459_v29 = vpop.f32.mrf.mxu1 }
 0x5b9   : > { %v3578_v40 = vpop.f32.mrf.mxu0 }
 0x5ba   : > { %v3720_v16 = vpop.f32.mrf.mxu1 }
 0x5bb   : > { %v3728_v42 = vadd.f32 %v3720_v16, %v3622_v39  ;;  %v3679_v28 = vpop.f32.mrf.mxu0 }
 0x5bc   : > { %v3726_v43 = vadd.f32 %v3679_v28, %v3620_v41  ;;  %v9464_v45 = vpop.f32.mrf.mxu1 }
 0x5bd   : > { %v3737_v38 = vmul.f32 %v3733_v35, %v3728_v42  ;;  %v3681_v44 = vpop.f32.mrf.mxu0 }
 0x5be   : > { %v3735_v48 = vmul.f32 %v3733_v35, %v3726_v43  ;;  %v3727_v50 = vadd.f32 %v3681_v44, %v3621_v36  ;;  %v3723_v52 = vpop.f32.mrf.mxu1 }
 0x5bf   : > { %v3747_v53 = vadd.f32 %v3743_v47, %v3737_v38  ;;  %v3683_v54 = vpop.f32.mrf.mxu0 }
 0x5c0   : > { %v3745_v55 = vadd.f32 %v3743_v47, %v3735_v48  ;;  %v3736_v59 = vmul.f32 %v3733_v35, %v3727_v50  ;;  %v9465_v0 = vpop.f32.mrf.mxu1 }
 0x5c1   : > { %v3684_v62 = vpop.f32.mrf.mxu0  ;;  %v3750_v63 = vmul.f32 0.1, %v3747_v53 }
 0x5c2   : > { %v3748_v1 = vmul.f32 0.1, %v3745_v55  ;;  %v3746_v4 = vadd.f32 %v3743_v47, %v3736_v59 }
 0x5c3   : > { %v3753_v57 = vmax.f32 %v3747_v53, %v3750_v63 }
 0x5c4   : > { %v3749_v7 = vmul.f32 0.1, %v3746_v4  ;;  %v3751_v8 = vmax.f32 %v3745_v55, %v3748_v1 }
 0x5c5   : > { %v3756_v58 = vmul.f32 %v3753_v57, %v10495_v23  ;;  %v3779_v23 = vadd.s32 8, %v10480_v56 }
 0x5c6   : > { %v3754_v9 = vmul.f32 %v3751_v8, %v10490_v15  ;;  %v3752_v46 = vmax.f32 %v3746_v4, %v3749_v7 }
 0x5c7   : > { %vm10848_vm4 = vcmp.eq.s32.totalorder %v3779_v23, %v3782_v12  ;;  %vm10860_vm6 = vcmp.eq.s32.totalorder %v3779_v23, %v3789_v22 }
 0x5c8   : > { %3760 = vrot.lane.b32.xlu1 %v3754_v9, %s11863_s19  ;;  %v3755_v49 = vmul.f32 %v3752_v46, %v10492_v19  ;;  %9467 = vmatpush3.msk.msra.mxu0 %vm10848_vm4, %v10070_v24 }
 0x5c9   : > { %9468 = vmatprep.subr.mxu0 %v10565_v61  ;;  %9474 = vmatpush3.msk.msra.mxu1 %vm10860_vm6, %v10070_v24 }
 0x5ca   : > { %3762 = vrot.lane.b32.xlu0 %v3755_v49, %s11863_s19  ;;  %9469 = vmatpush3.msk.msra.mxu0 %vm10844_vm3, %v10070_v24 }
 0x5cb   : > { %9475 = vmatprep.subr.mxu1 %v10565_v61  ;;  %9480 = vmatprep.subr.mxu0 %v10565_v61 }
 0x5cc   : > { %3764 = vrot.lane.b32.xlu1 %v3756_v58, %s11863_s19  ;;  %9476 = vmatpush3.msk.msra.mxu1 %vm10856_vm5, %v10070_v24  ;;  %s10071_s19 = smov 54  }
 0x5cd   : > { %9487 = vmatprep.subr.mxu1 %v10565_v61 }
 0x63a   : > { %v3761_v2 = vpop.permute.xlu1 %3760 }
 0x63b   : > { %3771 = vst.msk [vmem:[#allocation2] sm:$0xff] %vm1781_vm13, %v3761_v2  ;;  %vm4413_vm13 = vcmask 490912  }
 0x63c   : > { %v3763_v10 = vpop.permute.xlu0 %3762 }
 0x63d   : > { %v3766_v51 = vsel %vm1775_vm14, %v3761_v2, %v3763_v10 }
 0x63e   : > { %v3765_v3 = vpop.permute.xlu1 %3764  ;;  %4106 = vrot.lane.b32.xlu1 %v3766_v51, %s11855_s1 }
 0x63f   : > { %v3767_v15 = vsel %vm1775_vm14, %v3763_v10, %v3765_v3  ;;  %vm4564_vm14 = vcmask 572912  }
 0x640   : > { %3773 = vst.msk [vmem:[#allocation2 + $0x10] sm:$0xff] %vm1784_vm15, %v3767_v15  ;;  %vm4715_vm15 = vcmask 654912  }
 0x642   : > { %v3774_v19 = vld [vmem:[#allocation2] sm:$0xff] }
 0x643   : > { %3797 = vrot.lane.b32.xlu0 %v3774_v19, %s11855_s1 }
 0x647   : > { %v3776_v13 = vld [vmem:[#allocation2 + $0x10] sm:$0xff] }
 0x648   : > { %4718 = vrot.lane.b32.xlu0 %v3776_v13, %s11855_s1 }
 0x6b0   : > { %v4107_v18 = vpop.permute.xlu1 %4106 }
 0x6b1   : > { %v4109_v26 = vmax.f32 %v3774_v19, %v4107_v18  ;;  %v4262_v31 = vmax.f32 %v3766_v51, %v4107_v18 }
 0x6b5   : > { %v3798_v56 = vpop.permute.xlu0 %3797 }
 0x6b6   : > { %v3800_v60 = vmax.f32 %v3774_v19, %v3798_v56 }
 0x6b8   : > { %3802 = vrot.lane.b32.xlu1 %v3800_v60, %s11859_s2  ;;  %3954 = vrot.lane.b32.xlu0 %v3800_v60, %s10071_s19  ;;  %s10078_s2 = smov 32   ;;  %s10080_s19 = smov 52  }
 0x6ba   : > { %v4719_v33 = vpop.permute.xlu0 %4718 }
 0x6bb   : > { %v4721_v27 = vmax.f32 %v3766_v51, %v4719_v33  ;;  %v4722_v34 = vmax.f32 %v3776_v13, %v4719_v33 }
 0x6bc   : > { %4264 = vrot.lane.b32.xlu0 %v4262_v31, %s11855_s1  ;;  %4111 = vrot.lane.b32.xlu1 %v4109_v26, %s10072_s0  ;;  %s10079_s1 = smov 42   ;;  %s10081_s0 = smov 62  }
 0x6c0   : > { %4566 = vrot.lane.b32.xlu0 %v4262_v31, %s10073_s10  ;;  %4415 = vrot.lane.b32.xlu1 %v4262_v31, %s10074_s7  ;;  %s10082_s10 = smov 72   ;;  %s10083_s7 = smov 82  }
 0x6c4   : > { %4727 = vrot.lane.b32.xlu0 %v4722_v34, %s10075_s11  ;;  %4725 = vrot.lane.b32.xlu1 %v4721_v27, %s10075_s11  ;;  %v5032_v27 = vld [vmem:[#allocation4 + $0x8] sm:$0xff]  ;;  %s11820_s11 = smov 11  }
 0x6c8   : > { %4880 = vrot.lane.b32.xlu1 %v4722_v34, %s10076_s12  ;;  %s10077_s12 = smov 22  }
 0x72a   : > { %v3803_v6 = vpop.permute.xlu1 %3802  ;;  %v3955_v20 = vpop.permute.xlu0 %3954 }
 0x72b   : > { %9471 = vmatmul.mubr.msk.f32.vlgmr.msra.gmra.mxu0 %vm3804_vm7, %v3803_v6  ;;  %9478 = vmatmul.mubr.msk.f32.vlgmr.msra.gmra.mxu1 %vm3804_vm7, %v3803_v6 }
 0x72c   : > { %9481 = vmatpush3.msk.msra.mxu0 %vm10848_vm4, %v10070_v24  ;;  %9488 = vmatpush3.msk.msra.mxu1 %vm10860_vm6, %v10070_v24 }
 0x72d   : > { %9482 = vmatprep.subr.mxu0 %v10565_v61  ;;  %9489 = vmatprep.subr.mxu1 %v10565_v61 }
 0x72e   : > { %9483 = vmatpush3.msk.msra.mxu0 %vm10844_vm3, %v10070_v24  ;;  %9484 = vmatprep.mubr.msk.f32.mxu0 %vm10058_vm0, %v10565_v61  ;;  %v4112_v37 = vpop.permute.xlu1 %4111  ;;  %v4265_v11 = vpop.permute.xlu0 %4264 }
 0x72f   : > { %9490 = vmatpush3.msk.msra.mxu1 %vm10856_vm5, %v10070_v24  ;;  %9491 = vmatprep.mubr.msk.f32.mxu1 %vm10058_vm0, %v10565_v61 }
 0x730   : > { %9485 = vmatmul.mubr.msk.f32.vlgmr.msra.gmra.mxu0 %vm3804_vm7, %v3955_v20  ;;  %9492 = vmatmul.mubr.msk.f32.vlgmr.msra.gmra.mxu1 %vm3804_vm7, %v3955_v20 }
 0x731   : > { %9494 = vmatprep.subr.mxu0 %v10565_v61  ;;  %9501 = vmatprep.subr.mxu1 %v10565_v61 }
 0x732   : > { %9495 = vmatpush3.msk.msra.mxu0 %vm10848_vm4, %v10070_v24  ;;  %9502 = vmatpush3.msk.msra.mxu1 %vm10860_vm6, %v10070_v24  ;;  %v4416_v21 = vpop.permute.xlu1 %4415  ;;  %v4567_v29 = vpop.permute.xlu0 %4566 }
 0x733   : > { %9496 = vmatprep.subr.mxu0 %v10565_v61  ;;  %9503 = vmatprep.subr.mxu1 %v10565_v61 }
 0x734   : > { %9497 = vmatpush3.msk.msra.mxu0 %vm10844_vm3, %v10070_v24  ;;  %9498 = vmatprep.mubr.msk.f32.mxu0 %vm10058_vm0, %v10565_v61 }
 0x735   : > { %9504 = vmatpush3.msk.msra.mxu1 %vm10856_vm5, %v10070_v24  ;;  %9505 = vmatprep.mubr.msk.f32.mxu1 %vm10058_vm0, %v10565_v61 }
 0x736   : > { %9499 = vmatmul.mubr.msk.f32.vlgmr.msra.gmra.mxu0 %vm3804_vm7, %v4112_v37  ;;  %9506 = vmatmul.mubr.msk.f32.vlgmr.msra.gmra.mxu1 %vm3804_vm7, %v4112_v37  ;;  %v4728_v39 = vpop.permute.xlu0 %4727  ;;  %v4726_v40 = vpop.permute.xlu1 %4725  ;;  %v5541_v37 = vld [vmem:[%s11876_s13 + $0x8] sm:$0xff] }
 0x737   : > { %9508 = vmatprep.subr.mxu0 %v10565_v61  ;;  %9515 = vmatprep.subr.mxu1 %v10565_v61  ;;  %v4730_v32 = vsel %vm4729_vm8, %v4726_v40, %v4728_v39  ;;  %vm7224_vm8 = vcmask 138344  }
 0x738   : > { %9509 = vmatpush3.msk.msra.mxu0 %vm10848_vm4, %v10070_v24  ;;  %9516 = vmatpush3.msk.msra.mxu1 %vm10860_vm6, %v10070_v24 }
 0x739   : > { %9510 = vmatprep.subr.mxu0 %v10565_v61  ;;  %9517 = vmatprep.subr.mxu1 %v10565_v61 }
 0x73a   : > { %9511 = vmatpush3.msk.msra.mxu0 %vm10844_vm3, %v10070_v24  ;;  %9512 = vmatprep.mubr.msk.f32.mxu0 %vm10058_vm0, %v10565_v61  ;;  %v4881_v41 = vpop.permute.xlu1 %4880 }
 0x73b   : > { %9518 = vmatpush3.msk.msra.mxu1 %vm10856_vm5, %v10070_v24  ;;  %9519 = vmatprep.mubr.msk.f32.mxu1 %vm10058_vm0, %v10565_v61 }
 0x73c   : > { %9513 = vmatmul.mubr.msk.f32.vlgmr.msra.gmra.mxu0 %vm3804_vm7, %v4265_v11  ;;  %9520 = vmatmul.mubr.msk.f32.vlgmr.msra.gmra.mxu1 %vm3804_vm7, %v4265_v11  ;;  %v5540_v11 = vld [vmem:[%s11876_s13] sm:$0xff] }
 0x73d   : > { %9522 = vmatprep.subr.mxu0 %v10565_v61  ;;  %9529 = vmatprep.subr.mxu1 %v10565_v61 }
 0x73e   : > { %9523 = vmatpush3.msk.msra.mxu0 %vm10848_vm4, %v10070_v24  ;;  %9530 = vmatpush3.msk.msra.mxu1 %vm10860_vm6, %v10070_v24 }
 0x73f   : > { %9524 = vmatprep.subr.mxu0 %v10565_v61  ;;  %9531 = vmatprep.subr.mxu1 %v10565_v61 }
 0x740   : > { %9525 = vmatpush3.msk.msra.mxu0 %vm10844_vm3, %v10070_v24  ;;  %9526 = vmatprep.mubr.msk.f32.mxu0 %vm10058_vm0, %v10565_v61 }
 0x741   : > { %9532 = vmatpush3.msk.msra.mxu1 %vm10856_vm5, %v10070_v24  ;;  %9533 = vmatprep.mubr.msk.f32.mxu1 %vm10058_vm0, %v10565_v61 }
 0x742   : > { %9527 = vmatmul.mubr.msk.f32.vlgmr.msra.gmra.mxu0 %vm3804_vm7, %v4416_v21  ;;  %9534 = vmatmul.mubr.msk.f32.vlgmr.msra.gmra.mxu1 %vm3804_vm7, %v4416_v21  ;;  %v8921_v21 = vld [vmem:[%s11876_s13 + $0x18] sm:$0xff] }
 0x743   : > { %9536 = vmatprep.subr.mxu0 %v10565_v61  ;;  %9543 = vmatprep.subr.mxu1 %v10565_v61 }
 0x744   : > { %9537 = vmatpush3.msk.msra.mxu0 %vm10848_vm4, %v10070_v24  ;;  %9544 = vmatpush3.msk.msra.mxu1 %vm10860_vm6, %v10070_v24 }
 0x745   : > { %9538 = vmatprep.subr.mxu0 %v10565_v61  ;;  %9545 = vmatprep.subr.mxu1 %v10565_v61 }
 0x746   : > { %9539 = vmatpush3.msk.msra.mxu0 %vm10844_vm3, %v10070_v24  ;;  %9540 = vmatprep.mubr.msk.f32.mxu0 %vm10058_vm0, %v10565_v61 }
 0x747   : > { %9546 = vmatpush3.msk.msra.mxu1 %vm10856_vm5, %v10070_v24  ;;  %9547 = vmatprep.mubr.msk.f32.mxu1 %vm10058_vm0, %v10565_v61 }
 0x748   : > { %9541 = vmatmul.mubr.msk.f32.vlgmr.msra.gmra.mxu0 %vm3804_vm7, %v4567_v29  ;;  %9548 = vmatmul.mubr.msk.f32.vlgmr.msra.gmra.mxu1 %vm3804_vm7, %v4567_v29  ;;  %v8920_v29 = vld [vmem:[%s11876_s13 + $0x10] sm:$0xff]  ;;  %s11885_s13 = smov 106  }
 0x749   : > { %9550 = vmatprep.subr.mxu0 %v10565_v61  ;;  %9557 = vmatprep.subr.mxu1 %v10565_v61 }
 0x74a   : > { %9551 = vmatpush3.msk.msra.mxu0 %vm10848_vm4, %v10070_v24  ;;  %9558 = vmatpush3.msk.msra.mxu1 %vm10860_vm6, %v10070_v24 }
 0x74b   : > { %9552 = vmatprep.subr.mxu0 %v10565_v61  ;;  %9559 = vmatprep.subr.mxu1 %v10565_v61 }
 0x74c   : > { %9553 = vmatpush3.msk.msra.mxu0 %vm10844_vm3, %v10070_v24  ;;  %9554 = vmatprep.mubr.msk.f32.mxu0 %vm10058_vm0, %v10565_v61 }
 0x74d   : > { %9560 = vmatpush3.msk.msra.mxu1 %vm10856_vm5, %v10070_v24  ;;  %9561 = vmatprep.mubr.msk.f32.mxu1 %vm10058_vm0, %v10565_v61 }
 0x74e   : > { %9555 = vmatmul.mubr.msk.f32.vlgmr.msra.gmra.mxu0 %vm3804_vm7, %v4730_v32  ;;  %9562 = vmatmul.mubr.msk.f32.vlgmr.msra.gmra.mxu1 %vm3804_vm7, %v4730_v32 }
 0x74f   : > { %9564 = vmatprep.subr.mxu0 %v10565_v61  ;;  %9571 = vmatprep.subr.mxu1 %v10565_v61 }
 0x750   : > { %9565 = vmatpush3.msk.msra.mxu0 %vm10848_vm4, %v10070_v24  ;;  %9572 = vmatpush3.msk.msra.mxu1 %vm10860_vm6, %v10070_v24  ;;  %vm5029_vm4 = vcmask 818912   ;;  %vm5589_vm6 = vcmask 908376  }
 0x751   : > { %9566 = vmatprep.subr.mxu0 %v10565_v61  ;;  %9573 = vmatprep.subr.mxu1 %v10565_v61 }
 0x752   : > { %9567 = vmatpush3.msk.msra.mxu0 %vm10844_vm3, %v10070_v24  ;;  %9568 = vmatprep.mubr.msk.f32.mxu0 %vm10058_vm0, %v10565_v61 }
 0x753   : > { %9574 = vmatpush3.msk.msra.mxu1 %vm10856_vm5, %v10070_v24  ;;  %9575 = vmatprep.mubr.msk.f32.mxu1 %vm10058_vm0, %v10565_v61 }
 0x754   : > { %9569 = vmatmul.mubr.msk.f32.vlgmr.msra.gmra.mxu0 %vm3804_vm7, %v4881_v41  ;;  %9576 = vmatmul.mubr.msk.f32.vlgmr.msra.gmra.mxu1 %vm3804_vm7, %v4881_v41 }
 0x755   : > { %9584 = vmatprep.subr.bf16.mxu1 %v10565_v61  ;;  %9586 = vmatprep.mubr.msk.bf16.mxu1 %vm10058_vm0, %v10565_v61 }
 0x756   : > { %9578 = vmatprep.subr.bf16.mxu0 %v10565_v61  ;;  %9580 = vmatprep.mubr.msk.bf16.mxu0 %vm10058_vm0, %v10565_v61 }
 0x7eb   : > { %v3873_v16 = vpop.f32.mrf.mxu0  ;;  %v3943_v42 = vpop.f32.mrf.mxu1 }
 0x7ec   : > { %v3947_v28 = vmax.f32 %v3873_v16, %v3943_v42 }
 0x7ed   : > { %v9472_v35 = vpop.f32.mrf.mxu0  ;;  %v9479_v36 = vpop.f32.mrf.mxu1 }
 0x7ee   : > { %3949 = vrot.lane.b32.xlu0 %v3947_v28, %s10077_s12  ;;  %s11875_s12 = sld [smem:[#allocation21_spill]] }
 0x7f0   : > { %v4024_v43 = vpop.f32.mrf.mxu0  ;;  %v4094_v45 = vpop.f32.mrf.mxu1 }
 0x7f1   : > { %v4098_v38 = vmax.f32 %v4024_v43, %v4094_v45 }
 0x7f2   : > { %v9486_v44 = vpop.f32.mrf.mxu0  ;;  %v9493_v47 = vpop.f32.mrf.mxu1 }
 0x7f3   : > { %4100 = vrot.lane.b32.xlu1 %v4098_v38, %s10078_s2  ;;  %s11812_s2 = smov 117  }
 0x7f4   : > { %v9949_v20 = vld [vmem:[%s11875_s12] sm:$0xff]   ;;  %v9950_v40 = vld [vmem:[%s11875_s12 + $0x8] sm:$0xff]   ;;  %v9951_v16 = vld [vmem:[%s11875_s12 + $0x18] sm:$0xff]  }
 0x7f5   : > { %v9952_v28 = vld [vmem:[%s11875_s12 + $0x10] sm:$0xff]   ;;  %v9953_v36 = vld [vmem:[%s11875_s12 + $0x28] sm:$0xff]   ;;  %v9954_v45 = vld [vmem:[%s11875_s12 + $0x20] sm:$0xff]  }
 0x7f6   : > { %v4181_v48 = vpop.f32.mrf.mxu0  ;;  %v4251_v50 = vpop.f32.mrf.mxu1  ;;  %v9956_v44 = vld [vmem:[%s11875_s12 + $0x38] sm:$0xff]   ;;  %v9955_v47 = vld [vmem:[%s11875_s12 + $0x30] sm:$0xff]  }
 0x7f7   : > { %v4255_v52 = vmax.f32 %v4181_v48, %v4251_v50  ;;  %v9957_v50 = vld [vmem:[%s11875_s12 + $0x40] sm:$0xff]  }
 0x7f8   : > { %v9500_v53 = vpop.f32.mrf.mxu0  ;;  %v9507_v54 = vpop.f32.mrf.mxu1 }
 0x7f9   : > { %4257 = vrot.lane.b32.xlu0 %v4255_v52, %s10079_s1  ;;  %s11810_s1 = smov 118  }
 0x7fc   : > { %v4334_v55 = vpop.f32.mrf.mxu0  ;;  %v4404_v59 = vpop.f32.mrf.mxu1 }
 0x7fd   : > { %v4408_v0 = vmax.f32 %v4334_v55, %v4404_v59 }
 0x7fe   : > { %v9514_v62 = vpop.f32.mrf.mxu0  ;;  %v9521_v63 = vpop.f32.mrf.mxu1 }
 0x7ff   : > { %4410 = vrot.lane.b32.xlu1 %v4408_v0, %s10080_s19  ;;  %s11815_s19 = smov 116  }
 0x802   : > { %v4485_v1 = vpop.f32.mrf.mxu0  ;;  %v4555_v4 = vpop.f32.mrf.mxu1 }
 0x803   : > { %v4559_v7 = vmax.f32 %v4485_v1, %v4555_v4 }
 0x804   : > { %v9528_v8 = vpop.f32.mrf.mxu0  ;;  %v9535_v9 = vpop.f32.mrf.mxu1 }
 0x805   : > { %4561 = vrot.lane.b32.xlu0 %v4559_v7, %s10081_s0  ;;  %s11824_s0 = smov 106  }
 0x808   : > { %v4636_v46 = vpop.f32.mrf.mxu0  ;;  %v4706_v57 = vpop.f32.mrf.mxu1 }
 0x809   : > { %v4710_v49 = vmax.f32 %v4636_v46, %v4706_v57 }
 0x80a   : > { %v9542_v58 = vpop.f32.mrf.mxu0  ;;  %v9549_v2 = vpop.f32.mrf.mxu1 }
 0x80b   : > { %4712 = vrot.lane.b32.xlu1 %v4710_v49, %s10082_s10  ;;  %s11818_s10 = smov 107  }
 0x80e   : > { %v4799_v10 = vpop.f32.mrf.mxu0  ;;  %v4869_v51 = vpop.f32.mrf.mxu1 }
 0x80f   : > { %v4873_v3 = vmax.f32 %v4799_v10, %v4869_v51 }
 0x810   : > { %v9556_v15 = vpop.f32.mrf.mxu0  ;;  %v9563_v19 = vpop.f32.mrf.mxu1 }
 0x811   : > { %4875 = vrot.lane.b32.xlu0 %v4873_v3, %s10083_s7  ;;  %s10091_s7 = smov 66  }
 0x814   : > { %v4950_v13 = vpop.f32.mrf.mxu0  ;;  %v5020_v23 = vpop.f32.mrf.mxu1 }
 0x815   : > { %v5024_v5 = vmax.f32 %v4950_v13, %v5020_v23 }
 0x816   : > { %v9570_v12 = vpop.f32.mrf.mxu0  ;;  %v9577_v14 = vpop.f32.mrf.mxu1 }
 0x817   : > { %5026 = vrot.lane.b32.xlu1 %v5024_v5, %s11858_s30  ;;  %s11884_s30 = sld [smem:[#allocation23_spill]] }
 0x860   : > { %v3950_v22 = vpop.permute.xlu0 %3949 }
 0x861   : > { %3953 = vst.msk [vmem:[#allocation4] sm:$0xff] %vm3952_vm10, %v3950_v22  ;;  %vm753_vm10 = vcmask 293888  }
 0x862   : > { %754 = vst.msk [vmem:[#allocation8] sm:$0xff] %vm753_vm10, %v10565_v61  ;;  %755 = vst.msk [vmem:[#allocation8 + $0x8] sm:$0xff] %vm753_vm10, %v10565_v61 }
 0x865   : > { %v4101_v30 = vpop.permute.xlu1 %4100 }
 0x866   : > { %4104 = vst.msk [vmem:[#allocation4] sm:$0xff] %vm4103_vm11, %v4101_v30  ;;  %vm8058_vm11 = vcmask 89144  }
 0x86b   : > { %v4258_v56 = vpop.permute.xlu0 %4257 }
 0x86c   : > { %4261 = vst.msk [vmem:[#allocation4] sm:$0xff] %vm4260_vm12, %v4258_v56  ;;  %vm8075_vm12 = vcmask 187544  }
 0x871   : > { %v4411_v60 = vpop.permute.xlu1 %4410 }
 0x872   : > { %4414 = vst.msk [vmem:[#allocation4] sm:$0xff] %vm4413_vm13, %v4411_v60  ;;  %vm8084_vm13 = vcmask 236744  }
 0x877   : > { %v4562_v18 = vpop.permute.xlu0 %4561 }
 0x878   : > { %4565 = vst.msk [vmem:[#allocation4] sm:$0xff] %vm4564_vm14, %v4562_v18  ;;  %vm8660_vm14 = vcmask 73728  }
 0x87d   : > { %v4713_v26 = vpop.permute.xlu1 %4712 }
 0x87e   : > { %4716 = vst.msk [vmem:[#allocation4] sm:$0xff] %vm4715_vm15, %v4713_v26 }
 0x883   : > { %v4876_v31 = vpop.permute.xlu0 %4875 }
 0x884   : > { %4879 = vst.msk [vmem:[#allocation4] sm:$0xff] %vm4878_vm1, %v4876_v31 }
 0x889   : > { %v5027_v33 = vpop.permute.xlu1 %5026 }
 0x88a   : > { %5030 = vst.msk [vmem:[#allocation4] sm:$0xff] %vm5029_vm4, %v5027_v33 }
 0x891   : > { %v5031_v34 = vld [vmem:[#allocation4] sm:$0xff] }
 0x892   : > { %v5033_v6 = vpack.c.bf16 %v5032_v27, %v5031_v34 }
 0x894   : > { %5149 = vrot.lane.b32.xlu1 %v5033_v6, %s11854_s4  ;;  %5045 = vrot.lane.b32.xlu0 %v5033_v6, %s11864_s27 }
 0x895   : > { %9585 = vmatpush3.bf16.msra.mxu1 %v5033_v6 }
 0x896   : > { %9596 = vmatprep.subr.bf16.mxu1 %v10565_v61 }
 0x898   : > { %5263 = vrot.lane.b32.xlu1 %v5033_v6, %s11812_s2  ;;  %5206 = vrot.lane.b32.xlu0 %v5033_v6, %s11810_s1  ;;  %s11878_s2 = sld [smem:[#allocation22_spill]]  ;;  %s11880_s1 = smov 118  }
 0x899   : > { %9587 = vmatmul.mubr.msk.bf16.vlgmr.msra.gmra.mxu1 %vm3804_vm7, %v9949_v20 }
 0x89a   : > { %9598 = vmatprep.mubr.msk.bf16.mxu1 %vm10058_vm0, %v10565_v61 }
 0x89c   : > { %5377 = vrot.lane.b32.xlu1 %v5033_v6, %s11857_s8  ;;  %5320 = vrot.lane.b32.xlu0 %v5033_v6, %s11815_s19  ;;  %s11881_s19 = smov 116  }
 0x8a0   : > { %5491 = vrot.lane.b32.xlu1 %v5033_v6, %s11824_s0  ;;  %5434 = vrot.lane.b32.xlu0 %v5033_v6, %s11818_s10  ;;  %s11882_s10 = smov 107  }
 0x8a4   : > { %5549 = vperm.xlu1 %9947, %v5541_v37   ;;  %5544 = vperm.xlu0 %9946, %v5540_v11  }
 0x8a8   : > { %5564 = vperm.xlu1 %9947, %v8921_v21   ;;  %5559 = vperm.xlu0 %9946, %v8920_v29  }
 0x906   : > { %v5046_v39 = vpop.permute.xlu0 %5045  ;;  %v5150_v32 = vpop.permute.xlu1 %5149 }
 0x907   : > { %9579 = vmatpush3.bf16.msra.mxu0 %v5046_v39 }
 0x908   : > { %9590 = vmatprep.subr.bf16.mxu0 %v10565_v61 }
 0x90a   : > { %9581 = vmatmul.mubr.msk.bf16.vlgmr.msra.gmra.mxu0 %vm3804_vm7, %v9950_v40  ;;  %v5207_v41 = vpop.permute.xlu0 %5206  ;;  %v5264_v35 = vpop.permute.xlu1 %5263 }
 0x90b   : > { %9591 = vmatpush3.bf16.msra.mxu0 %v5150_v32  ;;  %9597 = vmatpush3.bf16.msra.mxu1 %v5207_v41 }
 0x90c   : > { %9608 = vmatprep.subr.bf16.mxu1 %v10565_v61  ;;  %9592 = vmatprep.mubr.msk.bf16.mxu0 %vm10058_vm0, %v10565_v61 }
 0x90d   : > { %9602 = vmatprep.subr.bf16.mxu0 %v10565_v61 }
 0x90e   : > { %v5321_v42 = vpop.permute.xlu0 %5320  ;;  %9599 = vmatmul.mubr.msk.bf16.vlgmr.msra.gmra.mxu1 %vm3804_vm7, %v9951_v16  ;;  %v5378_v38 = vpop.permute.xlu1 %5377 }
 0x90f   : > { %9609 = vmatpush3.bf16.msra.mxu1 %v5321_v42  ;;  %9610 = vmatprep.mubr.msk.bf16.mxu1 %vm10058_vm0, %v10565_v61 }
 0x910   : > { %9620 = vmatprep.subr.bf16.mxu1 %v10565_v61 }
 0x912   : > { %9593 = vmatmul.mubr.msk.bf16.vlgmr.msra.gmra.mxu0 %vm3804_vm7, %v9952_v28  ;;  %v5435_v43 = vpop.permute.xlu0 %5434  ;;  %v5492_v48 = vpop.permute.xlu1 %5491 }
 0x913   : > { %9603 = vmatpush3.bf16.msra.mxu0 %v5264_v35  ;;  %9604 = vmatprep.mubr.msk.bf16.mxu0 %vm10058_vm0, %v10565_v61 }
 0x914   : > { %9614 = vmatprep.subr.bf16.mxu0 %v10565_v61 }
 0x916   : > { %9611 = vmatmul.mubr.msk.bf16.vlgmr.msra.gmra.mxu1 %vm3804_vm7, %v9953_v36 }
 0x917   : > { %9621 = vmatpush3.bf16.msra.mxu1 %v5435_v43  ;;  %9622 = vmatprep.mubr.msk.bf16.mxu1 %vm10058_vm0, %v10565_v61 }
 0x918   : > { %9632 = vmatprep.subr.bf16.mxu1 %v10565_v61 }
 0x91a   : > { %9605 = vmatmul.mubr.msk.bf16.vlgmr.msra.gmra.mxu0 %vm3804_vm7, %v9954_v45 }
 0x91b   : > { %9615 = vmatpush3.bf16.msra.mxu0 %v5378_v38  ;;  %9616 = vmatprep.mubr.msk.bf16.mxu0 %vm10058_vm0, %v10565_v61 }
 0x91c   : > { %9626 = vmatprep.subr.bf16.mxu0 %v10565_v61 }
 0x91e   : > { %9623 = vmatmul.mubr.msk.bf16.vlgmr.msra.gmra.mxu1 %vm3804_vm7, %v9956_v44 }
 0x91f   : > { %9634 = vmatprep.mubr.msk.bf16.mxu1 %vm10058_vm0, %v10565_v61  ;;  %v5545_v21 = vpop.permute.xlu0 %5544  ;;  %v5550_v16 = vpop.permute.xlu1 %5549 }
 0x922   : > { %9617 = vmatmul.mubr.msk.bf16.vlgmr.msra.gmra.mxu0 %vm3804_vm7, %v9955_v47 }
 0x923   : > { %9627 = vmatpush3.bf16.msra.mxu0 %v5492_v48  ;;  %9628 = vmatprep.mubr.msk.bf16.mxu0 %vm10058_vm0, %v10565_v61  ;;  %v5560_v36 = vpop.permute.xlu0 %5559 }
 0x924   : > { %9638 = vmatprep.subr.bf16.mxu0 %v10565_v61 }
 0x92a   : > { %9629 = vmatmul.mubr.msk.bf16.vlgmr.msra.gmra.mxu0 %vm3804_vm7, %v9957_v50  ;;  %v5565_v50 = vpop.permute.xlu1 %5564 }
 0x92b   : > { %9640 = vmatprep.mubr.msk.bf16.mxu0 %vm10058_vm0, %v10565_v61 }
 0x959   : > { %v5134_v52 = vpop.f32.mrf.mxu1 }
 0x95b   : > { %v9588_v53 = vpop.f32.mrf.mxu1 }
 0x95d   : > { %v5137_v54 = vpop.f32.mrf.mxu1 }
 0x95f   : > { %v9589_v55 = vpop.f32.mrf.mxu1 }
 0x9ca   : > { %v5085_v59 = vpop.f32.mrf.mxu0 }
 0x9cb   : > { %v5135_v58 = vadd.f32 %v5134_v52, %v5085_v59  ;;  %v11130_v52 = vld [vmem:[%s11877_s20] ss:$0 sm:$0xff] }
 0x9cc   : > { %v9582_v0 = vpop.f32.mrf.mxu0 }
 0x9ce   : > { %v5088_v62 = vpop.f32.mrf.mxu0  ;;  %v5246_v63 = vpop.f32.mrf.mxu1 }
 0x9cf   : > { %v5138_v19 = vadd.f32 %v5137_v54, %v5088_v62 }
 0x9d0   : > { %v9583_v1 = vpop.f32.mrf.mxu0  ;;  %v9600_v4 = vpop.f32.mrf.mxu1 }
 0x9d2   : > { %v5189_v7 = vpop.f32.mrf.mxu0  ;;  %v5249_v8 = vpop.f32.mrf.mxu1 }
 0x9d3   : > { %v5196_v51 = vadd.f32 %v5189_v7, %v5135_v58  ;;  %v8957_v58 = vld [vmem:[%s11771_s14 + $0x10] sm:$0xff] }
 0x9d4   : > { %v9594_v9 = vpop.f32.mrf.mxu0  ;;  %v9601_v46 = vpop.f32.mrf.mxu1 }
 0x9d5   : > { %v5253_v5 = vadd.f32 %v5246_v63, %v5196_v51  ;;  %v9958_v9 = vld [vmem:[%s11878_s2] sm:$0xff]   ;;  %v6102_v46 = vld [vmem:[%s11771_s14 + $0x8] sm:$0xff] }
 0x9d6   : > { %v5192_v57 = vpop.f32.mrf.mxu0  ;;  %v5360_v49 = vpop.f32.mrf.mxu1 }
 0x9d7   : > { %v5197_v12 = vadd.f32 %v5192_v57, %v5138_v19  ;;  %v6101_v57 = vld [vmem:[%s11771_s14] sm:$0xff] }
 0x9d8   : > { %v9595_v2 = vpop.f32.mrf.mxu0  ;;  %v9612_v10 = vpop.f32.mrf.mxu1 }
 0x9d9   : > { %v5254_v18 = vadd.f32 %v5249_v8, %v5197_v12  ;;  %v9959_v10 = vld [vmem:[%s11878_s2 + $0x8] sm:$0xff]  }
 0x9da   : > { %v5303_v3 = vpop.f32.mrf.mxu0  ;;  %v5363_v15 = vpop.f32.mrf.mxu1 }
 0x9db   : > { %v5310_v30 = vadd.f32 %v5303_v3, %v5253_v5  ;;  %v9962_v5 = vld [vmem:[%s11878_s2 + $0x28] sm:$0xff]  }
 0x9dc   : > { %v9606_v13 = vpop.f32.mrf.mxu0  ;;  %v9613_v23 = vpop.f32.mrf.mxu1 }
 0x9dd   : > { %v5367_v33 = vadd.f32 %v5360_v49, %v5310_v30  ;;  %v8958_v49 = vld [vmem:[%s11771_s14 + $0x18] sm:$0xff]  ;;  %v9961_v13 = vld [vmem:[%s11878_s2 + $0x10] sm:$0xff]  }
 0x9de   : > { %v5306_v14 = vpop.f32.mrf.mxu0  ;;  %v5474_v22 = vpop.f32.mrf.mxu1  ;;  %v9965_v30 = vld [vmem:[%s11878_s2 + $0x38] sm:$0xff]  }
 0x9df   : > { %v5311_v27 = vadd.f32 %v5306_v14, %v5254_v18  ;;  %v9963_v14 = vld [vmem:[%s11878_s2 + $0x20] sm:$0xff]  }
 0x9e0   : > { %v9607_v56 = vpop.f32.mrf.mxu0  ;;  %v9624_v60 = vpop.f32.mrf.mxu1  ;;  %v9966_v18 = vld [vmem:[%s11878_s2 + $0x40] sm:$0xff]  }
 0x9e1   : > { %v5368_v11 = vadd.f32 %v5363_v15, %v5311_v27  ;;  %v9960_v15 = vld [vmem:[%s11878_s2 + $0x18] sm:$0xff]   ;;  %v9964_v56 = vld [vmem:[%s11878_s2 + $0x30] sm:$0xff]  }
 0x9e2   : > { %v5417_v26 = vpop.f32.mrf.mxu0  ;;  %v5477_v31 = vpop.f32.mrf.mxu1 }
 0x9e3   : > { %v5424_v20 = vadd.f32 %v5417_v26, %v5367_v33 }
 0x9e4   : > { %v9618_v34 = vpop.f32.mrf.mxu0  ;;  %v9625_v6 = vpop.f32.mrf.mxu1 }
 0x9e5   : > { %v5481_v39 = vadd.f32 %v5474_v22, %v5424_v20 }
 0x9e6   : > { %v5420_v37 = vpop.f32.mrf.mxu0 }
 0x9e7   : > { %v5425_v40 = vadd.f32 %v5420_v37, %v5368_v11 }
 0x9e8   : > { %v9619_v29 = vpop.f32.mrf.mxu0 }
 0x9e9   : > { %v5482_v28 = vadd.f32 %v5477_v31, %v5425_v40 }
 0x9ea   : > { %v5531_v32 = vpop.f32.mrf.mxu0 }
 0x9eb   : > { %v5538_v41 = vadd.f32 %v5531_v32, %v5481_v39 }
 0x9ec   : > { %v9630_v42 = vpop.f32.mrf.mxu0 }
 0x9ed   : > { %v5552_v35 = vmul.f32 %v5545_v21, %v5538_v41 }
 0x9ee   : > { %v5534_v43 = vpop.f32.mrf.mxu0 }
 0x9ef   : > { %v5567_v45 = vadd.f32 %v5560_v36, %v5552_v35  ;;  %v5539_v38 = vadd.f32 %v5534_v43, %v5482_v28 }
 0x9f0   : > { %v9631_v44 = vpop.f32.mrf.mxu0 }
 0x9f1   : > { %v5569_v47 = vmul.f32 0.1, %v5567_v45  ;;  %v5553_v48 = vmul.f32 %v5550_v16, %v5539_v38 }
 0x9f3   : > { %v5571_v53 = vmax.f32 %v5567_v45, %v5569_v47  ;;  %v5568_v54 = vadd.f32 %v5565_v50, %v5553_v48 }
 0x9f5   : > { %v5570_v55 = vmul.f32 0.1, %v5568_v54  ;;  %v5579_v59 = vmul.f32 %v11130_v52, %v5571_v53 }
 0x9f7   : > { %v5572_v0 = vmax.f32 %v5568_v54, %v5570_v55  ;;  %5583 = vrot.lane.b32.xlu0 %v5579_v59, %s11820_s11 }
 0x9f9   : > { %v5580_v62 = vmul.f32 %v11130_v52, %v5572_v0 }
 0x9fb   : > { %5585 = vrot.lane.b32.xlu1 %v5580_v62, %s11820_s11  ;;  %s11883_s11 = smov 11  }
 0xa69   : > { %v5584_v63 = vpop.permute.xlu0 %5583 }
 0xa6a   : > { %5590 = vst.msk [vmem:[#allocation5] sm:$0xff] %vm5589_vm6, %v5584_v63 }
 0xa6d   : > { %v5586_v1 = vpop.permute.xlu1 %5585 }
 0xa6e   : > { %5591 = vst.msk [vmem:[#allocation5 + $0x8] sm:$0xff] %vm5589_vm6, %v5586_v1 }
 0xa71   : > { %v5592_v4 = vld [vmem:[#allocation5] sm:$0xff] }
 0xa75   : > { %v5593_v7 = vld [vmem:[#allocation5 + $0x8] sm:$0xff] }
 0xa76   : > { %v5594_v8 = vpack.c.bf16 %v5593_v7, %v5592_v4 }
 0xa78   : > { %5710 = vrot.lane.b32.xlu1 %v5594_v8, %s11854_s4  ;;  %5606 = vrot.lane.b32.xlu0 %v5594_v8, %s11864_s27 }
 0xa79   : > { %9639 = vmatpush3.bf16.msra.mxu0 %v5594_v8 }
 0xa7a   : > { %9650 = vmatprep.subr.bf16.mxu0 %v10565_v61 }
 0xa7c   : > { %5824 = vrot.lane.b32.xlu1 %v5594_v8, %s11879_s25  ;;  %5767 = vrot.lane.b32.xlu0 %v5594_v8, %s11880_s1 }
 0xa7d   : > { %9641 = vmatmul.mubr.msk.bf16.vlgmr.msra.gmra.mxu0 %vm3804_vm7, %v9958_v9 }
 0xa7e   : > { %9652 = vmatprep.mubr.msk.bf16.mxu0 %vm10058_vm0, %v10565_v61 }
 0xa80   : > { %5938 = vrot.lane.b32.xlu1 %v5594_v8, %s11857_s8  ;;  %5881 = vrot.lane.b32.xlu0 %v5594_v8, %s11881_s19 }
 0xa84   : > { %6052 = vrot.lane.b32.xlu1 %v5594_v8, %s11824_s0  ;;  %5995 = vrot.lane.b32.xlu0 %v5594_v8, %s11882_s10  ;;  %s10090_s0 = smov 86  }
 0xa88   : > { %6110 = vperm.xlu1 %9947, %v6102_v46   ;;  %6105 = vperm.xlu0 %9946, %v6101_v57  }
 0xa8c   : > { %6125 = vperm.xlu1 %9947, %v8958_v49   ;;  %6120 = vperm.xlu0 %9946, %v8957_v58  }
 0xaea   : > { %v5607_v2 = vpop.permute.xlu0 %5606  ;;  %v5711_v51 = vpop.permute.xlu1 %5710 }
 0xaeb   : > { %9633 = vmatpush3.bf16.msra.mxu1 %v5607_v2 }
 0xaec   : > { %9644 = vmatprep.subr.bf16.mxu1 %v10565_v61 }
 0xaee   : > { %9635 = vmatmul.mubr.msk.bf16.vlgmr.msra.gmra.mxu1 %vm3804_vm7, %v9959_v10  ;;  %v5768_v3 = vpop.permute.xlu0 %5767  ;;  %v5825_v23 = vpop.permute.xlu1 %5824 }
 0xaef   : > { %9645 = vmatpush3.bf16.msra.mxu1 %v5711_v51  ;;  %9651 = vmatpush3.bf16.msra.mxu0 %v5768_v3 }
 0xaf0   : > { %9662 = vmatprep.subr.bf16.mxu0 %v10565_v61  ;;  %9646 = vmatprep.mubr.msk.bf16.mxu1 %vm10058_vm0, %v10565_v61 }
 0xaf1   : > { %9656 = vmatprep.subr.bf16.mxu1 %v10565_v61 }
 0xaf2   : > { %v5882_v19 = vpop.permute.xlu0 %5881  ;;  %9653 = vmatmul.mubr.msk.bf16.vlgmr.msra.gmra.mxu0 %vm3804_vm7, %v9960_v15  ;;  %v5939_v22 = vpop.permute.xlu1 %5938 }
 0xaf3   : > { %9663 = vmatpush3.bf16.msra.mxu0 %v5882_v19  ;;  %9664 = vmatprep.mubr.msk.bf16.mxu0 %vm10058_vm0, %v10565_v61 }
 0xaf4   : > { %9674 = vmatprep.subr.bf16.mxu0 %v10565_v61 }
 0xaf6   : > { %9647 = vmatmul.mubr.msk.bf16.vlgmr.msra.gmra.mxu1 %vm3804_vm7, %v9961_v13  ;;  %v5996_v12 = vpop.permute.xlu0 %5995  ;;  %v6053_v60 = vpop.permute.xlu1 %6052 }
 0xaf7   : > { %9657 = vmatpush3.bf16.msra.mxu1 %v5825_v23  ;;  %9658 = vmatprep.mubr.msk.bf16.mxu1 %vm10058_vm0, %v10565_v61 }
 0xaf8   : > { %9668 = vmatprep.subr.bf16.mxu1 %v10565_v61 }
 0xafa   : > { %9665 = vmatmul.mubr.msk.bf16.vlgmr.msra.gmra.mxu0 %vm3804_vm7, %v9962_v5 }
 0xafb   : > { %9675 = vmatpush3.bf16.msra.mxu0 %v5996_v12  ;;  %9676 = vmatprep.mubr.msk.bf16.mxu0 %vm10058_vm0, %v10565_v61 }
 0xafc   : > { %9686 = vmatprep.subr.bf16.mxu0 %v10565_v61 }
 0xafe   : > { %9659 = vmatmul.mubr.msk.bf16.vlgmr.msra.gmra.mxu1 %vm3804_vm7, %v9963_v14 }
 0xaff   : > { %9669 = vmatpush3.bf16.msra.mxu1 %v5939_v22  ;;  %9670 = vmatprep.mubr.msk.bf16.mxu1 %vm10058_vm0, %v10565_v61 }
 0xb00   : > { %9680 = vmatprep.subr.bf16.mxu1 %v10565_v61 }
 0xb02   : > { %9677 = vmatmul.mubr.msk.bf16.vlgmr.msra.gmra.mxu0 %vm3804_vm7, %v9965_v30 }
 0xb03   : > { %9688 = vmatprep.mubr.msk.bf16.mxu0 %vm10058_vm0, %v10565_v61  ;;  %v6106_v58 = vpop.permute.xlu0 %6105  ;;  %v6111_v19 = vpop.permute.xlu1 %6110 }
 0xb06   : > { %9671 = vmatmul.mubr.msk.bf16.vlgmr.msra.gmra.mxu1 %vm3804_vm7, %v9964_v56 }
 0xb07   : > { %9681 = vmatpush3.bf16.msra.mxu1 %v6053_v60  ;;  %9682 = vmatprep.mubr.msk.bf16.mxu1 %vm10058_vm0, %v10565_v61  ;;  %v6121_v12 = vpop.permute.xlu0 %6120 }
 0xb08   : > { %9692 = vmatprep.subr.bf16.mxu1 %v10565_v61 }
 0xb0e   : > { %9683 = vmatmul.mubr.msk.bf16.vlgmr.msra.gmra.mxu1 %vm3804_vm7, %v9966_v18 }
 0xb0f   : > { %9694 = vmatprep.mubr.msk.bf16.mxu1 %vm10058_vm0, %v10565_v61 }
 0xb3d   : > { %v5695_v26 = vpop.f32.mrf.mxu0 }
 0xb3f   : > { %v9642_v31 = vpop.f32.mrf.mxu0 }
 0xb41   : > { %v5698_v33 = vpop.f32.mrf.mxu0 }
 0xb43   : > { %v9643_v27 = vpop.f32.mrf.mxu0 }
 0xbae   : > { %v5646_v34 = vpop.f32.mrf.mxu1 }
 0xbaf   : > { %v5696_v42 = vadd.f32 %v5695_v26, %v5646_v34  ;;  %v6126_v26 = vpop.permute.xlu1 %6125 }
 0xbb0   : > { %v9636_v6 = vpop.f32.mrf.mxu1 }
 0xbb2   : > { %v5649_v20 = vpop.f32.mrf.mxu1  ;;  %v5807_v37 = vpop.f32.mrf.mxu0 }
 0xbb3   : > { %v5699_v38 = vadd.f32 %v5698_v33, %v5649_v20 }
 0xbb4   : > { %v9637_v11 = vpop.f32.mrf.mxu1  ;;  %v9654_v21 = vpop.f32.mrf.mxu0 }
 0xbb6   : > { %v5750_v29 = vpop.f32.mrf.mxu1  ;;  %v5810_v39 = vpop.f32.mrf.mxu0 }
 0xbb7   : > { %v5757_v36 = vadd.f32 %v5750_v29, %v5696_v42  ;;  %v8993_v42 = vld [vmem:[%s11772_s15 + $0x10] sm:$0xff] }
 0xbb8   : > { %v9648_v40 = vpop.f32.mrf.mxu1  ;;  %v9655_v32 = vpop.f32.mrf.mxu0 }
 0xbb9   : > { %v5814_v48 = vadd.f32 %v5807_v37, %v5757_v36  ;;  %v9967_v40 = vld [vmem:[%s11884_s30] sm:$0xff]   ;;  %v6656_v32 = vld [vmem:[%s11772_s15 + $0x8] sm:$0xff] }
 0xbba   : > { %v5753_v41 = vpop.f32.mrf.mxu1  ;;  %v5921_v16 = vpop.f32.mrf.mxu0 }
 0xbbb   : > { %v5758_v50 = vadd.f32 %v5753_v41, %v5699_v38  ;;  %v6655_v41 = vld [vmem:[%s11772_s15] sm:$0xff] }
 0xbbc   : > { %v9649_v28 = vpop.f32.mrf.mxu1  ;;  %v9666_v35 = vpop.f32.mrf.mxu0 }
 0xbbd   : > { %v5815_v62 = vadd.f32 %v5810_v39, %v5758_v50  ;;  %v9968_v35 = vld [vmem:[%s11884_s30 + $0x8] sm:$0xff]  }
 0xbbe   : > { %v5864_v43 = vpop.f32.mrf.mxu1  ;;  %v5924_v45 = vpop.f32.mrf.mxu0 }
 0xbbf   : > { %v5871_v55 = vadd.f32 %v5864_v43, %v5814_v48  ;;  %v9971_v48 = vld [vmem:[%s11884_s30 + $0x28] sm:$0xff]  }
 0xbc0   : > { %v9660_v44 = vpop.f32.mrf.mxu1  ;;  %v9667_v47 = vpop.f32.mrf.mxu0 }
 0xbc1   : > { %v5928_v4 = vadd.f32 %v5921_v16, %v5871_v55  ;;  %v8994_v16 = vld [vmem:[%s11772_s15 + $0x18] sm:$0xff]  ;;  %v9970_v44 = vld [vmem:[%s11884_s30 + $0x10] sm:$0xff]  }
 0xbc2   : > { %v5867_v53 = vpop.f32.mrf.mxu1  ;;  %v6035_v54 = vpop.f32.mrf.mxu0  ;;  %v9974_v55 = vld [vmem:[%s11884_s30 + $0x38] sm:$0xff]  }
 0xbc3   : > { %v5872_v7 = vadd.f32 %v5867_v53, %v5815_v62  ;;  %v9972_v53 = vld [vmem:[%s11884_s30 + $0x20] sm:$0xff]  }
 0xbc4   : > { %v9661_v59 = vpop.f32.mrf.mxu1  ;;  %v9678_v0 = vpop.f32.mrf.mxu0  ;;  %v9975_v62 = vld [vmem:[%s11884_s30 + $0x40] sm:$0xff]  }
 0xbc5   : > { %v5929_v49 = vadd.f32 %v5924_v45, %v5872_v7  ;;  %v9969_v45 = vld [vmem:[%s11884_s30 + $0x18] sm:$0xff]   ;;  %v9973_v59 = vld [vmem:[%s11884_s30 + $0x30] sm:$0xff]  }
 0xbc6   : > { %v5978_v63 = vpop.f32.mrf.mxu1  ;;  %v6038_v1 = vpop.f32.mrf.mxu0 }
 0xbc7   : > { %v5985_v46 = vadd.f32 %v5978_v63, %v5928_v4 }
 0xbc8   : > { %v9672_v8 = vpop.f32.mrf.mxu1  ;;  %v9679_v9 = vpop.f32.mrf.mxu0 }
 0xbc9   : > { %v6042_v10 = vadd.f32 %v6035_v54, %v5985_v46 }
 0xbca   : > { %v5981_v57 = vpop.f32.mrf.mxu1 }
 0xbcb   : > { %v5986_v51 = vadd.f32 %v5981_v57, %v5929_v49 }
 0xbcc   : > { %v9673_v2 = vpop.f32.mrf.mxu1 }
 0xbcd   : > { %v6043_v23 = vadd.f32 %v6038_v1, %v5986_v51 }
 0xbce   : > { %v6092_v3 = vpop.f32.mrf.mxu1 }
 0xbcf   : > { %v6099_v15 = vadd.f32 %v6092_v3, %v6042_v10 }
 0xbd0   : > { %v9684_v13 = vpop.f32.mrf.mxu1 }
 0xbd1   : > { %v6113_v5 = vmul.f32 %v6106_v58, %v6099_v15 }
 0xbd2   : > { %v6095_v14 = vpop.f32.mrf.mxu1 }
 0xbd3   : > { %v6128_v22 = vadd.f32 %v6121_v12, %v6113_v5  ;;  %v6100_v30 = vadd.f32 %v6095_v14, %v6043_v23 }
 0xbd4   : > { %v9685_v56 = vpop.f32.mrf.mxu1 }
 0xbd5   : > { %v6130_v60 = vmul.f32 0.1, %v6128_v22  ;;  %v6114_v18 = vmul.f32 %v6111_v19, %v6100_v30 }
 0xbd7   : > { %v6132_v31 = vmax.f32 %v6128_v22, %v6130_v60  ;;  %v6129_v33 = vadd.f32 %v6126_v26, %v6114_v18 }
 0xbd9   : > { %v6131_v27 = vmul.f32 0.1, %v6129_v33  ;;  %v6134_v34 = vmul.f32 %v11130_v52, %v6132_v31 }
 0xbdb   : > { %v6133_v6 = vmax.f32 %v6129_v33, %v6131_v27  ;;  %6138 = vrot.lane.b32.xlu0 %v6134_v34, %s11883_s11 }
 0xbdd   : > { %v6135_v20 = vmul.f32 %v11130_v52, %v6133_v6 }
 0xbdf   : > { %6140 = vrot.lane.b32.xlu1 %v6135_v20, %s11883_s11 }
 0xc4d   : > { %v6139_v37 = vpop.permute.xlu0 %6138 }
 0xc4e   : > { %6144 = vst.msk [vmem:[#allocation4] sm:$0xff] %vm5589_vm6, %v6139_v37 }
 0xc51   : > { %v6141_v11 = vpop.permute.xlu1 %6140 }
 0xc52   : > { %6145 = vst.msk [vmem:[#allocation4 + $0x8] sm:$0xff] %vm5589_vm6, %v6141_v11 }
 0xc55   : > { %v6146_v21 = vld [vmem:[#allocation4] sm:$0xff] }
 0xc59   : > { %v6147_v29 = vld [vmem:[#allocation4 + $0x8] sm:$0xff] }
 0xc5a   : > { %v6148_v39 = vpack.c.bf16 %v6147_v29, %v6146_v21 }
 0xc5c   : > { %6264 = vrot.lane.b32.xlu1 %v6148_v39, %s11854_s4  ;;  %6160 = vrot.lane.b32.xlu0 %v6148_v39, %s11864_s27 }
 0xc5d   : > { %9693 = vmatpush3.bf16.msra.mxu1 %v6148_v39 }
 0xc5e   : > { %9704 = vmatprep.subr.bf16.mxu1 %v10565_v61 }
 0xc60   : > { %6378 = vrot.lane.b32.xlu1 %v6148_v39, %s11879_s25  ;;  %6321 = vrot.lane.b32.xlu0 %v6148_v39, %s11880_s1  ;;  %s11886_s25 = sld [smem:[#allocation24_spill]] }
 0xc61   : > { %9695 = vmatmul.mubr.msk.bf16.vlgmr.msra.gmra.mxu1 %vm3804_vm7, %v9967_v40 }
 0xc62   : > { %9706 = vmatprep.mubr.msk.bf16.mxu1 %vm10058_vm0, %v10565_v61 }
 0xc64   : > { %6492 = vrot.lane.b32.xlu1 %v6148_v39, %s11857_s8  ;;  %6435 = vrot.lane.b32.xlu0 %v6148_v39, %s11881_s19  ;;  %s10092_s8 = smov 46   ;;  %s10094_s19 = smov 9  }
 0xc68   : > { %6606 = vrot.lane.b32.xlu1 %v6148_v39, %s11885_s13  ;;  %6549 = vrot.lane.b32.xlu0 %v6148_v39, %s11882_s10  ;;  %s11826_s10 = smov 13  }
 0xc6c   : > { %6664 = vperm.xlu1 %9947, %v6656_v32   ;;  %6659 = vperm.xlu0 %9946, %v6655_v41  }
 0xc70   : > { %6679 = vperm.xlu1 %9947, %v8994_v16   ;;  %6674 = vperm.xlu0 %9946, %v8993_v42  }
 0xcce   : > { %v6161_v28 = vpop.permute.xlu0 %6160  ;;  %v6265_v36 = vpop.permute.xlu1 %6264 }
 0xccf   : > { %9687 = vmatpush3.bf16.msra.mxu0 %v6161_v28 }
 0xcd0   : > { %9698 = vmatprep.subr.bf16.mxu0 %v10565_v61 }
 0xcd2   : > { %9689 = vmatmul.mubr.msk.bf16.vlgmr.msra.gmra.mxu0 %vm3804_vm7, %v9968_v35  ;;  %v6322_v43 = vpop.permute.xlu0 %6321  ;;  %v6379_v47 = vpop.permute.xlu1 %6378 }
 0xcd3   : > { %9699 = vmatpush3.bf16.msra.mxu0 %v6265_v36  ;;  %9705 = vmatpush3.bf16.msra.mxu1 %v6322_v43 }
 0xcd4   : > { %9716 = vmatprep.subr.bf16.mxu1 %v10565_v61  ;;  %9700 = vmatprep.mubr.msk.bf16.mxu0 %vm10058_vm0, %v10565_v61 }
 0xcd5   : > { %9710 = vmatprep.subr.bf16.mxu0 %v10565_v61 }
 0xcd6   : > { %v6436_v38 = vpop.permute.xlu0 %6435  ;;  %9707 = vmatmul.mubr.msk.bf16.vlgmr.msra.gmra.mxu1 %vm3804_vm7, %v9969_v45  ;;  %v6493_v54 = vpop.permute.xlu1 %6492 }
 0xcd7   : > { %9717 = vmatpush3.bf16.msra.mxu1 %v6436_v38  ;;  %9718 = vmatprep.mubr.msk.bf16.mxu1 %vm10058_vm0, %v10565_v61 }
 0xcd8   : > { %9728 = vmatprep.subr.bf16.mxu1 %v10565_v61 }
 0xcda   : > { %9701 = vmatmul.mubr.msk.bf16.vlgmr.msra.gmra.mxu0 %vm3804_vm7, %v9970_v44  ;;  %v6550_v50 = vpop.permute.xlu0 %6549  ;;  %v6607_v0 = vpop.permute.xlu1 %6606 }
 0xcdb   : > { %9711 = vmatpush3.bf16.msra.mxu0 %v6379_v47  ;;  %9712 = vmatprep.mubr.msk.bf16.mxu0 %vm10058_vm0, %v10565_v61 }
 0xcdc   : > { %9722 = vmatprep.subr.bf16.mxu0 %v10565_v61 }
 0xcde   : > { %9719 = vmatmul.mubr.msk.bf16.vlgmr.msra.gmra.mxu1 %vm3804_vm7, %v9971_v48 }
 0xcdf   : > { %9729 = vmatpush3.bf16.msra.mxu1 %v6550_v50  ;;  %9730 = vmatprep.mubr.msk.bf16.mxu1 %vm10058_vm0, %v10565_v61 }
 0xce0   : > { %9740 = vmatprep.subr.msk.mxu1 %vm10844_vm3, %v10070_v24 }
 0xce2   : > { %9713 = vmatmul.mubr.msk.bf16.vlgmr.msra.gmra.mxu0 %vm3804_vm7, %v9972_v53 }
 0xce3   : > { %9723 = vmatpush3.bf16.msra.mxu0 %v6493_v54  ;;  %9724 = vmatprep.mubr.msk.bf16.mxu0 %vm10058_vm0, %v10565_v61 }
 0xce4   : > { %9734 = vmatprep.subr.bf16.mxu0 %v10565_v61 }
 0xce6   : > { %9731 = vmatmul.mubr.msk.bf16.vlgmr.msra.gmra.mxu1 %vm3804_vm7, %v9974_v55 }
 0xce7   : > { %9741 = vmatpush3.msk.msra.mxu1 %vm10844_vm3, %v10070_v24  ;;  %v6660_v42 = vpop.permute.xlu0 %6659  ;;  %v6665_v38 = vpop.permute.xlu1 %6664 }
 0xce8   : > { %9745 = vmatprep.subr.msk.mxu1 %vm10856_vm5, %v10070_v24 }
 0xcea   : > { %9725 = vmatmul.mubr.msk.bf16.vlgmr.msra.gmra.mxu0 %vm3804_vm7, %v9973_v59 }
 0xceb   : > { %9735 = vmatpush3.bf16.msra.mxu0 %v6607_v0  ;;  %9736 = vmatprep.mubr.msk.bf16.mxu0 %vm10058_vm0, %v10565_v61  ;;  %v6675_v50 = vpop.permute.xlu0 %6674 }
 0xcec   : > { %9750 = vmatprep.subr.msk.mxu0 %vm10844_vm3, %v10070_v24 }
 0xcf2   : > { %9737 = vmatmul.mubr.msk.bf16.vlgmr.msra.gmra.mxu0 %vm3804_vm7, %v9975_v62 }
 0xcf3   : > { %9751 = vmatpush3.msk.msra.mxu0 %vm10844_vm3, %v10070_v24 }
 0xcf4   : > { %9760 = vmatprep.subr.msk.mxu0 %vm10844_vm3, %v10070_v24 }
 0xd21   : > { %v6249_v63 = vpop.f32.mrf.mxu1 }
 0xd23   : > { %v9696_v1 = vpop.f32.mrf.mxu1 }
 0xd25   : > { %v6252_v4 = vpop.f32.mrf.mxu1 }
 0xd27   : > { %v9697_v7 = vpop.f32.mrf.mxu1 }
 0xd92   : > { %v6200_v8 = vpop.f32.mrf.mxu0 }
 0xd93   : > { %v6250_v13 = vadd.f32 %v6249_v63, %v6200_v8  ;;  %v6680_v63 = vpop.permute.xlu1 %6679 }
 0xd94   : > { %v9690_v9 = vpop.f32.mrf.mxu0 }
 0xd96   : > { %v6203_v46 = vpop.f32.mrf.mxu0  ;;  %v6361_v57 = vpop.f32.mrf.mxu1 }
 0xd97   : > { %v6253_v30 = vadd.f32 %v6252_v4, %v6203_v46 }
 0xd98   : > { %v9691_v49 = vpop.f32.mrf.mxu0  ;;  %v9708_v58 = vpop.f32.mrf.mxu1 }
 0xd9a   : > { %v6304_v2 = vpop.f32.mrf.mxu0  ;;  %v6364_v10 = vpop.f32.mrf.mxu1 }
 0xd9b   : > { %v6311_v12 = vadd.f32 %v6304_v2, %v6250_v13 }
 0xd9c   : > { %v9702_v51 = vpop.f32.mrf.mxu0  ;;  %v9709_v3 = vpop.f32.mrf.mxu1 }
 0xd9d   : > { %v6368_v18 = vadd.f32 %v6361_v57, %v6311_v12 }
 0xd9e   : > { %v6307_v15 = vpop.f32.mrf.mxu0  ;;  %v6475_v19 = vpop.f32.mrf.mxu1 }
 0xd9f   : > { %v6312_v26 = vadd.f32 %v6307_v15, %v6253_v30 }
 0xda0   : > { %v9703_v23 = vpop.f32.mrf.mxu0  ;;  %v9720_v5 = vpop.f32.mrf.mxu1 }
 0xda1   : > { %v6369_v20 = vadd.f32 %v6364_v10, %v6312_v26 }
 0xda2   : > { %v6418_v14 = vpop.f32.mrf.mxu0  ;;  %v6478_v22 = vpop.f32.mrf.mxu1 }
 0xda3   : > { %v6425_v27 = vadd.f32 %v6418_v14, %v6368_v18 }
 0xda4   : > { %v9714_v56 = vpop.f32.mrf.mxu0  ;;  %v9721_v60 = vpop.f32.mrf.mxu1 }
 0xda5   : > { %v6482_v21 = vadd.f32 %v6475_v19, %v6425_v27 }
 0xda6   : > { %v6421_v31 = vpop.f32.mrf.mxu0  ;;  %v6589_v33 = vpop.f32.mrf.mxu1 }
 0xda7   : > { %v6426_v29 = vadd.f32 %v6421_v31, %v6369_v20 }
 0xda8   : > { %v9715_v34 = vpop.f32.mrf.mxu0  ;;  %v9732_v6 = vpop.f32.mrf.mxu1 }
 0xda9   : > { %v6483_v16 = vadd.f32 %v6478_v22, %v6426_v29 }
 0xdaa   : > { %v6532_v37 = vpop.f32.mrf.mxu0  ;;  %v6592_v11 = vpop.f32.mrf.mxu1 }
 0xdab   : > { %v6539_v32 = vadd.f32 %v6532_v37, %v6482_v21 }
 0xdac   : > { %v9726_v39 = vpop.f32.mrf.mxu0  ;;  %v9733_v40 = vpop.f32.mrf.mxu1 }
 0xdad   : > { %v6596_v35 = vadd.f32 %v6589_v33, %v6539_v32 }
 0xdae   : > { %v6535_v41 = vpop.f32.mrf.mxu0 }
 0xdaf   : > { %v6540_v36 = vadd.f32 %v6535_v41, %v6483_v16 }
 0xdb0   : > { %v9727_v28 = vpop.f32.mrf.mxu0 }
 0xdb1   : > { %v6597_v47 = vadd.f32 %v6592_v11, %v6540_v36 }
 0xdb2   : > { %v6646_v43 = vpop.f32.mrf.mxu0 }
 0xdb3   : > { %v6653_v45 = vadd.f32 %v6646_v43, %v6596_v35 }
 0xdb4   : > { %v9738_v44 = vpop.f32.mrf.mxu0 }
 0xdb5   : > { %v6667_v48 = vmul.f32 %v6660_v42, %v6653_v45 }
 0xdb6   : > { %v6649_v53 = vpop.f32.mrf.mxu0 }
 0xdb7   : > { %v6682_v54 = vadd.f32 %v6675_v50, %v6667_v48  ;;  %v6654_v55 = vadd.f32 %v6649_v53, %v6597_v47 }
 0xdb8   : > { %v9739_v59 = vpop.f32.mrf.mxu0 }
 0xdb9   : > { %v6684_v0 = vmul.f32 0.1, %v6682_v54  ;;  %v6668_v62 = vmul.f32 %v6665_v38, %v6654_v55  ;;  %v7908_v55 = vld [vmem:[%s11773_s16 + $0x8] sm:$0xff]  ;;  %v7907_v59 = vld [vmem:[%s11773_s16] sm:$0xff] }
 0xdbb   : > { %v6686_v1 = vmax.f32 %v6682_v54, %v6684_v0  ;;  %v6683_v4 = vadd.f32 %v6680_v63, %v6668_v62  ;;  %v9976_v54 = vld [vmem:[%s11886_s25] sm:$0xff]   ;;  %v9054_v0 = vld [vmem:[%s11773_s16 + $0x18] sm:$0xff]  ;;  %v9053_v62 = vld [vmem:[%s11773_s16 + $0x10] sm:$0xff] }
 0xdbd   : > { %v6685_v7 = vmul.f32 0.1, %v6683_v4  ;;  %v6688_v8 = vmul.f32 %v11130_v52, %v6686_v1  ;;  %v9977_v1 = vld [vmem:[%s11886_s25 + $0x8] sm:$0xff]  }
 0xdbf   : > { %v6687_v9 = vmax.f32 %v6683_v4, %v6685_v7  ;;  %6692 = vrot.lane.b32.xlu0 %v6688_v8, %s11883_s11  ;;  %v9978_v8 = vld [vmem:[%s11886_s25 + $0x18] sm:$0xff]  }
 0xdc1   : > { %v6689_v46 = vmul.f32 %v11130_v52, %v6687_v9 }
 0xdc3   : > { %6694 = vrot.lane.b32.xlu1 %v6689_v46, %s11883_s11  ;;  %v9979_v46 = vld [vmem:[%s11886_s25 + $0x10] sm:$0xff]  }
 0xe31   : > { %v6693_v57 = vpop.permute.xlu0 %6692 }
 0xe32   : > { %6698 = vst.msk [vmem:[#allocation5] sm:$0xff] %vm5589_vm6, %v6693_v57 }
 0xe35   : > { %v6695_v49 = vpop.permute.xlu1 %6694 }
 0xe36   : > { %6699 = vst.msk [vmem:[#allocation5 + $0x8] sm:$0xff] %vm5589_vm6, %v6695_v49  ;;  %v9980_v49 = vld [vmem:[%s11886_s25 + $0x28] sm:$0xff]  }
 0xe39   : > { %v6700_v58 = vld [vmem:[#allocation5] sm:$0xff] }
 0xe3a   : > { %6704 = vrot.lane.b32.xlu0 %v6700_v58, %s11880_s1 }
 0xe3d   : > { %v6701_v2 = vld [vmem:[#allocation5 + $0x8] sm:$0xff] }
 0xe3e   : > { %6706 = vrot.lane.b32.xlu1 %v6701_v2, %s11880_s1 }
 0xeac   : > { %v6705_v10 = vpop.permute.xlu0 %6704 }
 0xead   : > { %v6710_v51 = vmax.f32 %v6700_v58, %v6705_v10 }
 0xeaf   : > { %6714 = vrot.lane.b32.xlu0 %v6710_v51, %s11885_s13 }
 0xeb0   : > { %v6707_v3 = vpop.permute.xlu1 %6706 }
 0xeb1   : > { %v6711_v52 = vmax.f32 %v6701_v2, %v6707_v3  ;;  %v9981_v2 = vld [vmem:[%s11886_s25 + $0x20] sm:$0xff]   ;;  %v9982_v3 = vld [vmem:[%s11886_s25 + $0x30] sm:$0xff]  }
 0xeb3   : > { %6885 = vrot.lane.b32.xlu0 %v6710_v51, %s10090_s0  ;;  %6716 = vrot.lane.b32.xlu1 %v6711_v52, %s11885_s13  ;;  %s10093_s13 = smov 5  }
 0xeb7   : > { %7056 = vrot.lane.b32.xlu0 %v6710_v51, %s10091_s7  ;;  %6887 = vrot.lane.b32.xlu1 %v6711_v52, %s10090_s0  ;;  %s10098_s0 = smov 124  }
 0xebb   : > { %7227 = vrot.lane.b32.xlu0 %v6710_v51, %s10092_s8  ;;  %7058 = vrot.lane.b32.xlu1 %v6711_v52, %s10091_s7  ;;  %s10101_s7 = smov 119   ;;  %v9983_v51 = vld [vmem:[%s11886_s25 + $0x38] sm:$0xff]  }
 0xebf   : > { %7229 = vrot.lane.b32.xlu1 %v6711_v52, %s10092_s8 }
 0xf21   : > { %v6715_v15 = vpop.permute.xlu0 %6714 }
 0xf22   : > { %9742 = vmatprep.mubr.msk.f32.mxu1 %vm1806_vm2, %v6715_v15 }
 0xf25   : > { %v6886_v19 = vpop.permute.xlu0 %6885  ;;  %v6717_v13 = vpop.permute.xlu1 %6716 }
 0xf26   : > { %9743 = vmatmul.mubr.msk.f32.vlgmr.msra.gmra.mxu1 %vm1806_vm2, %v6717_v13  ;;  %9752 = vmatprep.mubr.msk.f32.mxu0 %vm1806_vm2, %v6886_v19 }
 0xf27   : > { %9747 = vmatprep.mubr.msk.f32.mxu1 %vm1806_vm2, %v6715_v15  ;;  %9746 = vmatpush3.msk.msra.mxu1 %vm10856_vm5, %v10070_v24  ;;  %v9984_v15 = vld [vmem:[%s11886_s25 + $0x40] sm:$0xff]  }
 0xf28   : > { %9755 = vmatprep.subr.msk.mxu1 %vm10856_vm5, %v10070_v24 }
 0xf29   : > { %v7057_v23 = vpop.permute.xlu0 %7056  ;;  %v6888_v5 = vpop.permute.xlu1 %6887 }
 0xf2a   : > { %9748 = vmatmul.mubr.msk.f32.vlgmr.msra.gmra.mxu1 %vm1806_vm2, %v6717_v13  ;;  %9753 = vmatmul.mubr.msk.f32.vlgmr.msra.gmra.mxu0 %vm1806_vm2, %v6888_v5 }
 0xf2b   : > { %9757 = vmatprep.mubr.msk.f32.mxu1 %vm1806_vm2, %v6886_v19  ;;  %9762 = vmatprep.mubr.msk.f32.mxu0 %vm1806_vm2, %v7057_v23 }
 0xf2c   : > { %9756 = vmatpush3.msk.msra.mxu1 %vm10856_vm5, %v10070_v24  ;;  %9761 = vmatpush3.msk.msra.mxu0 %vm10844_vm3, %v10070_v24 }
 0xf2d   : > { %v7228_v12 = vpop.permute.xlu0 %7227  ;;  %v7059_v14 = vpop.permute.xlu1 %7058  ;;  %9765 = vmatprep.subr.msk.mxu1 %vm10856_vm5, %v10070_v24  ;;  %9770 = vmatprep.subr.msk.mxu0 %vm10844_vm3, %v10070_v24 }
 0xf2e   : > { %9758 = vmatmul.mubr.msk.f32.vlgmr.msra.gmra.mxu1 %vm1806_vm2, %v6888_v5  ;;  %9763 = vmatmul.mubr.msk.f32.vlgmr.msra.gmra.mxu0 %vm1806_vm2, %v7059_v14 }
 0xf2f   : > { %9767 = vmatprep.mubr.msk.f32.mxu1 %vm1806_vm2, %v7057_v23  ;;  %9772 = vmatprep.mubr.msk.f32.mxu0 %vm1806_vm2, %v7228_v12 }
 0xf30   : > { %9766 = vmatpush3.msk.msra.mxu1 %vm10856_vm5, %v10070_v24  ;;  %9771 = vmatpush3.msk.msra.mxu0 %vm10844_vm3, %v10070_v24  ;;  %vm748_vm3 = vcmask 211968  }
 0xf31   : > { %v7230_v22 = vpop.permute.xlu1 %7229  ;;  %9775 = vmatprep.subr.msk.mxu1 %vm10856_vm5, %v10070_v24  ;;  %9780 = vmatprep.subr.bf16.mxu0 %v10565_v61  ;;  %750 = vst.msk [vmem:[#allocation6 + $0x8] sm:$0xff] %vm748_vm3, %v10565_v61  ;;  %749 = vst.msk [vmem:[#allocation6] sm:$0xff] %vm748_vm3, %v10565_v61 }
 0xf32   : > { %9768 = vmatmul.mubr.msk.f32.vlgmr.msra.gmra.mxu1 %vm1806_vm2, %v7059_v14  ;;  %9773 = vmatmul.mubr.msk.f32.vlgmr.msra.gmra.mxu0 %vm1806_vm2, %v7230_v22  ;;  %751 = vst.msk [vmem:[#allocation7] sm:$0xff] %vm748_vm3, %v10565_v61  ;;  %752 = vst.msk [vmem:[#allocation7 + $0x8] sm:$0xff] %vm748_vm3, %v10565_v61 }
 0xf33   : > { %9777 = vmatprep.mubr.msk.f32.mxu1 %vm1806_vm2, %v7228_v12  ;;  %9776 = vmatpush3.msk.msra.mxu1 %vm10856_vm5, %v10070_v24  ;;  %vm7053_vm5 = vcmask 105544  }
 0xf34   : > { %9786 = vmatprep.subr.bf16.mxu1 %v10565_v61  ;;  %9782 = vmatprep.mubr.msk.bf16.mxu0 %vm10058_vm0, %v10565_v61 }
 0xf36   : > { %9778 = vmatmul.mubr.msk.f32.vlgmr.msra.gmra.mxu1 %vm1806_vm2, %v7230_v22  ;;  %vm6882_vm2 = vcmask 72744  }
 0xf37   : > { %9788 = vmatprep.mubr.msk.bf16.mxu1 %vm10058_vm0, %v10565_v61 }
 0xfe6   : > { %v9744_v17 = vpop.f32.mrf.mxu1 }
 0xfe8   : > { %v6788_v24 = vpop.f32.mrf.mxu1 }
 0xfea   : > { %v9749_v25 = vpop.f32.mrf.mxu1  ;;  %v9754_v30 = vpop.f32.mrf.mxu0 }
 0xfeb   : > { %v6873_v56 = vmax.f32 %v9744_v17, %v9749_v25 }
 0xfec   : > { %v6863_v60 = vpop.f32.mrf.mxu1  ;;  %v6959_v18 = vpop.f32.mrf.mxu0 }
 0xfed   : > { %v6872_v26 = vmax.f32 %v6788_v24, %v6863_v60  ;;  %6878 = vrot.lane.b32.xlu1 %v6873_v56, %s10093_s13 }
 0xfee   : > { %v9759_v31 = vpop.f32.mrf.mxu1  ;;  %v9764_v33 = vpop.f32.mrf.mxu0 }
 0xfef   : > { %v7044_v27 = vmax.f32 %v9754_v30, %v9759_v31  ;;  %6876 = vrot.lane.b32.xlu0 %v6872_v26, %s10093_s13 }
 0xff0   : > { %v7034_v34 = vpop.f32.mrf.mxu1  ;;  %v7130_v6 = vpop.f32.mrf.mxu0 }
 0xff1   : > { %v7043_v20 = vmax.f32 %v6959_v18, %v7034_v34  ;;  %7049 = vrot.lane.b32.xlu1 %v7044_v27, %s10094_s19 }
 0xff2   : > { %v9769_v37 = vpop.f32.mrf.mxu1  ;;  %v9774_v21 = vpop.f32.mrf.mxu0 }
 0xff3   : > { %v7215_v11 = vmax.f32 %v9764_v33, %v9769_v37  ;;  %7047 = vrot.lane.b32.xlu0 %v7043_v20, %s10094_s19 }
 0xff4   : > { %v7205_v29 = vpop.f32.mrf.mxu1  ;;  %v7301_v41 = vpop.f32.mrf.mxu0 }
 0xff5   : > { %v7214_v39 = vmax.f32 %v7130_v6, %v7205_v29  ;;  %7220 = vrot.lane.b32.xlu1 %v7215_v11, %s11826_s10 }
 0xff6   : > { %v9779_v40 = vpop.f32.mrf.mxu1 }
 0xff7   : > { %v7386_v32 = vmax.f32 %v9774_v21, %v9779_v40  ;;  %7218 = vrot.lane.b32.xlu0 %v7214_v39, %s11826_s10 }
 0xff8   : > { %v7376_v16 = vpop.f32.mrf.mxu1 }
 0xff9   : > { %v7385_v42 = vmax.f32 %v7301_v41, %v7376_v16  ;;  %7391 = vrot.lane.b32.xlu1 %v7386_v32, %s10096_s29 }
 0xffb   : > { %7389 = vrot.lane.b32.xlu0 %v7385_v42, %s10096_s29 }
0x105f   : > { %v6879_v28 = vpop.permute.xlu1 %6878 }
0x1060   : > { %6884 = vst.msk [vmem:[#allocation6 + $0x8] sm:$0xff] %vm6882_vm2, %v6879_v28 }
0x1061   : > { %v6877_v35 = vpop.permute.xlu0 %6876 }
0x1062   : > { %6883 = vst.msk [vmem:[#allocation6] sm:$0xff] %vm6882_vm2, %v6877_v35 }
0x1063   : > { %v7050_v36 = vpop.permute.xlu1 %7049 }
0x1064   : > { %7055 = vst.msk [vmem:[#allocation6 + $0x8] sm:$0xff] %vm7053_vm5, %v7050_v36 }
0x1065   : > { %v7048_v43 = vpop.permute.xlu0 %7047 }
0x1066   : > { %7054 = vst.msk [vmem:[#allocation6] sm:$0xff] %vm7053_vm5, %v7048_v43 }
0x1067   : > { %v7221_v45 = vpop.permute.xlu1 %7220 }
0x1068   : > { %7226 = vst.msk [vmem:[#allocation6 + $0x8] sm:$0xff] %vm7224_vm8, %v7221_v45 }
0x1069   : > { %v7219_v38 = vpop.permute.xlu0 %7218 }
0x106a   : > { %7225 = vst.msk [vmem:[#allocation6] sm:$0xff] %vm7224_vm8, %v7219_v38 }
0x106b   : > { %v7392_v44 = vpop.permute.xlu1 %7391 }
0x106c   : > { %7397 = vst.msk [vmem:[#allocation6 + $0x8] sm:$0xff] %vm7395_vm9, %v7392_v44 }
0x106d   : > { %v7390_v47 = vpop.permute.xlu0 %7389 }
0x106e   : > { %7396 = vst.msk [vmem:[#allocation6] sm:$0xff] %vm7395_vm9, %v7390_v47 }
0x1073   : > { %v7399_v48 = vld [vmem:[#allocation6 + $0x8] sm:$0xff] }
0x1075   : > { %v7398_v50 = vld [vmem:[#allocation6] sm:$0xff] }
0x1076   : > { %v7400_v53 = vpack.c.bf16 %v7399_v48, %v7398_v50 }
0x1078   : > { %7516 = vrot.lane.b32.xlu1 %v7400_v53, %s11854_s4  ;;  %7412 = vrot.lane.b32.xlu0 %v7400_v53, %s11864_s27  ;;  %s10099_s4 = smov 120   ;;  %s10100_s27 = smov 122  }
0x1079   : > { %9787 = vmatpush3.bf16.msra.mxu1 %v7400_v53 }
0x107a   : > { %9798 = vmatprep.subr.bf16.mxu1 %v10565_v61 }
0x107c   : > { %7630 = vrot.lane.b32.xlu1 %v7400_v53, %s10097_s5  ;;  %7573 = vrot.lane.b32.xlu0 %v7400_v53, %s10098_s0  ;;  %s11887_s0 = sld [smem:[#allocation25_spill]] }
0x107d   : > { %9789 = vmatmul.mubr.msk.bf16.vlgmr.msra.gmra.mxu1 %vm3804_vm7, %v9976_v54 }
0x107e   : > { %9800 = vmatprep.mubr.msk.bf16.mxu1 %vm10058_vm0, %v10565_v61 }
0x1080   : > { %7744 = vrot.lane.b32.xlu1 %v7400_v53, %s10099_s4  ;;  %7687 = vrot.lane.b32.xlu0 %v7400_v53, %s10100_s27  ;;  %s11888_s4 = smov 13   ;;  %s728_s27 = sand.u32 1, %s10047_s26  }
0x1081   : > { %s729_s10 = scalar_lea.vmem [#allocation9], %s728_s27  ;;  %s8663_s12 = scalar_lea.sflag [#allocation10], %s728_s27 }
0x1082   : > { %s8675_s8 = sshll.u32 %s729_s10, 4  ;;  %s8676_s8 = int_to_ptr.vmem [resolvable:$true] %s8675_s8 }
0x1083   : > { %s9995_s20 = scalar_lea.vmem %s8676_s8, 16 }
0x1084   : > { %7858 = vrot.lane.b32.xlu1 %v7400_v53, %s11880_s1  ;;  %7801 = vrot.lane.b32.xlu0 %v7400_v53, %s10101_s7  ;;  %p9996_p11 = scmp.ne.s32.totalorder %s8676_s8, %s9995_s20 }
0x1086   : > { %p9997_p12 = pnand %p9996_p11, %p10267_p5 }
0x1088   : > { %7916 = vperm.xlu1 %9947, %v7908_v55   ;;  %7911 = vperm.xlu0 %9946, %v7907_v59   ;;  %p9998_p13 = pneg %p9997_p12 }
0x108c   : > { %7931 = vperm.xlu1 %9947, %v9054_v0   ;;  %7926 = vperm.xlu0 %9946, %v9053_v62  }
0x10ea   : > { %v7413_v63 = vpop.permute.xlu0 %7412  ;;  %v7517_v4 = vpop.permute.xlu1 %7516 }
0x10eb   : > { %9781 = vmatpush3.bf16.msra.mxu0 %v7413_v63 }
0x10ec   : > { %9792 = vmatprep.subr.bf16.mxu0 %v10565_v61 }
0x10ee   : > { %9783 = vmatmul.mubr.msk.bf16.vlgmr.msra.gmra.mxu0 %vm3804_vm7, %v9977_v1  ;;  %v7574_v7 = vpop.permute.xlu0 %7573  ;;  %v7631_v57 = vpop.permute.xlu1 %7630 }
0x10ef   : > { %9793 = vmatpush3.bf16.msra.mxu0 %v7517_v4  ;;  %9799 = vmatpush3.bf16.msra.mxu1 %v7574_v7 }
0x10f0   : > { %9810 = vmatprep.subr.bf16.mxu1 %v10565_v61  ;;  %9794 = vmatprep.mubr.msk.bf16.mxu0 %vm10058_vm0, %v10565_v61 }
0x10f1   : > { %9804 = vmatprep.subr.bf16.mxu0 %v10565_v61 }
0x10f2   : > { %v7688_v9 = vpop.permute.xlu0 %7687  ;;  %9801 = vmatmul.mubr.msk.bf16.vlgmr.msra.gmra.mxu1 %vm3804_vm7, %v9978_v8  ;;  %v7745_v10 = vpop.permute.xlu1 %7744 }
0x10f3   : > { %9811 = vmatpush3.bf16.msra.mxu1 %v7688_v9  ;;  %9812 = vmatprep.mubr.msk.bf16.mxu1 %vm10058_vm0, %v10565_v61 }
0x10f4   : > { %9822 = vmatprep.subr.bf16.mxu1 %v10565_v61 }
0x10f6   : > { %9795 = vmatmul.mubr.msk.bf16.vlgmr.msra.gmra.mxu0 %vm3804_vm7, %v9979_v46  ;;  %v7802_v58 = vpop.permute.xlu0 %7801  ;;  %v7859_v52 = vpop.permute.xlu1 %7858 }
0x10f7   : > { %9805 = vmatpush3.bf16.msra.mxu0 %v7631_v57  ;;  %9806 = vmatprep.mubr.msk.bf16.mxu0 %vm10058_vm0, %v10565_v61 }
0x10f8   : > { %9816 = vmatprep.subr.bf16.mxu0 %v10565_v61 }
0x10fa   : > { %9813 = vmatmul.mubr.msk.bf16.vlgmr.msra.gmra.mxu1 %vm3804_vm7, %v9980_v49 }
0x10fb   : > { %9823 = vmatpush3.bf16.msra.mxu1 %v7802_v58  ;;  %9824 = vmatprep.mubr.msk.bf16.mxu1 %vm10058_vm0, %v10565_v61 }
0x10fc   : > { %9834 = vmatprep.subr.bf16.mxu1 %v10565_v61 }
0x10fe   : > { %9807 = vmatmul.mubr.msk.bf16.vlgmr.msra.gmra.mxu0 %vm3804_vm7, %v9981_v2 }
0x10ff   : > { %9817 = vmatpush3.bf16.msra.mxu0 %v7745_v10  ;;  %9818 = vmatprep.mubr.msk.bf16.mxu0 %vm10058_vm0, %v10565_v61 }
0x1100   : > { %9828 = vmatprep.subr.bf16.mxu0 %v10565_v61 }
0x1102   : > { %9825 = vmatmul.mubr.msk.bf16.vlgmr.msra.gmra.mxu1 %vm3804_vm7, %v9983_v51 }
0x1103   : > { %9836 = vmatprep.mubr.msk.bf16.mxu1 %vm10058_vm0, %v10565_v61  ;;  %v7912_v54 = vpop.permute.xlu0 %7911  ;;  %v7917_v1 = vpop.permute.xlu1 %7916 }
0x1106   : > { %9819 = vmatmul.mubr.msk.bf16.vlgmr.msra.gmra.mxu0 %vm3804_vm7, %v9982_v3  ;;  %v9055_v3 = vld [vmem:[%s11778_s21] ss:$0 sm:$0xff] }
0x1107   : > { %9829 = vmatpush3.bf16.msra.mxu0 %v7859_v52  ;;  %9830 = vmatprep.mubr.msk.bf16.mxu0 %vm10058_vm0, %v10565_v61  ;;  %v7927_v9 = vpop.permute.xlu0 %7926  ;;  %v7932_v51 = vpop.permute.xlu1 %7931  ;;  %vm7956_vm0 = vcmask 171048   ;;  %v8267_v61 = vld [vmem:[%s11775_s18] sm:$0xff] }
0x110e   : > { %9831 = vmatmul.mubr.msk.bf16.vlgmr.msra.gmra.mxu0 %vm3804_vm7, %v9984_v15 }
0x113d   : > { %v7501_v19 = vpop.f32.mrf.mxu1 }
0x113f   : > { %v9790_v13 = vpop.f32.mrf.mxu1 }
0x1141   : > { %v7504_v23 = vpop.f32.mrf.mxu1 }
0x1143   : > { %v9791_v5 = vpop.f32.mrf.mxu1 }
0x11ae   : > { %v7452_v12 = vpop.f32.mrf.mxu0 }
0x11af   : > { %v7502_v33 = vadd.f32 %v7501_v19, %v7452_v12  ;;  %v8017_v12 = vld [vmem:[%s11774_s17] sm:$0xff] }
0x11b0   : > { %v9784_v14 = vpop.f32.mrf.mxu0 }
0x11b1   : > { %v9058_v14 = vld [vmem:[%s11774_s17 + $0x10] sm:$0xff] }
0x11b2   : > { %v7455_v22 = vpop.f32.mrf.mxu0  ;;  %v7613_v17 = vpop.f32.mrf.mxu1 }
0x11b3   : > { %v7505_v11 = vadd.f32 %v7504_v23, %v7455_v22 }
0x11b4   : > { %v9785_v24 = vpop.f32.mrf.mxu0  ;;  %v9802_v25 = vpop.f32.mrf.mxu1 }
0x11b6   : > { %v7556_v30 = vpop.f32.mrf.mxu0  ;;  %v7616_v56 = vpop.f32.mrf.mxu1 }
0x11b7   : > { %v7563_v6 = vadd.f32 %v7556_v30, %v7502_v33 }
0x11b8   : > { %v9796_v60 = vpop.f32.mrf.mxu0  ;;  %v9803_v18 = vpop.f32.mrf.mxu1 }
0x11b9   : > { %v7620_v39 = vadd.f32 %v7613_v17, %v7563_v6  ;;  %v9059_v60 = vld [vmem:[%s11774_s17 + $0x18] sm:$0xff] }
0x11ba   : > { %v7559_v26 = vpop.f32.mrf.mxu0  ;;  %v7727_v31 = vpop.f32.mrf.mxu1 }
0x11bb   : > { %v7564_v40 = vadd.f32 %v7559_v26, %v7505_v11  ;;  %v9985_v26 = vld [vmem:[%s11887_s0] sm:$0xff]   ;;  %s10103_s0 = smov [#allocation9]  }
0x11bc   : > { %v9797_v27 = vpop.f32.mrf.mxu0  ;;  %v9814_v34 = vpop.f32.mrf.mxu1 }
0x11bd   : > { %v7621_v35 = vadd.f32 %v7616_v56, %v7564_v40  ;;  %v8018_v56 = vld [vmem:[%s11774_s17 + $0x8] sm:$0xff] }
0x11be   : > { %v7670_v20 = vpop.f32.mrf.mxu0  ;;  %v7730_v37 = vpop.f32.mrf.mxu1 }
0x11bf   : > { %v7677_v16 = vadd.f32 %v7670_v20, %v7620_v39 }
0x11c0   : > { %v9808_v21 = vpop.f32.mrf.mxu0  ;;  %v9815_v29 = vpop.f32.mrf.mxu1 }
0x11c1   : > { %v7734_v45 = vadd.f32 %v7727_v31, %v7677_v16 }
0x11c2   : > { %v7673_v32 = vpop.f32.mrf.mxu0  ;;  %v7841_v41 = vpop.f32.mrf.mxu1 }
0x11c3   : > { %v7678_v38 = vadd.f32 %v7673_v32, %v7621_v35  ;;  %v9987_v35 = vld [vmem:[%s11766_s9 + $0x20] sm:$0xff]  }
0x11c4   : > { %v9809_v42 = vpop.f32.mrf.mxu0  ;;  %v9826_v28 = vpop.f32.mrf.mxu1 }
0x11c5   : > { %v7735_v53 = vadd.f32 %v7730_v37, %v7678_v38  ;;  %v9986_v28 = vld [vmem:[%s11766_s9] sm:$0xff]  }
0x11c6   : > { %v7784_v36 = vpop.f32.mrf.mxu0  ;;  %v7844_v43 = vpop.f32.mrf.mxu1  ;;  %9842 = vmatprep.mubr.msk.bf16.mxu0 %vm3804_vm7, %v9986_v28  ;;  %v9076_v38 = vld [vmem:[%s11775_s18 + $0x80] sm:$0xff] }
0x11c7   : > { %v7791_v48 = vadd.f32 %v7784_v36, %v7734_v45  ;;  %v8269_v36 = vld [vmem:[%s11775_s18 + $0x10] sm:$0xff]  ;;  %v9077_v45 = vld [vmem:[%s11775_s18 + $0x88] sm:$0xff] }
0x11c8   : > { %v9820_v44 = vpop.f32.mrf.mxu0  ;;  %v9827_v47 = vpop.f32.mrf.mxu1 }
0x11c9   : > { %v7848_v59 = vadd.f32 %v7841_v41, %v7791_v48  ;;  %v9078_v44 = vld [vmem:[%s11775_s18 + $0x90] sm:$0xff]  ;;  %v8270_v47 = vld [vmem:[%s11775_s18 + $0x18] sm:$0xff] }
0x11ca   : > { %v7787_v50 = vpop.f32.mrf.mxu0  ;;  %v9079_v48 = vld [vmem:[%s11775_s18 + $0x98] sm:$0xff] }
0x11cb   : > { %v7792_v0 = vadd.f32 %v7787_v50, %v7735_v53  ;;  %v8271_v50 = vld [vmem:[%s11775_s18 + $0x20] sm:$0xff] }
0x11cc   : > { %v9821_v55 = vpop.f32.mrf.mxu0  ;;  %v9080_v53 = vld [vmem:[%s11775_s18 + $0xa0] sm:$0xff] }
0x11cd   : > { %v7849_v7 = vadd.f32 %v7844_v43, %v7792_v0  ;;  %v8268_v43 = vld [vmem:[%s11775_s18 + $0x8] sm:$0xff]  ;;  %v9082_v0 = vld [vmem:[%s11775_s18 + $0xb0] sm:$0xff] }
0x11ce   : > { %v7898_v62 = vpop.f32.mrf.mxu0  ;;  %v9081_v55 = vld [vmem:[%s11775_s18 + $0xa8] sm:$0xff] }
0x11cf   : > { %v7905_v63 = vadd.f32 %v7898_v62, %v7848_v59  ;;  %v8273_v59 = vld [vmem:[%s11775_s18 + $0x30] sm:$0xff]  ;;  %v8274_v62 = vld [vmem:[%s11775_s18 + $0x38] sm:$0xff] }
0x11d0   : > { %v9832_v4 = vpop.f32.mrf.mxu0 }
0x11d1   : > { %v7919_v8 = vmul.f32 %v7912_v54, %v7905_v63  ;;  %v8272_v54 = vld [vmem:[%s11775_s18 + $0x28] sm:$0xff]  ;;  %v9083_v63 = vld [vmem:[%s11775_s18 + $0xb8] sm:$0xff]  ;;  %v9084_v4 = vld [vmem:[%s11775_s18 + $0xc0] sm:$0xff] }
0x11d2   : > { %v7901_v46 = vpop.f32.mrf.mxu0 }
0x11d3   : > { %v7934_v57 = vadd.f32 %v7927_v9, %v7919_v8  ;;  %v7906_v49 = vadd.f32 %v7901_v46, %v7849_v7  ;;  %v8276_v7 = vld [vmem:[%s11775_s18 + $0x48] sm:$0xff]  ;;  %v8277_v9 = vld [vmem:[%s11775_s18 + $0x50] sm:$0xff] }
0x11d4   : > { %v9833_v58 = vpop.f32.mrf.mxu0  ;;  %v9085_v8 = vld [vmem:[%s11775_s18 + $0xc8] sm:$0xff]  ;;  %v9086_v46 = vld [vmem:[%s11775_s18 + $0xd0] sm:$0xff] }
0x11d5   : > { %v7936_v2 = vmul.f32 0.1, %v7934_v57  ;;  %v7920_v10 = vmul.f32 %v7917_v1, %v7906_v49  ;;  %v8275_v1 = vld [vmem:[%s11775_s18 + $0x40] sm:$0xff]  ;;  %v9087_v49 = vld [vmem:[%s11775_s18 + $0xd8] sm:$0xff] }
0x11d6   : > { %v8279_v58 = vld [vmem:[%s11775_s18 + $0x60] sm:$0xff] }
0x11d7   : > { %v7938_v52 = vmax.f32 %v7934_v57, %v7936_v2  ;;  %v7935_v15 = vadd.f32 %v7932_v51, %v7920_v10  ;;  %v8278_v57 = vld [vmem:[%s11775_s18 + $0x58] sm:$0xff]  ;;  %v9088_v2 = vld [vmem:[%s11775_s18 + $0xe0] sm:$0xff]  ;;  %v8280_v10 = vld [vmem:[%s11775_s18 + $0x68] sm:$0xff] }
0x11d8   : > { %v9089_v51 = vld [vmem:[%s11775_s18 + $0xe8] sm:$0xff] }
0x11d9   : > { %v7937_v19 = vmul.f32 0.1, %v7935_v15  ;;  %v7946_v13 = vmul.f32 %v9055_v3, %v7938_v52  ;;  %v9090_v52 = vld [vmem:[%s11775_s18 + $0xf0] sm:$0xff] }
0x11db   : > { %v7939_v23 = vmax.f32 %v7935_v15, %v7937_v19  ;;  %7950 = vrot.lane.b32.xlu0 %v7946_v13, %s10093_s13  ;;  %v8282_v15 = vld [vmem:[%s11775_s18 + $0x78] sm:$0xff] }
0x11dc   : > { %v9091_v19 = vld [vmem:[%s11775_s18 + $0xf8] sm:$0xff] }
0x11dd   : > { %v7947_v5 = vmul.f32 %v9055_v3, %v7939_v23  ;;  %v8281_v3 = vld [vmem:[%s11775_s18 + $0x70] sm:$0xff] }
0x11df   : > { %7952 = vrot.lane.b32.xlu1 %v7947_v5, %s10093_s13  ;;  %s9092_s13 = sshll.u32 %s10250_s6, 4 }
0x11e3   : > { %8021 = vperm.xlu1 %9947, %v8017_v12  }
0x11e7   : > { %8036 = vperm.xlu1 %9947, %v9058_v14  }
0x124d   : > { %v7951_v22 = vpop.permute.xlu0 %7950 }
0x124e   : > { %7957 = vst.msk [vmem:[#allocation7] sm:$0xff] %vm7956_vm0, %v7951_v22 }
0x1251   : > { %v7953_v17 = vpop.permute.xlu1 %7952 }
0x1252   : > { %7958 = vst.msk [vmem:[#allocation7 + $0x8] sm:$0xff] %vm7956_vm0, %v7953_v17 }
0x1255   : > { %v7959_v24 = vld [vmem:[#allocation7] sm:$0xff] }
0x1259   : > { %v7960_v25 = vld [vmem:[#allocation7 + $0x8] sm:$0xff] }
0x125a   : > { %v7961_v30 = vpack.c.bf16 %v7960_v25, %v7959_v24 }
0x125c   : > { %7970 = vrot.lane.b32.xlu0 %v7961_v30, %s10097_s5  ;;  %s10102_s5 = smov 7  }
0x125e   : > { %v8022_v31 = vpop.permute.xlu1 %8021 }
0x1260   : > { %8026 = vperm.xlu0 %9946, %v8018_v56  }
0x1262   : > { %v8037_v6 = vpop.permute.xlu1 %8036 }
0x1264   : > { %8041 = vperm.xlu0 %9946, %v9059_v60   ;;  %v9988_v60 = vld [vmem:[%s11766_s9 + $0x8] sm:$0xff]  }
0x12ce   : > { %v7971_v18 = vpop.permute.xlu0 %7970 }
0x12cf   : > { %9835 = vmatpush3.bf16.msra.mxu1 %v7971_v18  ;;  %v9989_v18 = vld [vmem:[%s11766_s9 + $0x28] sm:$0xff]  }
0x12d2   : > { %9837 = vmatmul.mubr.msk.bf16.vlgmr.msra.gmra.mxu1 %vm3804_vm7, %v9985_v26  ;;  %v9990_v26 = vld [vmem:[%s11766_s9 + $0x10] sm:$0xff]  }
0x12d3   : > { %9850 = vmatprep.mubr.msk.bf16.mxu1 %vm3804_vm7, %v9987_v35 }
0x12db   : > { %v8027_v33 = vpop.permute.xlu0 %8026 }
0x12df   : > { %v8042_v39 = vpop.permute.xlu0 %8041 }
0x1392   : > { %v8010_v27 = vpop.f32.mrf.mxu1 }
0x1393   : > { %v8029_v34 = vmul.f32 %v8022_v31, %v8010_v27  ;;  %v9991_v31 = vld [vmem:[%s11766_s9 + $0x30] sm:$0xff]   ;;  %v9993_v27 = vld [vmem:[%s11766_s9 + $0x38] sm:$0xff]  }
0x1394   : > { %v9838_v20 = vpop.f32.mrf.mxu1 }
0x1395   : > { %v8044_v37 = vadd.f32 %v8037_v6, %v8029_v34 }
0x1396   : > { %v8013_v11 = vpop.f32.mrf.mxu1 }
0x1397   : > { %v8046_v21 = vmul.f32 0.1, %v8044_v37  ;;  %v8030_v29 = vmul.f32 %v8027_v33, %v8013_v11  ;;  %v9992_v33 = vld [vmem:[%s11766_s9 + $0x18] sm:$0xff]  }
0x1398   : > { %v9839_v40 = vpop.f32.mrf.mxu1 }
0x1399   : > { %v8048_v32 = vmax.f32 %v8044_v37, %v8046_v21  ;;  %v8045_v41 = vadd.f32 %v8042_v39, %v8030_v29 }
0x139b   : > { %v8047_v16 = vmul.f32 0.1, %v8045_v41  ;;  %8052 = vrot.lane.b32.xlu1 %v8048_v32, %s10102_s5 }
0x139d   : > { %v8049_v42 = vmax.f32 %v8045_v41, %v8047_v16 }
0x139f   : > { %8061 = vrot.lane.b32.xlu1 %v8048_v32, %s10094_s19  ;;  %8054 = vrot.lane.b32.xlu0 %v8049_v42, %s10102_s5  ;;  %s9999_s5 = sshll.u32 %s10103_s0, 4  ;;  %s10000_s5 = int_to_ptr.vmem [resolvable:$false] %s9999_s5 }
0x13a0   : > { %s10001_s6 = scalar_lea.vmem %s10000_s5, 32  ;;  %p10002_p0 = scmp.lt.s32.totalorder %s8676_s8, %s10000_s5 }
0x13a1   : > { %p10003_p1 = scmp.lt.s32.totalorder %s10001_s6, %s9995_s20 }
0x13a3   : > { %8069 = vrot.lane.b32.xlu1 %v8048_v32, %s11883_s11  ;;  %8063 = vrot.lane.b32.xlu0 %v8049_v42, %s10094_s19  ;;  %p10004_p2 = por %p10003_p1, %p10002_p0 }
0x13a5   : > { %p10005_p3 = pnand %p10004_p2, %p9998_p13 }
0x13a7   : > { %8078 = vrot.lane.b32.xlu1 %v8048_v32, %s11888_s4  ;;  %8071 = vrot.lane.b32.xlu0 %v8049_v42, %s11883_s11  ;;  %s8673_s11 = scalar_lea.hbm %s11781_s24, %s9092_s13 }
0x13ab   : > { %8285 = vperm.xlu1 %9947, %v8267_v61   ;;  %8080 = vrot.lane.b32.xlu0 %v8049_v42, %s11888_s4 }
0x13af   : > { %8295 = vperm.xlu1 %9947, %v8269_v36   ;;  %8290 = vperm.xlu0 %9946, %v8268_v43  }
0x13b3   : > { %8403 = vperm.xlu1 %9947, %v9077_v45   ;;  %8398 = vperm.xlu0 %9946, %v9076_v38  }
0x13b7   : > { %8408 = vperm.xlu1 %9947, %v9078_v44   ;;  %8300 = vperm.xlu0 %9946, %v8270_v47  }
0x13bb   : > { %8413 = vperm.xlu1 %9947, %v9079_v48   ;;  %8305 = vperm.xlu0 %9946, %v8271_v50  }
0x13bf   : > { %8418 = vperm.xlu1 %9947, %v9080_v53   ;;  %8310 = vperm.xlu0 %9946, %v8272_v54  }
0x13c3   : > { %8423 = vperm.xlu1 %9947, %v9081_v55   ;;  %8315 = vperm.xlu0 %9946, %v8273_v59  }
0x13c7   : > { %8428 = vperm.xlu1 %9947, %v9082_v0   ;;  %8320 = vperm.xlu0 %9946, %v8274_v62  }
0x13cb   : > { %8433 = vperm.xlu1 %9947, %v9083_v63   ;;  %8325 = vperm.xlu0 %9946, %v8275_v1  }
0x13cf   : > { %8438 = vperm.xlu1 %9947, %v9084_v4   ;;  %8330 = vperm.xlu0 %9946, %v8276_v7  }
0x13d3   : > { %8443 = vperm.xlu1 %9947, %v9085_v8   ;;  %8335 = vperm.xlu0 %9946, %v8277_v9  }
0x13d7   : > { %8448 = vperm.xlu1 %9947, %v9086_v46   ;;  %8340 = vperm.xlu0 %9946, %v8278_v57  }
0x13db   : > { %8453 = vperm.xlu1 %9947, %v9087_v49   ;;  %8345 = vperm.xlu0 %9946, %v8279_v58  }
0x13df   : > { %8458 = vperm.xlu1 %9947, %v9088_v2   ;;  %8350 = vperm.xlu0 %9946, %v8280_v10  }
0x13e3   : > { %8463 = vperm.xlu1 %9947, %v9089_v51   ;;  %8355 = vperm.xlu0 %9946, %v8281_v3  }
0x13e7   : > { %8468 = vperm.xlu1 %9947, %v9090_v52   ;;  %8360 = vperm.xlu0 %9946, %v8282_v15  }
0x13eb   : > { %8473 = vperm.xlu0 %9946, %v9091_v19  }
0x140d   : > { %v8053_v13 = vpop.permute.xlu1 %8052 }
0x140e   : > { %8059 = vst.msk [vmem:[#allocation8] sm:$0xff] %vm8058_vm11, %v8053_v13 }
0x1411   : > { %v8062_v23 = vpop.permute.xlu1 %8061  ;;  %v8055_v5 = vpop.permute.xlu0 %8054 }
0x1412   : > { %8067 = vst.msk [vmem:[#allocation8] sm:$0xff] %vm7224_vm8, %v8062_v23 }
0x1413   : > { %8060 = vst.msk [vmem:[#allocation8 + $0x8] sm:$0xff] %vm8058_vm11, %v8055_v5 }
0x1415   : > { %v8070_v12 = vpop.permute.xlu1 %8069  ;;  %v8064_v14 = vpop.permute.xlu0 %8063 }
0x1416   : > { %8076 = vst.msk [vmem:[#allocation8] sm:$0xff] %vm8075_vm12, %v8070_v12 }
0x1417   : > { %8068 = vst.msk [vmem:[#allocation8 + $0x8] sm:$0xff] %vm7224_vm8, %v8064_v14 }
0x1419   : > { %v8079_v22 = vpop.permute.xlu1 %8078  ;;  %v8072_v17 = vpop.permute.xlu0 %8071 }
0x141a   : > { %8085 = vst.msk [vmem:[#allocation8] sm:$0xff] %vm8084_vm13, %v8079_v22 }
0x141b   : > { %8077 = vst.msk [vmem:[#allocation8 + $0x8] sm:$0xff] %vm8075_vm12, %v8072_v17 }
0x141d   : > { %v8081_v24 = vpop.permute.xlu0 %8080 }
0x141e   : > { %8086 = vst.msk [vmem:[#allocation8 + $0x8] sm:$0xff] %vm8084_vm13, %v8081_v24 }
0x1421   : > { %v8087_v25 = vld [vmem:[#allocation8] sm:$0xff] }
0x1425   : > { %v8088_v30 = vld [vmem:[#allocation8 + $0x8] sm:$0xff] }
0x1426   : > { %v8089_v56 = vpack.c.bf16 %v8088_v30, %v8087_v25  ;;  %v8286_v6 = vpop.permute.xlu1 %8285 }
0x1428   : > { %9840 = vmatprep.subr.bf16.mxu0 %v8089_v56  ;;  %9858 = vmatprep.subr.bf16.mxu1 %v8089_v56 }
0x1429   : > { %9841 = vmatpush3.bf16.msra.mxu0 %v8089_v56  ;;  %9859 = vmatpush3.bf16.msra.mxu1 %v8089_v56 }
0x142a   : > { %v8291_v34 = vpop.permute.xlu0 %8290  ;;  %v8296_v37 = vpop.permute.xlu1 %8295 }
0x142c   : > { %9843 = vmatmul.mubr.msk.bf16.vlgmr.msra.gmra.mxu0 %vm3804_vm7, %v9988_v60  ;;  %9851 = vmatmul.mubr.msk.bf16.vlgmr.msra.gmra.mxu1 %vm3804_vm7, %v9989_v18 }
0x142d   : > { %9846 = vmatprep.mubr.msk.bf16.mxu0 %vm3804_vm7, %v9990_v26  ;;  %9854 = vmatprep.mubr.msk.bf16.mxu1 %vm3804_vm7, %v9991_v31 }
0x142e   : > { %v8399_v20 = vpop.permute.xlu0 %8398  ;;  %v8404_v21 = vpop.permute.xlu1 %8403 }
0x1432   : > { %v8301_v11 = vpop.permute.xlu0 %8300  ;;  %v8409_v39 = vpop.permute.xlu1 %8408 }
0x1434   : > { %9847 = vmatmul.mubr.msk.bf16.gmra.mxu0 %vm3804_vm7, %v9992_v33  ;;  %9855 = vmatmul.mubr.msk.bf16.gmra.mxu1 %vm3804_vm7, %v9993_v27  ;;  %vm8620_vm7 = vcmask 80896  }
0x1436   : > { %v8306_v29 = vpop.permute.xlu0 %8305  ;;  %v8414_v32 = vpop.permute.xlu1 %8413 }
0x143a   : > { %v8311_v40 = vpop.permute.xlu0 %8310  ;;  %v8419_v16 = vpop.permute.xlu1 %8418 }
0x143e   : > { %v8316_v41 = vpop.permute.xlu0 %8315  ;;  %v8424_v61 = vpop.permute.xlu1 %8423 }
0x1442   : > { %v8321_v42 = vpop.permute.xlu0 %8320  ;;  %v8429_v35 = vpop.permute.xlu1 %8428 }
0x1446   : > { %v8326_v28 = vpop.permute.xlu0 %8325  ;;  %v8434_v43 = vpop.permute.xlu1 %8433 }
0x144a   : > { %v8331_v36 = vpop.permute.xlu0 %8330  ;;  %v8439_v38 = vpop.permute.xlu1 %8438 }
0x144e   : > { %v8336_v45 = vpop.permute.xlu0 %8335  ;;  %v8444_v50 = vpop.permute.xlu1 %8443 }
0x1452   : > { %v8341_v44 = vpop.permute.xlu0 %8340  ;;  %v8449_v9 = vpop.permute.xlu1 %8448 }
0x1456   : > { %v11634_v63 = vpop.permute.xlu0 %8345  ;;  %v8454_v25 = vpop.permute.xlu1 %8453 }
0x145a   : > { %v8351_v19 = vpop.permute.xlu0 %8350 }
0x14ec   : > { %v9844_v47 = vpop.f32.mrf.mxu0  ;;  %v9852_v48 = vpop.f32.mrf.mxu1 }
0x14ed   : > { %v8365_v55 = vmul.f32 %v9844_v47, %v8296_v37 }
0x14ee   : > { %v8204_v53 = vpop.f32.mrf.mxu0  ;;  %v8236_v54 = vpop.f32.mrf.mxu1 }
0x14ef   : > { %v8363_v59 = vmul.f32 %v8286_v6, %v8204_v53  ;;  %v8478_v46 = vadd.f32 %v8409_v39, %v8365_v55  ;;  %v8371_v56 = vmul.f32 %v8326_v28, %v8236_v54  ;;  %v8356_v39 = vpop.permute.xlu0 %8355 }
0x14f0   : > { %v9845_v0 = vpop.f32.mrf.mxu0  ;;  %v9853_v62 = vpop.f32.mrf.mxu1 }
0x14f1   : > { %v8476_v1 = vadd.f32 %v8399_v20, %v8363_v59  ;;  %v8366_v4 = vmul.f32 %v9845_v0, %v8301_v11  ;;  %v8494_v13 = vmul.f32 0.1, %v8478_v46 }
0x14f2   : > { %v8207_v7 = vpop.f32.mrf.mxu0  ;;  %v8239_v8 = vpop.f32.mrf.mxu1 }
0x14f3   : > { %v8492_v57 = vmul.f32 0.1, %v8476_v1  ;;  %v8364_v49 = vmul.f32 %v8291_v34, %v8207_v7  ;;  %v8479_v58 = vadd.f32 %v8414_v32, %v8366_v4  ;;  %v8372_v31 = vmul.f32 %v8331_v36, %v8239_v8 }
0x14f4   : > { %v9848_v2 = vpop.f32.mrf.mxu0  ;;  %v11636_v10 = vpop.f32.mrf.mxu1  ;;  %v8510_v34 = vmax.f32 %v8478_v46, %v8494_v13  ;;  %v8373_v32 = vmul.f32 %v9852_v48, %v8336_v45 }
0x14f5   : > { %v8477_v51 = vadd.f32 %v8404_v21, %v8364_v49  ;;  %v8495_v3 = vmul.f32 0.1, %v8479_v58  ;;  %v8508_v15 = vmax.f32 %v8476_v1, %v8492_v57  ;;  %v8369_v5 = vmul.f32 %v9848_v2, %v8316_v41 }
0x14f6   : > { %v8220_v52 = vpop.f32.mrf.mxu0  ;;  %v8252_v14 = vpop.f32.mrf.mxu1  ;;  %v8374_v41 = vmul.f32 %v9853_v62, %v8341_v44  ;;  %v8486_v55 = vadd.f32 %v8449_v9, %v8373_v32 }
0x14f7   : > { %v8493_v23 = vmul.f32 0.1, %v8477_v51  ;;  %v8367_v12 = vmul.f32 %v8306_v29, %v8220_v52  ;;  %v8524_v17 = vsel %vm753_vm10, %v8508_v15, 0.0  ;;  %v8511_v24 = vmax.f32 %v8479_v58, %v8495_v3  ;;  %v8361_v44 = vpop.permute.xlu0 %8360 }
0x14f8   : > { %v9849_v22 = vpop.f32.mrf.mxu0  ;;  %8525 = vadd.xlane.f32.xlu1 %v8524_v17  ;;  %v8482_v6 = vadd.f32 %v8429_v35, %v8369_v5  ;;  %v9857_v37 = vpop.f32.mrf.mxu1  ;;  %v8530_v35 = vsel %vm753_vm10, %v8510_v34, 0.0  ;;  %v8487_v59 = vadd.f32 %v8454_v25, %v8374_v41  ;;  %v8502_v7 = vmul.f32 0.1, %v8486_v55 }
0x14f9   : > { %v8370_v30 = vmul.f32 %v9849_v22, %v8321_v42  ;;  %v8480_v60 = vadd.f32 %v8419_v16, %v8367_v12  ;;  %v8509_v26 = vmax.f32 %v8477_v51, %v8493_v23  ;;  %v8533_v21 = vsel %vm753_vm10, %v8511_v24, 0.0  ;;  %v8459_v16 = vpop.permute.xlu1 %8458 }
0x14fa   : > { %v8223_v18 = vpop.f32.mrf.mxu0  ;;  %v8485_v42 = vadd.f32 %v8444_v50, %v8372_v31  ;;  %v8255_v47 = vpop.f32.mrf.mxu1  ;;  %v8375_v50 = vmul.f32 %v11634_v63, %v8252_v14  ;;  %v8503_v8 = vmul.f32 0.1, %v8487_v59  ;;  %v8378_v46 = vmul.f32 %v9857_v37, %v8361_v44 }
0x14fb   : > { %v8483_v33 = vadd.f32 %v8434_v43, %v8370_v30  ;;  %v8368_v27 = vmul.f32 %v8311_v40, %v8223_v18  ;;  %v8496_v20 = vmul.f32 0.1, %v8480_v60  ;;  %v8527_v11 = vsel %vm753_vm10, %v8509_v26, 0.0  ;;  %v8474_v3 = vpop.permute.xlu0 %8473 }
0x14fc   : > { %8528 = vadd.xlane.f32.xlu0 %v8527_v11  ;;  %8534 = vadd.xlane.f32.xlu1 %v8533_v21  ;;  %v8484_v43 = vadd.f32 %v8439_v38, %v8371_v56  ;;  %v8498_v40 = vmul.f32 0.1, %v8482_v6  ;;  %v8376_v0 = vmul.f32 %v8351_v19, %v8255_v47  ;;  %v8377_v58 = vmul.f32 %v11636_v10, %v8356_v39  ;;  %v8589_v11 = vld [vmem:[%s11779_s22 + $0x8] sm:$0xff] }
0x14fd   : > { %v8481_v29 = vadd.f32 %v8424_v61, %v8368_v27  ;;  %v8499_v28 = vmul.f32 0.1, %v8483_v33  ;;  %v8512_v53 = vmax.f32 %v8480_v60, %v8496_v20  ;;  %v8501_v61 = vmul.f32 0.1, %v8485_v42  ;;  %v8464_v4 = vpop.permute.xlu1 %8463  ;;  %v8588_v20 = vld [vmem:[%s11779_s22] sm:$0xff] }
0x14fe   : > { %v8500_v48 = vmul.f32 0.1, %v8484_v43  ;;  %v8514_v62 = vmax.f32 %v8482_v6, %v8498_v40  ;;  %v8489_v9 = vadd.f32 %v8464_v4, %v8376_v0  ;;  %v8488_v2 = vadd.f32 %v8459_v16, %v8375_v50  ;;  %v8591_v16 = vld [vmem:[%s11779_s22 + $0x18] sm:$0xff] }
0x14ff   : > { %v8497_v36 = vmul.f32 0.1, %v8481_v29  ;;  %v8515_v45 = vmax.f32 %v8483_v33, %v8499_v28  ;;  %v8536_v38 = vsel %vm753_vm10, %v8512_v53, 0.0  ;;  %v8517_v49 = vmax.f32 %v8485_v42, %v8501_v61  ;;  %v8590_v42 = vld [vmem:[%s11779_s22 + $0x10] sm:$0xff]  ;;  %v8592_v61 = vld [vmem:[%s11779_s22 + $0x20] sm:$0xff] }
0x1500   : > { %8531 = vadd.xlane.f32.xlu0 %v8530_v35  ;;  %v8542_v51 = vsel %vm753_vm10, %v8514_v62, 0.0  ;;  %v8516_v63 = vmax.f32 %v8484_v43, %v8500_v48  ;;  %v8491_v15 = vadd.f32 %v8474_v3, %v8378_v46  ;;  %v8505_v19 = vmul.f32 0.1, %v8489_v9  ;;  %v8594_v46 = vld [vmem:[%s11779_s22 + $0x30] sm:$0xff] }
0x1501   : > { %v8513_v54 = vmax.f32 %v8481_v29, %v8497_v36  ;;  %v8545_v57 = vsel %vm753_vm10, %v8515_v45, 0.0  ;;  %v8469_v52 = vpop.permute.xlu1 %8468  ;;  %v8551_v13 = vsel %vm753_vm10, %v8517_v49, 0.0  ;;  %v8519_v23 = vmax.f32 %v8487_v59, %v8503_v8 }
0x1502   : > { %v8490_v5 = vadd.f32 %v8469_v52, %v8377_v58  ;;  %v8504_v12 = vmul.f32 0.1, %v8488_v2  ;;  %v8548_v14 = vsel %vm753_vm10, %v8516_v63, 0.0  ;;  %v8518_v22 = vmax.f32 %v8486_v55, %v8502_v7  ;;  %v8593_v55 = vld [vmem:[%s11779_s22 + $0x28] sm:$0xff]  ;;  %v8595_v7 = vld [vmem:[%s11779_s22 + $0x38] sm:$0xff] }
0x1503   : > { %v8539_v1 = vsel %vm753_vm10, %v8513_v54, 0.0  ;;  %v8507_v10 = vmul.f32 0.1, %v8491_v15  ;;  %v8557_v17 = vsel %vm753_vm10, %v8519_v23, 0.0  ;;  %v8521_v24 = vmax.f32 %v8489_v9, %v8505_v19 }
0x1504   : > { %8540 = vadd.xlane.f32.xlu1 %v8539_v1  ;;  %8537 = vadd.xlane.f32.xlu0 %v8536_v38  ;;  %v8506_v25 = vmul.f32 0.1, %v8490_v5  ;;  %v8554_v30 = vsel %vm753_vm10, %v8518_v22, 0.0  ;;  %v8520_v56 = vmax.f32 %v8488_v2, %v8504_v12 }
0x1505   : > { %v8563_v60 = vsel %vm753_vm10, %v8521_v24, 0.0  ;;  %v8523_v18 = vmax.f32 %v8491_v15, %v8507_v10  ;;  %v8596_v15 = vld [vmem:[%s11779_s22 + $0x40] sm:$0xff] }
0x1506   : > { %v8560_v26 = vsel %vm753_vm10, %v8520_v56, 0.0  ;;  %v8522_v31 = vmax.f32 %v8490_v5, %v8506_v25 }
0x1507   : > { %v8569_v33 = vsel %vm753_vm10, %v8523_v18, 0.0 }
0x1508   : > { %8546 = vadd.xlane.f32.xlu1 %v8545_v57  ;;  %8543 = vadd.xlane.f32.xlu0 %v8542_v51  ;;  %v8566_v27 = vsel %vm753_vm10, %v8522_v31, 0.0 }
0x150c   : > { %8552 = vadd.xlane.f32.xlu1 %v8551_v13  ;;  %8549 = vadd.xlane.f32.xlu0 %v8548_v14  ;;  %v8597_v13 = vld [vmem:[%s11779_s22 + $0x48] sm:$0xff] }
0x1510   : > { %8558 = vadd.xlane.f32.xlu1 %v8557_v17  ;;  %8555 = vadd.xlane.f32.xlu0 %v8554_v30  ;;  %v8598_v30 = vld [vmem:[%s11779_s22 + $0x50] sm:$0xff] }
0x1514   : > { %8564 = vadd.xlane.f32.xlu1 %v8563_v60  ;;  %8561 = vadd.xlane.f32.xlu0 %v8560_v26  ;;  %v8599_v60 = vld [vmem:[%s11779_s22 + $0x58] sm:$0xff] }
0x1518   : > { %8570 = vadd.xlane.f32.xlu1 %v8569_v33  ;;  %8567 = vadd.xlane.f32.xlu0 %v8566_v27 }
0x1581   : > { %v8526_v34 = vpop.xlane.xlu1 %8525 }
0x1582   : > { %v8572_v6 = vmul.f32 0.027777778, %v8526_v34 }
0x1584   : > { %v8604_v39 = vmul.f32 %v8588_v20, %v8572_v6 }
0x1585   : > { %v8535_v37 = vpop.xlane.xlu1 %8534  ;;  %v8529_v21 = vpop.xlane.xlu0 %8528 }
0x1586   : > { %v8573_v29 = vmul.f32 0.027777778, %v8529_v21  ;;  %v8575_v32 = vmul.f32 0.027777778, %v8535_v37  ;;  %v8621_v40 = vsel %vm8620_vm7, %v8604_v39, 0.0 }
0x1588   : > { %v8605_v41 = vmul.f32 %v8589_v11, %v8573_v29  ;;  %v8607_v47 = vmul.f32 %v8591_v16, %v8575_v32  ;;  %v8600_v11 = vld [vmem:[%s11779_s22 + $0x60] sm:$0xff]  ;;  %v8601_v29 = vld [vmem:[%s11779_s22 + $0x68] sm:$0xff] }
0x1589   : > { %v8532_v28 = vpop.xlane.xlu0 %8531 }
0x158a   : > { %v8622_v36 = vsel %vm8620_vm7, %v8605_v41, 0.0  ;;  %v8574_v43 = vmul.f32 0.027777778, %v8532_v28  ;;  %v8626_v48 = vsel %vm8620_vm7, %v8607_v47, 0.0  ;;  %v8602_v47 = vld [vmem:[%s11779_s22 + $0x70] sm:$0xff] }
0x158b   : > { %v8623_v54 = vadd.f32 %v8622_v36, %v8621_v40 }
0x158c   : > { %v8606_v35 = vmul.f32 %v8590_v42, %v8574_v43 }
0x158d   : > { %v8541_v53 = vpop.xlane.xlu1 %8540  ;;  %v8538_v0 = vpop.xlane.xlu0 %8537 }
0x158e   : > { %v8577_v59 = vmul.f32 0.027777778, %v8541_v53  ;;  %v8624_v1 = vsel %vm8620_vm7, %v8606_v35, 0.0  ;;  %v8576_v45 = vmul.f32 0.027777778, %v8538_v0  ;;  %v8603_v53 = vld [vmem:[%s11779_s22 + $0x78] sm:$0xff] }
0x158f   : > { %v8625_v44 = vadd.f32 %v8624_v1, %v8623_v54 }
0x1590   : > { %v8609_v50 = vmul.f32 %v8593_v55, %v8577_v59  ;;  %v8608_v38 = vmul.f32 %v8592_v61, %v8576_v45 }
0x1591   : > { %v8547_v62 = vpop.xlane.xlu1 %8546  ;;  %v8627_v4 = vadd.f32 %v8626_v48, %v8625_v44  ;;  %v8544_v9 = vpop.xlane.xlu0 %8543 }
0x1592   : > { %v8579_v8 = vmul.f32 0.027777778, %v8547_v62  ;;  %v8628_v57 = vsel %vm8620_vm7, %v8608_v38, 0.0  ;;  %v8578_v49 = vmul.f32 0.027777778, %v8544_v9  ;;  %v8630_v2 = vsel %vm8620_vm7, %v8609_v50, 0.0 }
0x1593   : > { %v8629_v58 = vadd.f32 %v8628_v57, %v8627_v4  ;;  %v8658_v57 = vld [vmem:[%s11780_s23] sm:$0x1] }
0x1594   : > { %v8611_v51 = vmul.f32 %v8595_v7, %v8579_v8  ;;  %v8610_v63 = vmul.f32 %v8594_v46, %v8578_v49 }
0x1595   : > { %v8553_v3 = vpop.xlane.xlu1 %8552  ;;  %v8631_v52 = vadd.f32 %v8630_v2, %v8629_v58  ;;  %v8550_v19 = vpop.xlane.xlu0 %8549 }
0x1596   : > { %v8581_v23 = vmul.f32 0.027777778, %v8553_v3  ;;  %v8632_v5 = vsel %vm8620_vm7, %v8610_v63, 0.0  ;;  %v8580_v12 = vmul.f32 0.027777778, %v8550_v19  ;;  %v8634_v22 = vsel %vm8620_vm7, %v8611_v51, 0.0 }
0x1597   : > { %v8633_v14 = vadd.f32 %v8632_v5, %v8631_v52 }
0x1598   : > { %v8612_v10 = vmul.f32 %v8596_v15, %v8580_v12  ;;  %v8613_v17 = vmul.f32 %v8597_v13, %v8581_v23 }
0x1599   : > { %v8559_v24 = vpop.xlane.xlu1 %8558  ;;  %v8635_v25 = vadd.f32 %v8634_v22, %v8633_v14  ;;  %v8556_v56 = vpop.xlane.xlu0 %8555 }
0x159a   : > { %v8583_v18 = vmul.f32 0.027777778, %v8559_v24  ;;  %v8636_v26 = vsel %vm8620_vm7, %v8612_v10, 0.0  ;;  %v8582_v31 = vmul.f32 0.027777778, %v8556_v56  ;;  %v8638_v27 = vsel %vm8620_vm7, %v8613_v17, 0.0 }
0x159b   : > { %v8637_v33 = vadd.f32 %v8636_v26, %v8635_v25 }
0x159c   : > { %v8614_v34 = vmul.f32 %v8598_v30, %v8582_v31  ;;  %v8615_v6 = vmul.f32 %v8599_v60, %v8583_v18 }
0x159d   : > { %v8565_v20 = vpop.xlane.xlu1 %8564  ;;  %v8639_v37 = vadd.f32 %v8638_v27, %v8637_v33  ;;  %v8562_v21 = vpop.xlane.xlu0 %8561 }
0x159e   : > { %v8585_v39 = vmul.f32 0.027777778, %v8565_v20  ;;  %v8640_v32 = vsel %vm8620_vm7, %v8614_v34, 0.0  ;;  %v8584_v41 = vmul.f32 0.027777778, %v8562_v21  ;;  %v8642_v42 = vsel %vm8620_vm7, %v8615_v6, 0.0 }
0x159f   : > { %v8641_v16 = vadd.f32 %v8640_v32, %v8639_v37 }
0x15a0   : > { %v8616_v28 = vmul.f32 %v8600_v11, %v8584_v41  ;;  %v8617_v36 = vmul.f32 %v8601_v29, %v8585_v39 }
0x15a1   : > { %v8571_v43 = vpop.xlane.xlu1 %8570  ;;  %v8643_v40 = vadd.f32 %v8642_v42, %v8641_v16  ;;  %v8568_v35 = vpop.xlane.xlu0 %8567 }
0x15a2   : > { %v8587_v54 = vmul.f32 0.027777778, %v8571_v43  ;;  %v8644_v55 = vsel %vm8620_vm7, %v8616_v28, 0.0  ;;  %v8586_v59 = vmul.f32 0.027777778, %v8568_v35  ;;  %v8646_v0 = vsel %vm8620_vm7, %v8617_v36, 0.0 }
0x15a3   : > { %v8645_v61 = vadd.f32 %v8644_v55, %v8643_v40 }
0x15a4   : > { %v8618_v1 = vmul.f32 %v8602_v47, %v8586_v59  ;;  %v8619_v45 = vmul.f32 %v8603_v53, %v8587_v54 }
0x15a5   : > { %v8647_v44 = vadd.f32 %v8646_v0, %v8645_v61 }
0x15a6   : > { %v8648_v48 = vsel %vm8620_vm7, %v8618_v1, 0.0  ;;  %v8650_v38 = vsel %vm8620_vm7, %v8619_v45, 0.0 }
0x15a7   : > { %v8649_v50 = vadd.f32 %v8648_v48, %v8647_v44 }
0x15a9   : > { %v8651_v62 = vadd.f32 %v8650_v38, %v8649_v50 }
0x15ab   : > { %v8652_v4 = vrot.slane %v8651_v62, 4 }
0x15ad   : > { %v8653_v7 = vadd.f32 %v8652_v4, %v8651_v62 }
0x15af   : > { %v8654_v8 = vrot.slane %v8653_v7, 2 }
0x15b1   : > { %v8655_v46 = vadd.f32 %v8654_v8, %v8653_v7 }
0x15b3   : > { %v8656_v9 = vrot.slane %v8655_v46, 1 }
0x15b5   : > { %v8657_v49 = vadd.f32 %v8656_v9, %v8655_v46 }
0x15b7   : > { %v8659_v58 = vadd.f32 %v8658_v57, %v8657_v49 }
0x15b9   : > { %8661 = vst.msk [vmem:[%s729_s10] sm:$0x1] %vm8660_vm14, %v8659_v58 }
0x15ba   : > { %10008 = shalt.err (!%p10005_p3)
}
0x15bb   : > { %s10009_s4 = scalar_lea.hbm %s8673_s11, 16  ;;  %s10013_s7 = scalar_lea.hbm %s11781_s24, 32 }
0x15bc   : > { %p10010_p4 = scmp.ne.s32.totalorder %s8673_s11, %s10009_s4  ;;  %p10014_p9 = scmp.lt.s32.totalorder %s8673_s11, %s11781_s24 }
0x15bd   : > { %p10015_p10 = scmp.lt.s32.totalorder %s10013_s7, %s10009_s4 }
0x15be   : > { %p10011_p7 = pnand %p10010_p4, %p10267_p5 }
0x15bf   : > { %p10016_p11 = por %p10015_p10, %p10014_p9 }
0x15c0   : > { %p10012_p8 = pneg %p10011_p7 }
0x15c2   : > { %p10017_p12 = pnand %p10016_p11, %p10012_p8 }
0x15c4   : > { %10020 = shalt.err (!%p10017_p12)
}
0x15c5   : > { %9861 = dma.vmem_to_hbm [thread:$0]  (%p10267_p5), %s8676_s8, 16, %s8673_s11, %s8663_s12  }
0x15c6 PF: > { %s11889_s19 = sld [smem:[#allocation12_spill]]  ;;  %p9867_p13 = scmp.ge.s32.totalorder %s10055_s28, 2 }
0x15c8   : > { %p9864_p0 = pnand %p9867_p13, %p10271_p6 }
0x15ca   : > { %p9865_p1 = pneg %p9864_p0 }
0x15cc   : > { %s8687_s20 = sand.u32 1, %s11889_s19  }
0x15cd   : > { %s8688_s0 = scalar_lea.sflag [#allocation10], %s8687_s20 }
0x15ce   : > { %10038 = dma.done.wait (%p9865_p1), %s8688_s0, 16  }
0x15cf   : > { %10040 = vsyncadd (%p9865_p1), %s8688_s0, 4294967280  ;;  %s11891_s28 = sld [smem:[#allocation14_spill]]  ;;  %s11894_s5 = smov %s10047_s26 }
0x15d0   : > { %s11892_s6 = sld [smem:[#allocation13_spill]] }
0x15d1   : > { %s11893_s27 = sld [smem:[#allocation15_spill]] }
0x15d5   : > { %p34_p2 = scmp.ge.s32.totalorder %s11891_s28, 4  }
0x15d6   : > { %s11895_s26 = smov %s11892_s6 }
0x15d7   :  { %36 = sbr.rel (!%p34_p2) target bundleno = 19 (0x13), region = 216 }
0x15dc   :  { %8692 = vsyncpa [#allocation10], 1 }
0x15dd   :  { %8694 = vsyncpa [#allocation10 + $0x1], 1 }

</bundles_post_ra>
